<compile_context>
chip_gen: v7x
topology: tpu7x:2x2x1
jax: 0.10.0
libtpu: 0.0.40
codegen_flags: <defaults>
</compile_context>

<pallas_src>
import numpy as np
import jax
import jax.numpy as jnp
from jax import lax
from jax.experimental import pallas as pl
from jax.experimental.pallas import tpu as pltpu


# ---------------- static shapes fixed by the torch module ----------------
R_LEN = 32          # response length -> rows (sublanes) of the transposed sim matrix
L_PAD = 256         # context len (256) / persona len (231, zero-padded) -> lanes
D_EMB = 768
NF = 200            # branch feature size

# fused-pipeline intermediate shapes (transposed layout, "dilated" pooling)
H1, W1 = R_LEN - 2, L_PAD - 2      # conv1 out            : (30, 254)
HQ1, WQ1 = H1 - 1, W1 - 1          # pool1 (dilated) + ReLU: (29, 253)  valid @ even idx
H2, W2 = HQ1 - 4, WQ1 - 4          # conv2 (dilation 2)   : (25, 249)  valid @ even idx
HQ2, WQ2 = H2 - 2, W2 - 2          # pool2 (dilated) + ReLU: (23, 247)  valid @ idx % 4 == 0


# ----------------------------- fused branch kernel -----------------------------

def _fused_branch_kernel(emb_ref, resp_ref, emask_ref, rmask_ref,
                         w1_ref, b1_ref, w2_ref, b2_ref, aw_ref, ab_ref, o_ref):
    br = pl.program_id(0)                       # 0 = context branch, 1 = persona branch

    # ---- masked similarity, lane-dense: s[r, l] = <resp[r], emb[l]>  (bf16 MXU, f32 acc)
    e = emb_ref[0, 0]                           # (L_PAD, D) bf16
    r = resp_ref[0]                             # (R_LEN, D) bf16
    s = lax.dot_general(r, e, (((1,), (1,)), ((), ())),
                        preferred_element_type=jnp.float32)        # (R_LEN, L_PAD) f32
    outer = rmask_ref[0] * emask_ref[0, 0]      # (R_LEN, 1) * (1, L_PAD)
    s = jnp.where(outer != 0.0, s, 0.0)         # masked_fill_(~mask, 0)

    # ---- conv1: 3x3 valid cross-correlation (weights pre-transposed host-side) ----
    c1 = jnp.zeros((H1, W1), jnp.float32) + b1_ref[br]
    for a in range(3):
        for b in range(3):
            c1 = c1 + w1_ref[br, a, b] * s[a:a + H1, b:b + W1]

    # ---- pool1 2x2 (kept dilated: torch (i', j') lives at (2i', 2j')) then ReLU ----
    q1 = jnp.maximum(jnp.maximum(c1[0:HQ1, 0:WQ1], c1[1:1 + HQ1, 0:WQ1]),
                     jnp.maximum(c1[0:HQ1, 1:1 + WQ1], c1[1:1 + HQ1, 1:1 + WQ1]))
    q1 = jnp.maximum(q1, 0.0)

    # ---- conv2 on the dilated grid (taps at 0 / 2 / 4) -----------------------------
    c2 = jnp.zeros((H2, W2), jnp.float32) + b2_ref[br]
    for a in range(3):
        for b in range(3):
            c2 = c2 + w2_ref[br, a, b] * q1[2 * a:2 * a + H2, 2 * b:2 * b + W2]

    # ---- pool2 (stride 2 in dilated coords -> shifts of 2) then ReLU ----------------
    q2 = jnp.maximum(jnp.maximum(c2[0:HQ2, 0:WQ2], c2[2:2 + HQ2, 0:WQ2]),
                     jnp.maximum(c2[0:HQ2, 2:2 + WQ2], c2[2:2 + HQ2, 2:2 + WQ2]))
    q2 = jnp.maximum(q2, 0.0)                   # torch value (h3, w3) sits at (4*w3, 4*h3)

    # ---- flatten + branch affine: the strided gather is folded into the weight -----
    acc = ab_ref[0]                             # (1, NF)
    for w3 in range(6):
        acc = acc + jnp.dot(q2[4 * w3:4 * w3 + 1, :], aw_ref[0, w3],
                            preferred_element_type=jnp.float32)
    o_ref[0, 0] = acc


def fused_branches(emb_all, resp, emask_all, rmask, w1t, b1, w2t, b2, aw, ab):
    BR, B = emb_all.shape[0], emb_all.shape[1]
    smem = pl.BlockSpec(memory_space=pltpu.MemorySpace.SMEM)
    out = pl.pallas_call(
        _fused_branch_kernel,
        out_shape=jax.ShapeDtypeStruct((BR, B, 1, NF), jnp.float32),
        grid=(BR, B),
        in_specs=[
            pl.BlockSpec((1, 1, L_PAD, D_EMB), lambda br, b: (br, b, 0, 0)),  # emb (bf16)
            pl.BlockSpec((1, R_LEN, D_EMB), lambda br, b: (b, 0, 0)),         # resp (bf16)
            pl.BlockSpec((1, 1, 1, L_PAD), lambda br, b: (br, b, 0, 0)),      # emb mask
            pl.BlockSpec((1, R_LEN, 1), lambda br, b: (b, 0, 0)),             # resp mask
            smem,                                                             # w1t (2,3,3)
            smem,                                                             # b1  (2,)
            smem,                                                             # w2t (2,3,3)
            smem,                                                             # b2  (2,)
            pl.BlockSpec((1, 6, WQ2, NF), lambda br, b: (br, 0, 0, 0)),       # expanded aw
            pl.BlockSpec((1, 1, NF), lambda br, b: (br, 0, 0)),               # ab
        ],
        out_specs=pl.BlockSpec((1, 1, 1, NF), lambda br, b: (br, b, 0, 0)),
        compiler_params=pltpu.CompilerParams(
            dimension_semantics=("parallel", "parallel")),
    )(emb_all, resp, emask_all, rmask, w1t, b1, w2t, b2, aw, ab)
    return out.reshape(BR, B, NF)


# --------------------- host-side parameter re-layout for the kernel ---------------------

def prep_kernel_params(p):
    # conv weights transposed because the kernel works on the transposed sim matrix.
    w1t = jnp.stack([p["cr_w1"].T, p["pr_w1"].T])            # (2, 3, 3)
    w2t = jnp.stack([p["cr_w2"].T, p["pr_w2"].T])
    b1 = jnp.stack([p["cr_b1"][0], p["pr_b1"][0]])           # (2,)
    b2 = jnp.stack([p["cr_b2"][0], p["pr_b2"][0]])

    def expand_affine(a, wf):
        # torch flatten of the (1, wf, 6) map is idx = h*6 + w; in the kernel's
        # transposed+dilated layout feature (h, w) sits at row 4*w, col 4*h of the
        # (HQ2, WQ2) tile -> fold that gather into a zero-expanded weight.
        a3 = a.reshape(wf, 6, NF).transpose(1, 0, 2)          # (6, wf, NF) indexed [w, h]
        full = jnp.zeros((6, WQ2, NF), jnp.float32)
        return full.at[:, 0:4 * wf:4, :].set(a3)

    aw = jnp.stack([expand_affine(p["cr_aw"], 62),
                    expand_affine(p["pr_aw"], 56)])           # (2, 6, 247, 200)
    ab = jnp.stack([p["cr_ab"], p["pr_ab"]])                  # (2, 1, 200)
    return dict(w1t=w1t, b1=b1, w2t=w2t, b2=b2, aw=aw, ab=ab)


# ----------------------------------- forward -----------------------------------

def our_model_forward(params, ctx_emb, resp_emb, per_emb, ctx_mask, resp_mask, per_mask):
    B = ctx_emb.shape[0]

    def pad_len(x, target):
        pad = target - x.shape[1]
        if pad == 0:
            return x
        cfg = [(0, 0), (0, pad)] + [(0, 0)] * (x.ndim - 2)
        return jnp.pad(x, cfg)

    emb_all = jnp.stack([pad_len(ctx_emb, L_PAD),
                         pad_len(per_emb, L_PAD)]).astype(jnp.bfloat16)   # (2, B, 256, 768)
    emask_all = jnp.stack([pad_len(ctx_mask, L_PAD),
                           pad_len(per_mask, L_PAD)]).astype(jnp.float32)
    emask_all = emask_all.reshape(2, B, 1, L_PAD)
    resp_bf = resp_emb.astype(jnp.bfloat16)
    rmask = resp_mask.astype(jnp.float32).reshape(B, R_LEN, 1)

    kp = prep_kernel_params(params)
    feats = fused_branches(emb_all, resp_bf, emask_all, rmask,
                           kp["w1t"], kp["b1"], kp["w2t"], kp["b2"],
                           kp["aw"], kp["ab"])                            # (2, B, 200)

    # torch: cat([context_V, persona_V], -1) @ affine_out  (tiny -> plain JAX)
    all_concat = jnp.transpose(feats, (1, 0, 2)).reshape(B, 2 * NF)       # (B, 400)
    out = jnp.dot(all_concat, params["out_w"],
                  precision=lax.Precision.HIGHEST) + params["out_b"]      # (B, 1)
    return jnp.squeeze(out)


# ------------------------- deterministic parameters (torch layout) ------------------------

def init_params(key):
    ks = jax.random.split(key, 14)

    def xavier(k, shape, fan_in, fan_out):
        std = (2.0 / (fan_in + fan_out)) ** 0.5
        return jax.random.normal(k, shape, jnp.float32) * std

    p = {}
    # context-response branch
    p["cr_w1"] = xavier(ks[0], (3, 3), 9, 9)
    p["cr_b1"] = jax.random.normal(ks[1], (1,), jnp.float32) * 0.1
    p["cr_w2"] = xavier(ks[2], (3, 3), 9, 9)
    p["cr_b2"] = jax.random.normal(ks[3], (1,), jnp.float32) * 0.1
    p["cr_aw"] = xavier(ks[4], (6 * 62 * 1, 200), 6 * 62, 200)   # (In, Out), In idx = h*6+w
    p["cr_ab"] = jax.random.normal(ks[5], (1, 200), jnp.float32) * 0.01
    # persona-response branch
    p["pr_w1"] = xavier(ks[6], (3, 3), 9, 9)
    p["pr_b1"] = jax.random.normal(ks[7], (1,), jnp.float32) * 0.1
    p["pr_w2"] = xavier(ks[8], (3, 3), 9, 9)
    p["pr_b2"] = jax.random.normal(ks[9], (1,), jnp.float32) * 0.1
    p["pr_aw"] = xavier(ks[10], (6 * 56 * 1, 200), 6 * 56, 200)
    p["pr_ab"] = jax.random.normal(ks[11], (1, 200), jnp.float32) * 0.01
    # output affine (400 -> 1, implied by the forward path; see TODO at top)
    p["out_w"] = xavier(ks[12], (400, 1), 400, 1)
    p["out_b"] = jax.random.normal(ks[13], (1, 1), jnp.float32) * 0.01
    return p


# ---------------------------- pure-JAX reference (torch layout) ----------------------------

def maxpool2x2(x):
    B, H, W = x.shape
    Ho, Wo = H // 2, W // 2
    x = x[:, : Ho * 2, : Wo * 2].reshape(B, Ho, 2, Wo, 2)
    return jnp.max(x, axis=(2, 4))


def reference_forward(p, ctx_emb, resp_emb, per_emb, ctx_mask, resp_mask, per_mask):
    hi = lax.Precision.HIGHEST

    def sim(e, r, ml, mr):
        # same bf16 cast as the kernel so the check is apples-to-apples
        s = jnp.einsum("bld,brd->blr", e.astype(jnp.bfloat16), r.astype(jnp.bfloat16),
                       preferred_element_type=jnp.float32)
        outer = ml[:, :, None] * mr[:, None, :]
        return jnp.where(outer != 0.0, s, 0.0)

    def conv(x, w, b):
        y = lax.conv_general_dilated(x[:, None], w[None, None], (1, 1), "VALID",
                                     dimension_numbers=("NCHW", "OIHW", "NCHW"),
                                     precision=hi)
        return y[:, 0] + b[0]

    def path(s, w1, b1, w2, b2, aw, ab):
        z = conv(s, w1, b1)
        z = jnp.maximum(maxpool2x2(z), 0.0)
        z = conv(z, w2, b2)
        z = jnp.maximum(maxpool2x2(z), 0.0)
        z = z.reshape(z.shape[0], -1)
        return jnp.dot(z, aw, precision=hi) + ab

    cr = sim(ctx_emb, resp_emb, ctx_mask, resp_mask)
    pr = sim(per_emb, resp_emb, per_mask, resp_mask)
    cv = path(cr, p["cr_w1"], p["cr_b1"], p["cr_w2"], p["cr_b2"], p["cr_aw"], p["cr_ab"])
    pv = path(pr, p["pr_w1"], p["pr_b1"], p["pr_w2"], p["pr_b2"], p["pr_aw"], p["pr_ab"])
    out = jnp.dot(jnp.concatenate([cv, pv], axis=-1), p["out_w"],
                  precision=hi) + p["out_b"]
    return jnp.squeeze(out)


# ----------------------------------------- main -----------------------------------------

if __name__ == "__main__":
    B = 2
    CONTEXT_LEN, RESPONSE_LEN, PERSONA_LEN, EMBED_DIM = 256, 32, 231, 768

    key = jax.random.PRNGKey(0)
    k_par, k_c, k_r, k_p = jax.random.split(key, 4)
    params = init_params(k_par)

    ctx_emb = jax.random.normal(k_c, (B, CONTEXT_LEN, EMBED_DIM), jnp.float32)
    resp_emb = jax.random.normal(k_r, (B, RESPONSE_LEN, EMBED_DIM), jnp.float32)
    per_emb = jax.random.normal(k_p, (B, PERSONA_LEN, EMBED_DIM), jnp.float32)

    def make_mask(lengths, total):
        lengths = jnp.asarray(lengths)[:, None]
        return (jnp.arange(total)[None, :] < lengths).astype(jnp.float32)

    ctx_mask = make_mask([200, CONTEXT_LEN], CONTEXT_LEN)      # (B, 256)
    resp_mask = make_mask([20, RESPONSE_LEN], RESPONSE_LEN)    # (B, 32)
    per_mask = make_mask([150, PERSONA_LEN], PERSONA_LEN)      # (B, 231)

    fwd = jax.jit(our_model_forward)
    out = jax.block_until_ready(fwd(params, ctx_emb, resp_emb, per_emb,
                                    ctx_mask, resp_mask, per_mask))

    ref = jax.block_until_ready(
        reference_forward(params, ctx_emb, resp_emb, per_emb,
                          ctx_mask, resp_mask, per_mask))

    assert out.shape == (B,), out.shape
    np.testing.assert_allclose(np.asarray(out), np.asarray(ref), rtol=1e-2, atol=1e-2)
    print("KERNEL_OK")
</pallas_src>

<mosaic_0001>
module attributes {stable_mosaic.version = 11 : i64} {
  func.func @_fused_branch_kernel(%arg0: i32, %arg1: i32, %arg2: memref<1x1x256x768xbf16, #tpu.memory_space<vmem>>, %arg3: memref<1x32x768xbf16, #tpu.memory_space<vmem>>, %arg4: memref<1x1x1x256xf32, #tpu.memory_space<vmem>>, %arg5: memref<1x32x1xf32, #tpu.memory_space<vmem>>, %arg6: memref<2x3x3xf32, #tpu.memory_space<smem>>, %arg7: memref<2xf32, #tpu.memory_space<smem>>, %arg8: memref<2x3x3xf32, #tpu.memory_space<smem>>, %arg9: memref<2xf32, #tpu.memory_space<smem>>, %arg10: memref<1x6x247x200xf32, #tpu.memory_space<vmem>>, %arg11: memref<1x1x200xf32, #tpu.memory_space<vmem>>, %arg12: memref<1x1x1x200xf32, #tpu.memory_space<vmem>>) attributes {dimension_semantics = [#tpu.dimension_semantics<parallel>, #tpu.dimension_semantics<parallel>], iteration_bounds = array<i64: 2, 2>, scalar_prefetch = 0 : i64, scratch_operands = 0 : i64, tpu.core_type = #tpu.core_type<tc>, window_params = [{transform_indices = @transform_0, window_bounds = array<i64: 1, 1, 256, 768>}, {transform_indices = @transform_1, window_bounds = array<i64: 1, 32, 768>}, {transform_indices = @transform_2, window_bounds = array<i64: 1, 1, 1, 256>}, {transform_indices = @transform_3, window_bounds = array<i64: 1, 32, 1>}, {transform_indices = @transform_4, window_bounds = array<i64: 2, 3, 3>}, {transform_indices = @transform_5, window_bounds = array<i64: 2>}, {transform_indices = @transform_6, window_bounds = array<i64: 2, 3, 3>}, {transform_indices = @transform_7, window_bounds = array<i64: 2>}, {transform_indices = @transform_8, window_bounds = array<i64: 1, 6, 247, 200>}, {transform_indices = @transform_9, window_bounds = array<i64: 1, 1, 200>}, {transform_indices = @transform_10, window_bounds = array<i64: 1, 1, 1, 200>}]} {
    %c0 = arith.constant 0 : index
    %c0_0 = arith.constant 0 : index
    %c0_1 = arith.constant 0 : index
    %c0_2 = arith.constant 0 : index
    %0 = vector.load %arg2[%c0, %c0_0, %c0_1, %c0_2] : memref<1x1x256x768xbf16, #tpu.memory_space<vmem>>, vector<1x1x256x768xbf16>
    %1 = vector.shape_cast %0 : vector<1x1x256x768xbf16> to vector<256x768xbf16>
    %c0_3 = arith.constant 0 : index
    %c0_4 = arith.constant 0 : index
    %c0_5 = arith.constant 0 : index
    %2 = vector.load %arg3[%c0_3, %c0_4, %c0_5] : memref<1x32x768xbf16, #tpu.memory_space<vmem>>, vector<1x32x768xbf16>
    %3 = vector.shape_cast %2 : vector<1x32x768xbf16> to vector<32x768xbf16>
    %cst = arith.constant dense<0.000000e+00> : vector<32x256xf32>
    %4 = tpu.matmul %3, %1, %cst {dimension_numbers = #tpu.dot_dimension_numbers<[1], [1], [0], [0], [0, 0, 1, 0], [], []>} : vector<32x768xbf16>, vector<256x768xbf16>, vector<32x256xf32> -> vector<32x256xf32>
    %c0_6 = arith.constant 0 : index
    %c0_7 = arith.constant 0 : index
    %c0_8 = arith.constant 0 : index
    %5 = vector.load %arg5[%c0_6, %c0_7, %c0_8] : memref<1x32x1xf32, #tpu.memory_space<vmem>>, vector<1x32x1xf32>
    %6 = vector.shape_cast %5 : vector<1x32x1xf32> to vector<32x1xf32>
    %c0_9 = arith.constant 0 : index
    %c0_10 = arith.constant 0 : index
    %c0_11 = arith.constant 0 : index
    %c0_12 = arith.constant 0 : index
    %7 = vector.load %arg4[%c0_9, %c0_10, %c0_11, %c0_12] : memref<1x1x1x256xf32, #tpu.memory_space<vmem>>, vector<1x1x1x256xf32>
    %8 = vector.shape_cast %7 : vector<1x1x1x256xf32> to vector<1x256xf32>
    %9 = vector.broadcast %6 : vector<32x1xf32> to vector<32x256xf32>
    %10 = vector.broadcast %8 : vector<1x256xf32> to vector<32x256xf32>
    %11 = arith.mulf %9, %10 : vector<32x256xf32>
    %cst_13 = arith.constant 0.000000e+00 : f32
    %12 = vector.broadcast %cst_13 : f32 to vector<32x256xf32>
    %13 = arith.cmpf one, %11, %12 : vector<32x256xf32>
    %cst_14 = arith.constant 0.000000e+00 : f32
    %14 = vector.broadcast %cst_14 : f32 to vector<32x256xf32>
    %15 = arith.select %13, %4, %14 : vector<32x256xi1>, vector<32x256xf32>
    %cst_15 = arith.constant 0.000000e+00 : f32
    %16 = vector.broadcast %cst_15 : f32 to vector<30x254xf32>
    %17 = arith.index_cast %arg0 : i32 to index
    %18 = memref.load %arg7[%17] : memref<2xf32, #tpu.memory_space<smem>>
    %19 = vector.broadcast %18 : f32 to vector<30x254xf32>
    %20 = arith.addf %16, %19 : vector<30x254xf32>
    %21 = arith.index_cast %arg0 : i32 to index
    %c0_16 = arith.constant 0 : index
    %c0_17 = arith.constant 0 : index
    %22 = memref.load %arg6[%21, %c0_16, %c0_17] : memref<2x3x3xf32, #tpu.memory_space<smem>>
    %23 = vector.extract_strided_slice %15 {offsets = [0, 0], sizes = [30, 254], strides = [1, 1]} : vector<32x256xf32> to vector<30x254xf32>
    %24 = vector.broadcast %22 : f32 to vector<30x254xf32>
    %25 = arith.mulf %24, %23 : vector<30x254xf32>
    %26 = arith.addf %20, %25 : vector<30x254xf32>
    %27 = arith.index_cast %arg0 : i32 to index
    %c0_18 = arith.constant 0 : index
    %c1 = arith.constant 1 : index
    %28 = memref.load %arg6[%27, %c0_18, %c1] : memref<2x3x3xf32, #tpu.memory_space<smem>>
    %29 = vector.extract_strided_slice %15 {offsets = [0, 1], sizes = [30, 254], strides = [1, 1]} : vector<32x256xf32> to vector<30x254xf32>
    %30 = vector.broadcast %28 : f32 to vector<30x254xf32>
    %31 = arith.mulf %30, %29 : vector<30x254xf32>
    %32 = arith.addf %26, %31 : vector<30x254xf32>
    %33 = arith.index_cast %arg0 : i32 to index
    %c0_19 = arith.constant 0 : index
    %c2 = arith.constant 2 : index
    %34 = memref.load %arg6[%33, %c0_19, %c2] : memref<2x3x3xf32, #tpu.memory_space<smem>>
    %35 = vector.extract_strided_slice %15 {offsets = [0, 2], sizes = [30, 254], strides = [1, 1]} : vector<32x256xf32> to vector<30x254xf32>
    %36 = vector.broadcast %34 : f32 to vector<30x254xf32>
    %37 = arith.mulf %36, %35 : vector<30x254xf32>
    %38 = arith.addf %32, %37 : vector<30x254xf32>
    %39 = arith.index_cast %arg0 : i32 to index
    %c1_20 = arith.constant 1 : index
    %c0_21 = arith.constant 0 : index
    %40 = memref.load %arg6[%39, %c1_20, %c0_21] : memref<2x3x3xf32, #tpu.memory_space<smem>>
    %41 = vector.extract_strided_slice %15 {offsets = [1, 0], sizes = [30, 254], strides = [1, 1]} : vector<32x256xf32> to vector<30x254xf32>
    %42 = vector.broadcast %40 : f32 to vector<30x254xf32>
    %43 = arith.mulf %42, %41 : vector<30x254xf32>
    %44 = arith.addf %38, %43 : vector<30x254xf32>
    %45 = arith.index_cast %arg0 : i32 to index
    %c1_22 = arith.constant 1 : index
    %c1_23 = arith.constant 1 : index
    %46 = memref.load %arg6[%45, %c1_22, %c1_23] : memref<2x3x3xf32, #tpu.memory_space<smem>>
    %47 = vector.extract_strided_slice %15 {offsets = [1, 1], sizes = [30, 254], strides = [1, 1]} : vector<32x256xf32> to vector<30x254xf32>
    %48 = vector.broadcast %46 : f32 to vector<30x254xf32>
    %49 = arith.mulf %48, %47 : vector<30x254xf32>
    %50 = arith.addf %44, %49 : vector<30x254xf32>
    %51 = arith.index_cast %arg0 : i32 to index
    %c1_24 = arith.constant 1 : index
    %c2_25 = arith.constant 2 : index
    %52 = memref.load %arg6[%51, %c1_24, %c2_25] : memref<2x3x3xf32, #tpu.memory_space<smem>>
    %53 = vector.extract_strided_slice %15 {offsets = [1, 2], sizes = [30, 254], strides = [1, 1]} : vector<32x256xf32> to vector<30x254xf32>
    %54 = vector.broadcast %52 : f32 to vector<30x254xf32>
    %55 = arith.mulf %54, %53 : vector<30x254xf32>
    %56 = arith.addf %50, %55 : vector<30x254xf32>
    %57 = arith.index_cast %arg0 : i32 to index
    %c2_26 = arith.constant 2 : index
    %c0_27 = arith.constant 0 : index
    %58 = memref.load %arg6[%57, %c2_26, %c0_27] : memref<2x3x3xf32, #tpu.memory_space<smem>>
    %59 = vector.extract_strided_slice %15 {offsets = [2, 0], sizes = [30, 254], strides = [1, 1]} : vector<32x256xf32> to vector<30x254xf32>
    %60 = vector.broadcast %58 : f32 to vector<30x254xf32>
    %61 = arith.mulf %60, %59 : vector<30x254xf32>
    %62 = arith.addf %56, %61 : vector<30x254xf32>
    %63 = arith.index_cast %arg0 : i32 to index
    %c2_28 = arith.constant 2 : index
    %c1_29 = arith.constant 1 : index
    %64 = memref.load %arg6[%63, %c2_28, %c1_29] : memref<2x3x3xf32, #tpu.memory_space<smem>>
    %65 = vector.extract_strided_slice %15 {offsets = [2, 1], sizes = [30, 254], strides = [1, 1]} : vector<32x256xf32> to vector<30x254xf32>
    %66 = vector.broadcast %64 : f32 to vector<30x254xf32>
    %67 = arith.mulf %66, %65 : vector<30x254xf32>
    %68 = arith.addf %62, %67 : vector<30x254xf32>
    %69 = arith.index_cast %arg0 : i32 to index
    %c2_30 = arith.constant 2 : index
    %c2_31 = arith.constant 2 : index
    %70 = memref.load %arg6[%69, %c2_30, %c2_31] : memref<2x3x3xf32, #tpu.memory_space<smem>>
    %71 = vector.extract_strided_slice %15 {offsets = [2, 2], sizes = [30, 254], strides = [1, 1]} : vector<32x256xf32> to vector<30x254xf32>
    %72 = vector.broadcast %70 : f32 to vector<30x254xf32>
    %73 = arith.mulf %72, %71 : vector<30x254xf32>
    %74 = arith.addf %68, %73 : vector<30x254xf32>
    %75 = vector.extract_strided_slice %74 {offsets = [0, 0], sizes = [29, 253], strides = [1, 1]} : vector<30x254xf32> to vector<29x253xf32>
    %76 = vector.extract_strided_slice %74 {offsets = [1, 0], sizes = [29, 253], strides = [1, 1]} : vector<30x254xf32> to vector<29x253xf32>
    %77 = arith.maximumf %75, %76 : vector<29x253xf32>
    %78 = vector.extract_strided_slice %74 {offsets = [0, 1], sizes = [29, 253], strides = [1, 1]} : vector<30x254xf32> to vector<29x253xf32>
    %79 = vector.extract_strided_slice %74 {offsets = [1, 1], sizes = [29, 253], strides = [1, 1]} : vector<30x254xf32> to vector<29x253xf32>
    %80 = arith.maximumf %78, %79 : vector<29x253xf32>
    %81 = arith.maximumf %77, %80 : vector<29x253xf32>
    %cst_32 = arith.constant 0.000000e+00 : f32
    %82 = vector.broadcast %cst_32 : f32 to vector<29x253xf32>
    %83 = arith.maximumf %81, %82 : vector<29x253xf32>
    %cst_33 = arith.constant 0.000000e+00 : f32
    %84 = vector.broadcast %cst_33 : f32 to vector<25x249xf32>
    %85 = arith.index_cast %arg0 : i32 to index
    %86 = memref.load %arg9[%85] : memref<2xf32, #tpu.memory_space<smem>>
    %87 = vector.broadcast %86 : f32 to vector<25x249xf32>
    %88 = arith.addf %84, %87 : vector<25x249xf32>
    %89 = arith.index_cast %arg0 : i32 to index
    %c0_34 = arith.constant 0 : index
    %c0_35 = arith.constant 0 : index
    %90 = memref.load %arg8[%89, %c0_34, %c0_35] : memref<2x3x3xf32, #tpu.memory_space<smem>>
    %91 = vector.extract_strided_slice %83 {offsets = [0, 0], sizes = [25, 249], strides = [1, 1]} : vector<29x253xf32> to vector<25x249xf32>
    %92 = vector.broadcast %90 : f32 to vector<25x249xf32>
    %93 = arith.mulf %92, %91 : vector<25x249xf32>
    %94 = arith.addf %88, %93 : vector<25x249xf32>
    %95 = arith.index_cast %arg0 : i32 to index
    %c0_36 = arith.constant 0 : index
    %c1_37 = arith.constant 1 : index
    %96 = memref.load %arg8[%95, %c0_36, %c1_37] : memref<2x3x3xf32, #tpu.memory_space<smem>>
    %97 = vector.extract_strided_slice %83 {offsets = [0, 2], sizes = [25, 249], strides = [1, 1]} : vector<29x253xf32> to vector<25x249xf32>
    %98 = vector.broadcast %96 : f32 to vector<25x249xf32>
    %99 = arith.mulf %98, %97 : vector<25x249xf32>
    %100 = arith.addf %94, %99 : vector<25x249xf32>
    %101 = arith.index_cast %arg0 : i32 to index
    %c0_38 = arith.constant 0 : index
    %c2_39 = arith.constant 2 : index
    %102 = memref.load %arg8[%101, %c0_38, %c2_39] : memref<2x3x3xf32, #tpu.memory_space<smem>>
    %103 = vector.extract_strided_slice %83 {offsets = [0, 4], sizes = [25, 249], strides = [1, 1]} : vector<29x253xf32> to vector<25x249xf32>
    %104 = vector.broadcast %102 : f32 to vector<25x249xf32>
    %105 = arith.mulf %104, %103 : vector<25x249xf32>
    %106 = arith.addf %100, %105 : vector<25x249xf32>
    %107 = arith.index_cast %arg0 : i32 to index
    %c1_40 = arith.constant 1 : index
    %c0_41 = arith.constant 0 : index
    %108 = memref.load %arg8[%107, %c1_40, %c0_41] : memref<2x3x3xf32, #tpu.memory_space<smem>>
    %109 = vector.extract_strided_slice %83 {offsets = [2, 0], sizes = [25, 249], strides = [1, 1]} : vector<29x253xf32> to vector<25x249xf32>
    %110 = vector.broadcast %108 : f32 to vector<25x249xf32>
    %111 = arith.mulf %110, %109 : vector<25x249xf32>
    %112 = arith.addf %106, %111 : vector<25x249xf32>
    %113 = arith.index_cast %arg0 : i32 to index
    %c1_42 = arith.constant 1 : index
    %c1_43 = arith.constant 1 : index
    %114 = memref.load %arg8[%113, %c1_42, %c1_43] : memref<2x3x3xf32, #tpu.memory_space<smem>>
    %115 = vector.extract_strided_slice %83 {offsets = [2, 2], sizes = [25, 249], strides = [1, 1]} : vector<29x253xf32> to vector<25x249xf32>
    %116 = vector.broadcast %114 : f32 to vector<25x249xf32>
    %117 = arith.mulf %116, %115 : vector<25x249xf32>
    %118 = arith.addf %112, %117 : vector<25x249xf32>
    %119 = arith.index_cast %arg0 : i32 to index
    %c1_44 = arith.constant 1 : index
    %c2_45 = arith.constant 2 : index
    %120 = memref.load %arg8[%119, %c1_44, %c2_45] : memref<2x3x3xf32, #tpu.memory_space<smem>>
    %121 = vector.extract_strided_slice %83 {offsets = [2, 4], sizes = [25, 249], strides = [1, 1]} : vector<29x253xf32> to vector<25x249xf32>
    %122 = vector.broadcast %120 : f32 to vector<25x249xf32>
    %123 = arith.mulf %122, %121 : vector<25x249xf32>
    %124 = arith.addf %118, %123 : vector<25x249xf32>
    %125 = arith.index_cast %arg0 : i32 to index
    %c2_46 = arith.constant 2 : index
    %c0_47 = arith.constant 0 : index
    %126 = memref.load %arg8[%125, %c2_46, %c0_47] : memref<2x3x3xf32, #tpu.memory_space<smem>>
    %127 = vector.extract_strided_slice %83 {offsets = [4, 0], sizes = [25, 249], strides = [1, 1]} : vector<29x253xf32> to vector<25x249xf32>
    %128 = vector.broadcast %126 : f32 to vector<25x249xf32>
    %129 = arith.mulf %128, %127 : vector<25x249xf32>
    %130 = arith.addf %124, %129 : vector<25x249xf32>
    %131 = arith.index_cast %arg0 : i32 to index
    %c2_48 = arith.constant 2 : index
    %c1_49 = arith.constant 1 : index
    %132 = memref.load %arg8[%131, %c2_48, %c1_49] : memref<2x3x3xf32, #tpu.memory_space<smem>>
    %133 = vector.extract_strided_slice %83 {offsets = [4, 2], sizes = [25, 249], strides = [1, 1]} : vector<29x253xf32> to vector<25x249xf32>
    %134 = vector.broadcast %132 : f32 to vector<25x249xf32>
    %135 = arith.mulf %134, %133 : vector<25x249xf32>
    %136 = arith.addf %130, %135 : vector<25x249xf32>
    %137 = arith.index_cast %arg0 : i32 to index
    %c2_50 = arith.constant 2 : index
    %c2_51 = arith.constant 2 : index
    %138 = memref.load %arg8[%137, %c2_50, %c2_51] : memref<2x3x3xf32, #tpu.memory_space<smem>>
    %139 = vector.extract_strided_slice %83 {offsets = [4, 4], sizes = [25, 249], strides = [1, 1]} : vector<29x253xf32> to vector<25x249xf32>
    %140 = vector.broadcast %138 : f32 to vector<25x249xf32>
    %141 = arith.mulf %140, %139 : vector<25x249xf32>
    %142 = arith.addf %136, %141 : vector<25x249xf32>
    %143 = vector.extract_strided_slice %142 {offsets = [0, 0], sizes = [23, 247], strides = [1, 1]} : vector<25x249xf32> to vector<23x247xf32>
    %144 = vector.extract_strided_slice %142 {offsets = [2, 0], sizes = [23, 247], strides = [1, 1]} : vector<25x249xf32> to vector<23x247xf32>
    %145 = arith.maximumf %143, %144 : vector<23x247xf32>
    %146 = vector.extract_strided_slice %142 {offsets = [0, 2], sizes = [23, 247], strides = [1, 1]} : vector<25x249xf32> to vector<23x247xf32>
    %147 = vector.extract_strided_slice %142 {offsets = [2, 2], sizes = [23, 247], strides = [1, 1]} : vector<25x249xf32> to vector<23x247xf32>
    %148 = arith.maximumf %146, %147 : vector<23x247xf32>
    %149 = arith.maximumf %145, %148 : vector<23x247xf32>
    %cst_52 = arith.constant 0.000000e+00 : f32
    %150 = vector.broadcast %cst_52 : f32 to vector<23x247xf32>
    %151 = arith.maximumf %149, %150 : vector<23x247xf32>
    %c0_53 = arith.constant 0 : index
    %c0_54 = arith.constant 0 : index
    %c0_55 = arith.constant 0 : index
    %152 = vector.load %arg11[%c0_53, %c0_54, %c0_55] : memref<1x1x200xf32, #tpu.memory_space<vmem>>, vector<1x1x200xf32>
    %153 = vector.shape_cast %152 : vector<1x1x200xf32> to vector<1x200xf32>
    %154 = vector.extract_strided_slice %151 {offsets = [0, 0], sizes = [1, 247], strides = [1, 1]} : vector<23x247xf32> to vector<1x247xf32>
    %c0_56 = arith.constant 0 : index
    %c0_57 = arith.constant 0 : index
    %c0_58 = arith.constant 0 : index
    %c0_59 = arith.constant 0 : index
    %155 = vector.load %arg10[%c0_56, %c0_57, %c0_58, %c0_59] : memref<1x6x247x200xf32, #tpu.memory_space<vmem>>, vector<1x1x247x200xf32>
    %156 = vector.shape_cast %155 : vector<1x1x247x200xf32> to vector<247x200xf32>
    %cst_60 = arith.constant dense<0.000000e+00> : vector<1x200xf32>
    %157 = tpu.matmul %154, %156, %cst_60 {dimension_numbers = #tpu.dot_dimension_numbers<[1], [0], [0], [1], [0, 0, 1, 1], [], []>} : vector<1x247xf32>, vector<247x200xf32>, vector<1x200xf32> -> vector<1x200xf32>
    %158 = arith.addf %153, %157 : vector<1x200xf32>
    %159 = vector.extract_strided_slice %151 {offsets = [4, 0], sizes = [1, 247], strides = [1, 1]} : vector<23x247xf32> to vector<1x247xf32>
    %c0_61 = arith.constant 0 : index
    %c1_62 = arith.constant 1 : index
    %c0_63 = arith.constant 0 : index
    %c0_64 = arith.constant 0 : index
    %160 = vector.load %arg10[%c0_61, %c1_62, %c0_63, %c0_64] : memref<1x6x247x200xf32, #tpu.memory_space<vmem>>, vector<1x1x247x200xf32>
    %161 = vector.shape_cast %160 : vector<1x1x247x200xf32> to vector<247x200xf32>
    %cst_65 = arith.constant dense<0.000000e+00> : vector<1x200xf32>
    %162 = tpu.matmul %159, %161, %cst_65 {dimension_numbers = #tpu.dot_dimension_numbers<[1], [0], [0], [1], [0, 0, 1, 1], [], []>} : vector<1x247xf32>, vector<247x200xf32>, vector<1x200xf32> -> vector<1x200xf32>
    %163 = arith.addf %158, %162 : vector<1x200xf32>
    %164 = vector.extract_strided_slice %151 {offsets = [8, 0], sizes = [1, 247], strides = [1, 1]} : vector<23x247xf32> to vector<1x247xf32>
    %c0_66 = arith.constant 0 : index
    %c2_67 = arith.constant 2 : index
    %c0_68 = arith.constant 0 : index
    %c0_69 = arith.constant 0 : index
    %165 = vector.load %arg10[%c0_66, %c2_67, %c0_68, %c0_69] : memref<1x6x247x200xf32, #tpu.memory_space<vmem>>, vector<1x1x247x200xf32>
    %166 = vector.shape_cast %165 : vector<1x1x247x200xf32> to vector<247x200xf32>
    %cst_70 = arith.constant dense<0.000000e+00> : vector<1x200xf32>
    %167 = tpu.matmul %164, %166, %cst_70 {dimension_numbers = #tpu.dot_dimension_numbers<[1], [0], [0], [1], [0, 0, 1, 1], [], []>} : vector<1x247xf32>, vector<247x200xf32>, vector<1x200xf32> -> vector<1x200xf32>
    %168 = arith.addf %163, %167 : vector<1x200xf32>
    %169 = vector.extract_strided_slice %151 {offsets = [12, 0], sizes = [1, 247], strides = [1, 1]} : vector<23x247xf32> to vector<1x247xf32>
    %c0_71 = arith.constant 0 : index
    %c3 = arith.constant 3 : index
    %c0_72 = arith.constant 0 : index
    %c0_73 = arith.constant 0 : index
    %170 = vector.load %arg10[%c0_71, %c3, %c0_72, %c0_73] : memref<1x6x247x200xf32, #tpu.memory_space<vmem>>, vector<1x1x247x200xf32>
    %171 = vector.shape_cast %170 : vector<1x1x247x200xf32> to vector<247x200xf32>
    %cst_74 = arith.constant dense<0.000000e+00> : vector<1x200xf32>
    %172 = tpu.matmul %169, %171, %cst_74 {dimension_numbers = #tpu.dot_dimension_numbers<[1], [0], [0], [1], [0, 0, 1, 1], [], []>} : vector<1x247xf32>, vector<247x200xf32>, vector<1x200xf32> -> vector<1x200xf32>
    %173 = arith.addf %168, %172 : vector<1x200xf32>
    %174 = vector.extract_strided_slice %151 {offsets = [16, 0], sizes = [1, 247], strides = [1, 1]} : vector<23x247xf32> to vector<1x247xf32>
    %c0_75 = arith.constant 0 : index
    %c4 = arith.constant 4 : index
    %c0_76 = arith.constant 0 : index
    %c0_77 = arith.constant 0 : index
    %175 = vector.load %arg10[%c0_75, %c4, %c0_76, %c0_77] : memref<1x6x247x200xf32, #tpu.memory_space<vmem>>, vector<1x1x247x200xf32>
    %176 = vector.shape_cast %175 : vector<1x1x247x200xf32> to vector<247x200xf32>
    %cst_78 = arith.constant dense<0.000000e+00> : vector<1x200xf32>
    %177 = tpu.matmul %174, %176, %cst_78 {dimension_numbers = #tpu.dot_dimension_numbers<[1], [0], [0], [1], [0, 0, 1, 1], [], []>} : vector<1x247xf32>, vector<247x200xf32>, vector<1x200xf32> -> vector<1x200xf32>
    %178 = arith.addf %173, %177 : vector<1x200xf32>
    %179 = vector.extract_strided_slice %151 {offsets = [20, 0], sizes = [1, 247], strides = [1, 1]} : vector<23x247xf32> to vector<1x247xf32>
    %c0_79 = arith.constant 0 : index
    %c5 = arith.constant 5 : index
    %c0_80 = arith.constant 0 : index
    %c0_81 = arith.constant 0 : index
    %180 = vector.load %arg10[%c0_79, %c5, %c0_80, %c0_81] : memref<1x6x247x200xf32, #tpu.memory_space<vmem>>, vector<1x1x247x200xf32>
    %181 = vector.shape_cast %180 : vector<1x1x247x200xf32> to vector<247x200xf32>
    %cst_82 = arith.constant dense<0.000000e+00> : vector<1x200xf32>
    %182 = tpu.matmul %179, %181, %cst_82 {dimension_numbers = #tpu.dot_dimension_numbers<[1], [0], [0], [1], [0, 0, 1, 1], [], []>} : vector<1x247xf32>, vector<247x200xf32>, vector<1x200xf32> -> vector<1x200xf32>
    %183 = arith.addf %178, %182 : vector<1x200xf32>
    %c0_83 = arith.constant 0 : index
    %c0_84 = arith.constant 0 : index
    %c0_85 = arith.constant 0 : index
    %c0_86 = arith.constant 0 : index
    %184 = vector.load %arg12[%c0_83, %c0_84, %c0_85, %c0_86] : memref<1x1x1x200xf32, #tpu.memory_space<vmem>>, vector<1x1x1x200xf32>
    %185 = vector.shape_cast %184 : vector<1x1x1x200xf32> to vector<1x200xf32>
    %186 = vector.shape_cast %183 : vector<1x200xf32> to vector<1x1x1x200xf32>
    tpu.vector_store %arg12[%c0_83, %c0_84, %c0_85, %c0_86], %186 {strides = array<i32>} : memref<1x1x1x200xf32, #tpu.memory_space<vmem>>, vector<1x1x1x200xf32>,
    return
  }
  func.func @transform_0(%arg0: i32, %arg1: i32) -> (i32, i32, i32, i32) {
    %c0_i32 = arith.constant 0 : i32
    %c0_i32_0 = arith.constant 0 : i32
    %c0_i32_1 = arith.constant 0 : i32
    return %arg0, %arg1, %c0_i32, %c0_i32_0 : i32, i32, i32, i32
  }
  func.func @transform_1(%arg0: i32, %arg1: i32) -> (i32, i32, i32) {
    %c0_i32 = arith.constant 0 : i32
    %c0_i32_0 = arith.constant 0 : i32
    %c0_i32_1 = arith.constant 0 : i32
    return %arg1, %c0_i32, %c0_i32_0 : i32, i32, i32
  }
  func.func @transform_2(%arg0: i32, %arg1: i32) -> (i32, i32, i32, i32) {
    %c0_i32 = arith.constant 0 : i32
    %c0_i32_0 = arith.constant 0 : i32
    %c0_i32_1 = arith.constant 0 : i32
    return %arg0, %arg1, %c0_i32, %c0_i32_0 : i32, i32, i32, i32
  }
  func.func @transform_3(%arg0: i32, %arg1: i32) -> (i32, i32, i32) {
    %c0_i32 = arith.constant 0 : i32
    %c0_i32_0 = arith.constant 0 : i32
    %c0_i32_1 = arith.constant 0 : i32
    return %arg1, %c0_i32, %c0_i32_0 : i32, i32, i32
  }
  func.func @transform_4(%arg0: i32, %arg1: i32) -> (i32, i32, i32) {
    %c0_i32 = arith.constant 0 : i32
    %c0_i32_0 = arith.constant 0 : i32
    %c0_i32_1 = arith.constant 0 : i32
    %c0_i32_2 = arith.constant 0 : i32
    return %c0_i32, %c0_i32_0, %c0_i32_1 : i32, i32, i32
  }
  func.func @transform_5(%arg0: i32, %arg1: i32) -> i32 {
    %c0_i32 = arith.constant 0 : i32
    %c0_i32_0 = arith.constant 0 : i32
    return %c0_i32 : i32
  }
  func.func @transform_6(%arg0: i32, %arg1: i32) -> (i32, i32, i32) {
    %c0_i32 = arith.constant 0 : i32
    %c0_i32_0 = arith.constant 0 : i32
    %c0_i32_1 = arith.constant 0 : i32
    %c0_i32_2 = arith.constant 0 : i32
    return %c0_i32, %c0_i32_0, %c0_i32_1 : i32, i32, i32
  }
  func.func @transform_7(%arg0: i32, %arg1: i32) -> i32 {
    %c0_i32 = arith.constant 0 : i32
    %c0_i32_0 = arith.constant 0 : i32
    return %c0_i32 : i32
  }
  func.func @transform_8(%arg0: i32, %arg1: i32) -> (i32, i32, i32, i32) {
    %c0_i32 = arith.constant 0 : i32
    %c0_i32_0 = arith.constant 0 : i32
    %c0_i32_1 = arith.constant 0 : i32
    %c0_i32_2 = arith.constant 0 : i32
    return %arg0, %c0_i32, %c0_i32_0, %c0_i32_1 : i32, i32, i32, i32
  }
  func.func @transform_9(%arg0: i32, %arg1: i32) -> (i32, i32, i32) {
    %c0_i32 = arith.constant 0 : i32
    %c0_i32_0 = arith.constant 0 : i32
    %c0_i32_1 = arith.constant 0 : i32
    return %arg0, %c0_i32, %c0_i32_0 : i32, i32, i32
  }
  func.func @transform_10(%arg0: i32, %arg1: i32) -> (i32, i32, i32, i32) {
    %c0_i32 = arith.constant 0 : i32
    %c0_i32_0 = arith.constant 0 : i32
    %c0_i32_1 = arith.constant 0 : i32
    return %arg0, %arg1, %c0_i32, %c0_i32_0 : i32, i32, i32, i32
  }
}

</mosaic_0001>

<bundles_post_ra>
// kernel: our_model_forward.1
= control target key start
LH: loop header
LB: loop body
LE: loop exit
PB: predicated region body
PF: predicated region fallthrough
CT: control target
= control target key end

     0   :  { %s7017_s0 = inlined_call_operand.vmem [shape: bf16[2,2,256,768], index: 0, kind: input, shape index: {}]   ;;  %s7018_s1 = inlined_call_operand.vmem [shape: bf16[2,32,768], index: 1, kind: input, shape index: {}]   ;;  %s7019_s2 = inlined_call_operand.vmem [shape: f32[2,2,1,256], index: 2, kind: input, shape index: {}]   ;;  %s7020_s3 = inlined_call_operand.vmem [shape: f32[2,32,1], index: 3, kind: input, shape index: {}]   ;;  %s7021_s4 = inlined_call_operand.vmem [shape: f32[2,3,3], index: 4, kind: input, shape index: {}]   ;;  %s7022_s5 = inlined_call_operand.vmem [shape: f32[2], index: 5, kind: input, shape index: {}]   ;;  %s7023_s6 = inlined_call_operand.vmem [shape: f32[2,3,3], index: 6, kind: input, shape index: {}]   ;;  %s7024_s7 = inlined_call_operand.vmem [shape: f32[2], index: 7, kind: input, shape index: {}]   ;;  %s7025_s8 = inlined_call_operand.vmem [shape: f32[2,6,247,200], index: 8, kind: input, shape index: {}]   ;;  %s7026_s9 = inlined_call_operand.vmem [shape: f32[2,1,200], index: 9, kind: input, shape index: {}]   ;;  %s7027_s10 = inlined_call_operand.vmem [shape: f32[2,2,1,200], index: 10, kind: output, shape index: {}]  }
   0x1   :  { %7040 = sst [smem:[#allocation12_spill]] %s7017_s0 }
   0x2   :  { %7041 = sst [smem:[#allocation13_spill]] %s7018_s1 }
   0x3   :  { %7042 = sst [smem:[#allocation14_spill]] %s7019_s2 }
   0x4   :  { %15 = vsyncpa [#allocation3], 0 }
   0x5   :  { %16 = vsyncpa [#allocation5], 0 }
   0x6   :  { %17 = vsyncpa [#allocation8], 0  ;;  %s5067_s13 = smov 0   ;;  %s5069_s14 = smov 0  }
   0x7   :  { %s5071_s15 = smov 0   ;;  %s5073_s16 = smov 0  }
   0x8   :  { %s5075_s17 = smov 0  }
   0x9 LB: > { %s338_s20 = sshll.u32 %s7022_s5, 4  ;;  %s3784_s21 = sadd.s32 4294967295, %s4999_s17   ;;  %s4999_s17 = sphi %s5075_s17, %s23_s17   ;;  %s4995_s16 = sphi %s5073_s16, %s7063_s16   ;;  %s4991_s15 = sphi %s5071_s15, %s7062_s15   ;;  %s4987_s14 = sphi %s5069_s14, %s7061_s14   ;;  %s4983_s13 = sphi %s5067_s13, %s7060_s13   ;;  %s339_s20 = int_to_ptr.vmem [resolvable:$true] %s338_s20 }
   0xa   : > { %p3786_p0 = scmp.ge.s32.totalorder %s4999_s17, 1  ;;  %p312_p1 = scmp.lt.s32.totalorder %s4999_s17, 5 }
   0xb   : > { %p5098_p2 = scmp.eq.s32.totalorder %s3784_s21, 0  ;;  %s32_s25 = sadd.s32 1, %s4991_s15 }
   0xc   : > { %p5102_p3 = pnand %p3786_p0, %p312_p1  ;;  %p5115_p6 = scmp.ge.s32.totalorder %s32_s25, 2 }
   0xd   : > { %s7043_s22 = scalar_select %p5098_p2, 1, 0 }
   0xe   : > { %p4653_p4 = pneg %p5102_p3  ;;  %s4889_s27 = scalar_lea.vmem %s339_s20, 16 }
   0xf   : > { %p4890_p7 = scmp.ne.s32.totalorder %s339_s20, %s4889_s27  ;;  %p4897_p11 = scmp.lt.s32.totalorder %s339_s20, %s339_s20 }
  0x10   : > { %p5110_p5 = pnand %p5098_p2, %p4653_p4  ;;  %p4898_p12 = scmp.lt.s32.totalorder %s4889_s27, %s4889_s27 }
  0x12   : > { %p4891_p8 = pneg %p5110_p5  ;;  %p4899_p13 = por %p4898_p12, %p4897_p11 }
  0x14   : > { %p4892_p9 = pnand %p4891_p8, %p4890_p7 }
  0x16   : > { %p4893_p10 = pneg %p4892_p9 }
  0x18   : > { %p4900_p0 = pnand %p4899_p13, %p4893_p10 }
  0x1a   : > { %4903 = shalt.err (!%p4900_p0)
}
  0x1b   : > { %s5001_s28 = smov [#allocation4]   ;;  %s7065_s25 = smov (%p5115_p6, %s32_s25), 0 }
  0x1c   : > { %4659 = dma.vmem_to_smem (!%p5110_p5), %s339_s20, 16, %s5001_s28, [#allocation5]  }
  0x1d   : > { %s35_s29 = sadd.s32 1, %s4995_s16  ;;  %s324_s12 = sshll.u32 %s7021_s4, 4  ;;  %s325_s12 = int_to_ptr.vmem [resolvable:$true] %s324_s12 }
  0x1e   : > { %s7067_s29 = smov (!%p5115_p6, %s35_s29), %s4995_s16  ;;  %s348_s21 = sshll.u32 %s7023_s6, 4  ;;  %s349_s21 = int_to_ptr.vmem [resolvable:$true] %s348_s21 }
  0x1f   : > { %p37_p1 = scmp.ge.s32.totalorder %s7067_s29, 2  ;;  %s4904_s27 = scalar_lea.vmem %s325_s12, 128 }
  0x20   : > { %p4905_p4 = scmp.ne.s32.totalorder %s325_s12, %s4904_s27  ;;  %p4912_p10 = scmp.lt.s32.totalorder %s325_s12, %s325_s12 }
  0x21   : > { %s7069_s29 = smov (%p37_p1, %s7067_s29), 0  ;;  %p4913_p11 = scmp.lt.s32.totalorder %s4904_s27, %s4904_s27 }
  0x22   : > { %p4907_p7 = pnand %p4905_p4, %p4891_p8 }
  0x23   : > { %p4914_p12 = por %p4913_p11, %p4912_p10 }
  0x24   : > { %p4908_p9 = pneg %p4907_p7 }
  0x26   : > { %p4915_p13 = pnand %p4914_p12, %p4908_p9 }
  0x28   : > { %4918 = shalt.err (!%p4915_p13)
}
  0x29   : > { %s5002_s20 = smov [#allocation2]   ;;  %s5003_s26 = smov 64  }
  0x2a   : > { %s5004_s28 = smov 4   ;;  %s4919_s30 = scalar_lea.vmem %s349_s21, 128 }
  0x2b   : > { %4656 = dma.vmem_to_smem (!%p5110_p5), %s325_s12, 128, %s5002_s20, [#allocation3], %s5003_s26, %s5003_s26, %s5004_s28  }
  0x2c   : > { %p4920_p6 = scmp.ne.s32.totalorder %s349_s21, %s4919_s30  ;;  %p4927_p4 = scmp.lt.s32.totalorder %s349_s21, %s349_s21 }
  0x2d   : > { %p4928_p7 = scmp.lt.s32.totalorder %s4919_s30, %s4919_s30 }
  0x2e   : > { %p4922_p0 = pnand %p4920_p6, %p4891_p8 }
  0x2f   : > { %p4929_p2 = por %p4928_p7, %p4927_p4 }
  0x30   : > { %p4923_p1 = pneg %p4922_p0 }
  0x32   : > { %p4930_p10 = pnand %p4929_p2, %p4923_p1 }
  0x34   : > { %4933 = shalt.err (!%p4930_p10)
}
  0x35   : > { %s5005_s11 = smov [#allocation6]   ;;  %s362_s12 = sshll.u32 %s7024_s7, 4  ;;  %s363_s12 = int_to_ptr.vmem [resolvable:$true] %s362_s12 }
  0x36   : > { %4662 = dma.vmem_to_smem (!%p5110_p5), %s349_s21, 128, %s5005_s11, [#allocation5], %s5003_s26, %s5003_s26, %s5004_s28  }
  0x37   : > { %s4934_s27 = scalar_lea.vmem %s363_s12, 16  ;;  %p4942_p13 = scmp.lt.s32.totalorder %s363_s12, %s363_s12 }
  0x38   : > { %p4935_p9 = scmp.ne.s32.totalorder %s363_s12, %s4934_s27  ;;  %p4943_p6 = scmp.lt.s32.totalorder %s4934_s27, %s4934_s27 }
  0x3a   : > { %p4937_p11 = pnand %p4935_p9, %p4891_p8  ;;  %p4944_p2 = por %p4943_p6, %p4942_p13 }
  0x3c   : > { %p4938_p12 = pneg %p4937_p11 }
  0x3e   : > { %p4945_p0 = pnand %p4944_p2, %p4938_p12 }
  0x40   : > { %4948 = shalt.err (!%p4945_p0)
}
  0x41   : > { %s5006_s20 = smov [#allocation7]   ;;  %429 = sbr.rel (%p5102_p3) target bundleno = 1880 (0x758), region = 60 }
  0x42   : > { %4665 = dma.vmem_to_smem (!%p5110_p5), %s363_s12, 16, %s5006_s20, [#allocation8]  }
  0x43   : > { %p7047_p1 = scmp.ne.s32.totalorder (!%p5102_p3), %s7043_s22, 0 }
  0x48   : > { %4970 = dma.done.wait (%p7047_p1), [#allocation3], 128  }
  0x49   : > { %4972 = vsyncadd (%p7047_p1), [#allocation3], 4294967168 }
  0x4a   : > { %4974 = dma.done.wait (%p7047_p1), [#allocation5], 144  }
  0x4b   : > { %4976 = vsyncadd (%p7047_p1), [#allocation5], 4294967152 }
  0x4c   : > { %4978 = dma.done.wait (%p7047_p1), [#allocation8], 16  }
  0x4d   : > { %4980 = vsyncadd (%p7047_p1), [#allocation8], 4294967280 }
  0x4e   : > { %447 = sfence }
  0x4f   : > { %p514_p3 = scmp.lt.s32.totalorder %s4987_s14, 1  ;;  %p516_p5 = scmp.lt.s32.totalorder %s4983_s13, 1  ;;  %vm1580_vm4 = vcmask 1046528   ;;  %vm1769_vm9 = vcmask 1045504   ;;  %vm1483_vm10 = vcmask 1039360   ;;  %vm1539_vm11 = vcmask 1031168  }
  0x50   : > { %s7048_s0 = sld [smem:[#allocation12_spill]]  ;;  %s7049_s1 = sld [smem:[#allocation13_spill]]  ;;  %vm2360_vm12 = vcmask 1043456   ;;  %vm2137_vm13 = vcmask 1014784   ;;  %vm2663_vm14 = vcmask 973824  }
  0x51   : > { %s5177_s23 = scalar_select %p514_p3, %s4987_s14, 1 }
  0x52   : > { %s7071_s13 = smov (!%p516_p5, %s4983_s13), 1  ;;  %s7050_s2 = sld [smem:[#allocation14_spill]] }
  0x53   : > { %s4634_s24 = smul.u32 384, %s5177_s23  ;;  %s4249_s20 = sshll.u32 %s7071_s13, 5 }
  0x54   : > { %s4633_s21 = smul.u32 192, %s7071_s13  ;;  %s3800_s22 = sshll.u32 %s5177_s23, 2 }
  0x55   : > { %s4635_s18 = smul.u32 96, %s7071_s13 }
  0x56   : > { %s520_s26 = sadd.s32 %s4634_s24, %s4633_s21 }
  0x57   : > { %s3797_s28 = sshll.u32 %s520_s26, 2  ;;  %s5200_s27 = scalar_lea.vmem %s7049_s1, %s4635_s18 }
  0x58   : > { %s5187_s11 = scalar_lea.vmem %s7048_s0, %s3797_s28  ;;  %v4777_v7 = vld [vmem:[%s5200_s27 + $0x4] ss:$24 sps:$4 sm:$0xff]   ;;  %v4775_v34 = vld [vmem:[%s5200_s27] ss:$24 sps:$4 sm:$0xff]   ;;  %v4823_v36 = vld [vmem:[%s5200_s27 + $0x34] ss:$24 sps:$4 sm:$0xff]   ;;  %s540_s26 = scalar_lea.vmem %s7020_s3, %s4249_s20 }
  0x59   : > { %v4727_v0 = vld [vmem:[%s5187_s11 + $0x4] ss:$24 sps:$4 sm:$0xff]   ;;  %v4729_v1 = vld [vmem:[%s5187_s11] ss:$24 sps:$4 sm:$0xff]   ;;  %v4730_v2 = vld [vmem:[%s5187_s11 + $0x34] ss:$24 sps:$4 sm:$0xff]   ;;  %1238 = vmatprep.mubr.bf16.mxu0 %v4777_v7 }
  0x5a   : > { %1206 = vmatprep.subr.bf16.mxu0 %v4727_v0  ;;  %v4732_v3 = vld [vmem:[%s5187_s11 + $0x30] ss:$24 sps:$4 sm:$0xff]   ;;  %v4733_v4 = vld [vmem:[%s5187_s11 + $0x64] ss:$24 sps:$4 sm:$0xff]   ;;  %v4735_v5 = vld [vmem:[%s5187_s11 + $0x60] ss:$24 sps:$4 sm:$0xff]  }
  0x5b   : > { %1207 = vmatpush1.bf16.xpose.msra.mxu0 %v4729_v1  ;;  %v4736_v6 = vld [vmem:[%s5187_s11 + $0x94] ss:$24 sps:$4 sm:$0xff]   ;;  %v4738_v8 = vld [vmem:[%s5187_s11 + $0x90] ss:$24 sps:$4 sm:$0xff]   ;;  %v4739_v9 = vld [vmem:[%s5187_s11 + $0xc4] ss:$24 sps:$4 sm:$0xff]  }
  0x5c   : > { %1208 = vmatprep.subr.bf16.mxu0 %v4730_v2  ;;  %v4741_v10 = vld [vmem:[%s5187_s11 + $0xc0] ss:$24 sps:$4 sm:$0xff]   ;;  %v4742_v11 = vld [vmem:[%s5187_s11 + $0xf4] ss:$24 sps:$4 sm:$0xff]   ;;  %v4744_v12 = vld [vmem:[%s5187_s11 + $0xf0] ss:$24 sps:$4 sm:$0xff]  }
  0x5d   : > { %v4745_v13 = vld [vmem:[%s5187_s11 + $0x124] ss:$24 sps:$4 sm:$0xff]   ;;  %v4747_v14 = vld [vmem:[%s5187_s11 + $0x120] ss:$24 sps:$4 sm:$0xff]   ;;  %v4748_v15 = vld [vmem:[%s5187_s11 + $0x154] ss:$24 sps:$4 sm:$0xff]  }
  0x5e   : > { %v4750_v16 = vld [vmem:[%s5187_s11 + $0x150] ss:$24 sps:$4 sm:$0xff]   ;;  %v4751_v17 = vld [vmem:[%s5187_s11 + $0x184] ss:$24 sps:$4 sm:$0xff]   ;;  %v4753_v18 = vld [vmem:[%s5187_s11 + $0x180] ss:$24 sps:$4 sm:$0xff]  }
  0x5f   : > { %v4754_v19 = vld [vmem:[%s5187_s11 + $0x1b4] ss:$24 sps:$4 sm:$0xff]   ;;  %v4756_v20 = vld [vmem:[%s5187_s11 + $0x1b0] ss:$24 sps:$4 sm:$0xff]   ;;  %v4757_v21 = vld [vmem:[%s5187_s11 + $0x1e4] ss:$24 sps:$4 sm:$0xff]  }
  0x60   : > { %v4759_v22 = vld [vmem:[%s5187_s11 + $0x1e0] ss:$24 sps:$4 sm:$0xff]   ;;  %v4760_v23 = vld [vmem:[%s5187_s11 + $0x214] ss:$24 sps:$4 sm:$0xff]   ;;  %v4762_v24 = vld [vmem:[%s5187_s11 + $0x210] ss:$24 sps:$4 sm:$0xff]  }
  0x61   : > { %v4763_v25 = vld [vmem:[%s5187_s11 + $0x244] ss:$24 sps:$4 sm:$0xff]   ;;  %v4765_v26 = vld [vmem:[%s5187_s11 + $0x240] ss:$24 sps:$4 sm:$0xff]   ;;  %v4766_v27 = vld [vmem:[%s5187_s11 + $0x274] ss:$24 sps:$4 sm:$0xff]  }
  0x62   : > { %v4768_v28 = vld [vmem:[%s5187_s11 + $0x270] ss:$24 sps:$4 sm:$0xff]   ;;  %v4769_v29 = vld [vmem:[%s5187_s11 + $0x2a4] ss:$24 sps:$4 sm:$0xff]   ;;  %v4771_v30 = vld [vmem:[%s5187_s11 + $0x2a0] ss:$24 sps:$4 sm:$0xff]  }
  0x63   : > { %1209 = vmatpush1.bf16.xpose.msra.mxu0 %v4732_v3  ;;  %v4772_v31 = vld [vmem:[%s5187_s11 + $0x2d4] ss:$24 sps:$4 sm:$0xff]   ;;  %v4774_v32 = vld [vmem:[%s5187_s11 + $0x2d0] ss:$24 sps:$4 sm:$0xff]   ;;  %s3799_s28 = sshll.u32 %s7071_s13, 1  ;;  %s5315_s18 = sshll.u32 %s4987_s14, 9 }
  0x64   : > { %1210 = vmatprep.subr.bf16.mxu0 %v4733_v4  ;;  %v4780_v33 = vld [vmem:[%s5187_s11 + $0xc] ss:$24 sps:$4 sm:$0xff]   ;;  %v4778_v35 = vld [vmem:[%s5187_s11 + $0x8] ss:$24 sps:$4 sm:$0xff]   ;;  %v4783_v37 = vld [vmem:[%s5187_s11 + $0x3c] ss:$24 sps:$4 sm:$0xff]   ;;  %s5309_s30 = sadd.s32 %s3800_s22, %s3799_s28 }
  0x65   : > { %v4828_v38 = vld [vmem:[%s5200_s27 + $0x30] ss:$24 sps:$4 sm:$0xff]   ;;  %v4831_v40 = vld [vmem:[%s5200_s27 + $0xc] ss:$24 sps:$4 sm:$0xff]   ;;  %v4789_v43 = vld [vmem:[%s5187_s11 + $0x9c] ss:$24 sps:$4 sm:$0xff]   ;;  %s535_s12 = scalar_lea.vmem %s7050_s2, %s5309_s30 }
  0x66   : > { %v4781_v39 = vld [vmem:[%s5187_s11 + $0x38] ss:$24 sps:$4 sm:$0xff]   ;;  %v4786_v41 = vld [vmem:[%s5187_s11 + $0x6c] ss:$24 sps:$4 sm:$0xff]   ;;  %v4784_v42 = vld [vmem:[%s5187_s11 + $0x68] ss:$24 sps:$4 sm:$0xff]  }
  0x67   : > { %v4787_v44 = vld [vmem:[%s5187_s11 + $0x98] ss:$24 sps:$4 sm:$0xff]   ;;  %v4792_v45 = vld [vmem:[%s5187_s11 + $0xcc] ss:$24 sps:$4 sm:$0xff]   ;;  %v4790_v46 = vld [vmem:[%s5187_s11 + $0xc8] ss:$24 sps:$4 sm:$0xff]  }
  0x68   : > { %v4795_v47 = vld [vmem:[%s5187_s11 + $0xfc] ss:$24 sps:$4 sm:$0xff]   ;;  %v4793_v48 = vld [vmem:[%s5187_s11 + $0xf8] ss:$24 sps:$4 sm:$0xff]   ;;  %v4798_v49 = vld [vmem:[%s5187_s11 + $0x12c] ss:$24 sps:$4 sm:$0xff]  }
  0x69   : > { %v4796_v50 = vld [vmem:[%s5187_s11 + $0x128] ss:$24 sps:$4 sm:$0xff]   ;;  %v4801_v51 = vld [vmem:[%s5187_s11 + $0x15c] ss:$24 sps:$4 sm:$0xff]   ;;  %v4799_v52 = vld [vmem:[%s5187_s11 + $0x158] ss:$24 sps:$4 sm:$0xff]  }
  0x6a   : > { %v4804_v53 = vld [vmem:[%s5187_s11 + $0x18c] ss:$24 sps:$4 sm:$0xff]   ;;  %v4802_v54 = vld [vmem:[%s5187_s11 + $0x188] ss:$24 sps:$4 sm:$0xff]   ;;  %v4807_v55 = vld [vmem:[%s5187_s11 + $0x1bc] ss:$24 sps:$4 sm:$0xff]  }
  0x6b   : > { %1211 = vmatpush1.bf16.xpose.msra.mxu0 %v4735_v5  ;;  %v4805_v56 = vld [vmem:[%s5187_s11 + $0x1b8] ss:$24 sps:$4 sm:$0xff]   ;;  %v4810_v57 = vld [vmem:[%s5187_s11 + $0x1ec] ss:$24 sps:$4 sm:$0xff]   ;;  %v4808_v58 = vld [vmem:[%s5187_s11 + $0x1e8] ss:$24 sps:$4 sm:$0xff]  }
  0x6c   : > { %1212 = vmatprep.subr.bf16.mxu0 %v4736_v6  ;;  %v4813_v59 = vld [vmem:[%s5187_s11 + $0x21c] ss:$24 sps:$4 sm:$0xff]   ;;  %v4811_v60 = vld [vmem:[%s5187_s11 + $0x218] ss:$24 sps:$4 sm:$0xff]   ;;  %v4816_v61 = vld [vmem:[%s5187_s11 + $0x24c] ss:$24 sps:$4 sm:$0xff]  }
  0x6d   : > { %v4814_v62 = vld [vmem:[%s5187_s11 + $0x248] ss:$24 sps:$4 sm:$0xff]   ;;  %v4819_v63 = vld [vmem:[%s5187_s11 + $0x27c] ss:$24 sps:$4 sm:$0xff]   ;;  %v4817_v0 = vld [vmem:[%s5187_s11 + $0x278] ss:$24 sps:$4 sm:$0xff]  }
  0x6e   : > { %v4822_v1 = vld [vmem:[%s5187_s11 + $0x2ac] ss:$24 sps:$4 sm:$0xff]   ;;  %v4820_v2 = vld [vmem:[%s5187_s11 + $0x2a8] ss:$24 sps:$4 sm:$0xff]   ;;  %v4827_v3 = vld [vmem:[%s5187_s11 + $0x2dc] ss:$24 sps:$4 sm:$0xff]  }
  0x6f   : > { %v4825_v4 = vld [vmem:[%s5187_s11 + $0x2d8] ss:$24 sps:$4 sm:$0xff]   ;;  %v4834_v5 = vld [vmem:[%s5187_s11 + $0x14] ss:$24 sps:$4 sm:$0xff]   ;;  %v4829_v6 = vld [vmem:[%s5200_s27 + $0x8] ss:$24 sps:$4 sm:$0xff]  }
  0x70   : > { %v4832_v7 = vld [vmem:[%s5187_s11 + $0x10] ss:$24 sps:$4 sm:$0xff]   ;;  %s5322_s13 = sadd.s32 128, %s5315_s18  ;;  %s1448_s20 = sadd.s32 1, %s5315_s18 }
  0x71   : > { %s1611_s24 = sadd.s32 1, %s5322_s13  ;;  %s1504_s21 = sadd.s32 2, %s5315_s18 }
  0x72   : > { %s1449_s22 = sld [smem:[#allocation2 + %s1448_s20]] }
  0x73   : > { %1213 = vmatpush1.bf16.xpose.msra.mxu0 %v4738_v8  ;;  %v4877_v8 = vld [vmem:[%s5200_s27 + $0x3c] ss:$24 sps:$4 sm:$0xff]   ;;  %s1612_s19 = sld [smem:[#allocation2 + %s1611_s24]] }
  0x74   : > { %1214 = vmatprep.subr.bf16.mxu0 %v4739_v9  ;;  %v4837_v9 = vld [vmem:[%s5187_s11 + $0x44] ss:$24 sps:$4 sm:$0xff]  }
  0x7b   : > { %1215 = vmatpush1.bf16.xpose.msra.mxu0 %v4741_v10  ;;  %v4879_v10 = vld [vmem:[%s5200_s27 + $0x38] ss:$24 sps:$4 sm:$0xff]  }
  0x7c   : > { %1216 = vmatprep.subr.bf16.mxu0 %v4742_v11  ;;  %v4835_v11 = vld [vmem:[%s5187_s11 + $0x40] ss:$24 sps:$4 sm:$0xff]  }
  0x83   : > { %1217 = vmatpush1.bf16.xpose.msra.mxu0 %v4744_v12  ;;  %v4885_v12 = vld [vmem:[%s5200_s27 + $0x14] ss:$24 sps:$4 sm:$0xff]  }
  0x84   : > { %1218 = vmatprep.subr.bf16.mxu0 %v4745_v13  ;;  %v4840_v13 = vld [vmem:[%s5187_s11 + $0x74] ss:$24 sps:$4 sm:$0xff]  }
  0x8b   : > { %1219 = vmatpush1.bf16.xpose.msra.mxu0 %v4747_v14  ;;  %v5007_v14 = vmov 0  }
  0x8c   : > { %1220 = vmatprep.subr.bf16.mxu0 %v4748_v15  ;;  %4725 = vset.pattern.permute.xlu0 %v5007_v14  ;;  %v1365_v15 = vld [vmem:[%s540_s26] sm:$0xff] }
  0x8d   : > { %1372 = vperm.xlu0 %4725, %v1365_v15   ;;  %4726 = vset.pattern.permute.xlu1 %v5007_v14 }
  0x93   : > { %1221 = vmatpush1.bf16.xpose.msra.mxu0 %v4750_v16  ;;  %v1367_v16 = vld [vmem:[%s540_s26 + $0x10] sm:$0xff] }
  0x94   : > { %1222 = vmatprep.subr.bf16.mxu0 %v4751_v17  ;;  %v1366_v17 = vld [vmem:[%s540_s26 + $0x8] sm:$0xff]  ;;  %1382 = vperm.xlu1 %4726, %v1367_v16  }
  0x95   : > { %1377 = vperm.xlu0 %4725, %v1366_v17  }
  0x9b   : > { %1223 = vmatpush1.bf16.xpose.msra.mxu0 %v4753_v18  ;;  %v4838_v18 = vld [vmem:[%s5187_s11 + $0x70] ss:$24 sps:$4 sm:$0xff]  }
  0x9c   : > { %1224 = vmatprep.subr.bf16.mxu0 %v4754_v19  ;;  %v1368_v19 = vld [vmem:[%s540_s26 + $0x18] sm:$0xff]  ;;  %s1680_s26 = sadd.s32 2, %s5322_s13 }
  0x9d   : > { %1387 = vperm.xlu1 %4726, %v1368_v19  }
  0xa3   : > { %1225 = vmatpush1.bf16.xpose.msra.mxu0 %v4756_v20  ;;  %v4843_v20 = vld [vmem:[%s5187_s11 + $0xa4] ss:$24 sps:$4 sm:$0xff]  }
  0xa4   : > { %1226 = vmatprep.subr.bf16.mxu0 %v4757_v21  ;;  %v4841_v21 = vld [vmem:[%s5187_s11 + $0xa0] ss:$24 sps:$4 sm:$0xff]  }
  0xab   : > { %1227 = vmatpush1.bf16.xpose.msra.mxu0 %v4759_v22  ;;  %v4846_v22 = vld [vmem:[%s5187_s11 + $0xd4] ss:$24 sps:$4 sm:$0xff]  }
  0xac   : > { %1228 = vmatprep.subr.bf16.mxu0 %v4760_v23  ;;  %v4844_v23 = vld [vmem:[%s5187_s11 + $0xd0] ss:$24 sps:$4 sm:$0xff]  }
  0xb3   : > { %1229 = vmatpush1.bf16.xpose.msra.mxu0 %v4762_v24  ;;  %v4849_v24 = vld [vmem:[%s5187_s11 + $0x104] ss:$24 sps:$4 sm:$0xff]  }
  0xb4   : > { %1230 = vmatprep.subr.bf16.mxu0 %v4763_v25  ;;  %v4847_v25 = vld [vmem:[%s5187_s11 + $0x100] ss:$24 sps:$4 sm:$0xff]  }
  0xbb   : > { %1231 = vmatpush1.bf16.xpose.msra.mxu0 %v4765_v26  ;;  %v4852_v26 = vld [vmem:[%s5187_s11 + $0x134] ss:$24 sps:$4 sm:$0xff]  }
  0xbc   : > { %1232 = vmatprep.subr.bf16.mxu0 %v4766_v27  ;;  %v4850_v27 = vld [vmem:[%s5187_s11 + $0x130] ss:$24 sps:$4 sm:$0xff]  }
  0xc3   : > { %1233 = vmatpush1.bf16.xpose.msra.mxu0 %v4768_v28  ;;  %v4855_v28 = vld [vmem:[%s5187_s11 + $0x164] ss:$24 sps:$4 sm:$0xff]  }
  0xc4   : > { %1234 = vmatprep.subr.bf16.mxu0 %v4769_v29  ;;  %v4853_v29 = vld [vmem:[%s5187_s11 + $0x160] ss:$24 sps:$4 sm:$0xff]  }
  0xcb   : > { %1235 = vmatpush1.bf16.xpose.msra.mxu0 %v4771_v30  ;;  %v4858_v30 = vld [vmem:[%s5187_s11 + $0x194] ss:$24 sps:$4 sm:$0xff]  }
  0xcc   : > { %1236 = vmatprep.subr.bf16.mxu0 %v4772_v31  ;;  %v4856_v31 = vld [vmem:[%s5187_s11 + $0x190] ss:$24 sps:$4 sm:$0xff]  }
  0xd3   : > { %1237 = vmatpush1.bf16.xpose.msra.mxu0 %v4774_v32  ;;  %v4861_v32 = vld [vmem:[%s5187_s11 + $0x1c4] ss:$24 sps:$4 sm:$0xff]  }
  0xd4   : > { %1259 = vmatprep.subr.bf16.mxu0 %v4780_v33  ;;  %v4859_v33 = vld [vmem:[%s5187_s11 + $0x1c0] ss:$24 sps:$4 sm:$0xff]  }
  0xda   : > { %1239 = vmatmul.mubr.bf16.vlgmr.msra.gmra.mrb[0].mxu0 %v4775_v34  ;;  %v4864_v34 = vld [vmem:[%s5187_s11 + $0x1f4] ss:$24 sps:$4 sm:$0xff]  }
  0xdb   : > { %1260 = vmatpush1.bf16.xpose.msra.mxu0 %v4778_v35  ;;  %1248 = vmatprep.mubr.bf16.mxu0 %v4823_v36  ;;  %v4862_v35 = vld [vmem:[%s5187_s11 + $0x1f0] ss:$24 sps:$4 sm:$0xff]   ;;  %v4867_v36 = vld [vmem:[%s5187_s11 + $0x224] ss:$24 sps:$4 sm:$0xff]  }
  0xdc   : > { %1261 = vmatprep.subr.bf16.mxu0 %v4783_v37  ;;  %v4865_v37 = vld [vmem:[%s5187_s11 + $0x220] ss:$24 sps:$4 sm:$0xff]  }
  0xe2   : > { %1249 = vmatmul.mubr.bf16.gmra.mrb[4].mxu0 %v4828_v38  ;;  %v4870_v38 = vld [vmem:[%s5187_s11 + $0x254] ss:$24 sps:$4 sm:$0xff]  }
  0xe3   : > { %1262 = vmatpush1.bf16.xpose.msra.mxu0 %v4781_v39  ;;  %1291 = vmatprep.mubr.bf16.mxu0 %v4831_v40  ;;  %v4868_v39 = vld [vmem:[%s5187_s11 + $0x250] ss:$24 sps:$4 sm:$0xff]   ;;  %v4873_v40 = vld [vmem:[%s5187_s11 + $0x284] ss:$24 sps:$4 sm:$0xff]  }
  0xe4   : > { %1263 = vmatprep.subr.bf16.mxu0 %v4786_v41  ;;  %v4871_v41 = vld [vmem:[%s5187_s11 + $0x280] ss:$24 sps:$4 sm:$0xff]  }
  0xeb   : > { %1264 = vmatpush1.bf16.xpose.msra.mxu0 %v4784_v42  ;;  %v4876_v42 = vld [vmem:[%s5187_s11 + $0x2b4] ss:$24 sps:$4 sm:$0xff]  }
  0xec   : > { %1265 = vmatprep.subr.bf16.mxu0 %v4789_v43  ;;  %v4874_v43 = vld [vmem:[%s5187_s11 + $0x2b0] ss:$24 sps:$4 sm:$0xff]  }
  0xf3   : > { %1266 = vmatpush1.bf16.xpose.msra.mxu0 %v4787_v44  ;;  %v4882_v44 = vld [vmem:[%s5187_s11 + $0x2e4] ss:$24 sps:$4 sm:$0xff]  }
  0xf4   : > { %1267 = vmatprep.subr.bf16.mxu0 %v4792_v45  ;;  %v4880_v45 = vld [vmem:[%s5187_s11 + $0x2e0] ss:$24 sps:$4 sm:$0xff]   ;;  %s1505_s11 = sld [smem:[#allocation2 + %s1504_s21]] }
  0xfb   : > { %1268 = vmatpush1.bf16.xpose.msra.mxu0 %v4790_v46  ;;  %v4883_v46 = vld [vmem:[%s5200_s27 + $0x10] ss:$24 sps:$4 sm:$0xff]  }
  0xfc   : > { %1269 = vmatprep.subr.bf16.mxu0 %v4795_v47  ;;  %v4886_v47 = vld [vmem:[%s5200_s27 + $0x44] ss:$24 sps:$4 sm:$0xff]  }
 0x103   : > { %1270 = vmatpush1.bf16.xpose.msra.mxu0 %v4793_v48  ;;  %v4888_v48 = vld [vmem:[%s5200_s27 + $0x40] ss:$24 sps:$4 sm:$0xff]   ;;  %s5327_s27 = sadd.s32 256, %s5315_s18 }
 0x104   : > { %1271 = vmatprep.subr.bf16.mxu0 %v4798_v49  ;;  %v7030_v49 = vlaneseq  ;;  %s1800_s28 = sadd.s32 1, %s5327_s27  ;;  %s1869_s1 = sadd.s32 2, %s5327_s27 }
 0x105   : > { %s1801_s0 = sld [smem:[#allocation2 + %s1800_s28]] }
 0x106   : > { %s5347_s2 = sld [smem:[#allocation2 + %s1869_s1]] }
 0x10b   : > { %1272 = vmatpush1.bf16.xpose.msra.mxu0 %v4796_v50  ;;  %v5312_v50 = vshrl.u32 %v7030_v49, 7 }
 0x10c   : > { %1273 = vmatprep.subr.bf16.mxu0 %v4801_v51  ;;  %v1373_v51 = vpop.permute.xlu0 %1372 }
 0x113   : > { %1274 = vmatpush1.bf16.xpose.msra.mxu0 %v4799_v52  ;;  %v1393_v52 = vsub.s32 0, %v5312_v50 }
 0x114   : > { %1275 = vmatprep.subr.bf16.mxu0 %v4804_v53  ;;  %v1397_v53 = vsub.s32 1, %v5312_v50 }
 0x11b   : > { %1276 = vmatpush1.bf16.xpose.msra.mxu0 %v4802_v54  ;;  %v1369_v54 = vld [vmem:[%s535_s12] sm:$0x3]  ;;  %s1681_s12 = sld [smem:[#allocation2 + %s1680_s26]] }
 0x11c   : > { %1277 = vmatprep.subr.bf16.mxu0 %v4807_v55  ;;  %v1394_v55 = vrot.slane %v1369_v54, %v1393_v52 }
 0x123   : > { %1278 = vmatpush1.bf16.xpose.msra.mxu0 %v4805_v56  ;;  %v1398_v56 = vrot.slane %v1369_v54, %v1397_v53 }
 0x124   : > { %1279 = vmatprep.subr.bf16.mxu0 %v4810_v57  ;;  %v1378_v57 = vpop.permute.xlu0 %1377 }
 0x12b   : > { %1280 = vmatpush1.bf16.xpose.msra.mxu0 %v4808_v58  ;;  %v1383_v58 = vpop.permute.xlu1 %1382 }
 0x12c   : > { %1281 = vmatprep.subr.bf16.mxu0 %v4813_v59  ;;  %v1401_v59 = vmul.f32 %v1394_v55, %v1373_v51 }
 0x12e   : > { %vm1409_vm0 = vcmp.ne.f32.partialorder %v1401_v59, 0.0 }
 0x133   : > { %1282 = vmatpush1.bf16.xpose.msra.mxu0 %v4811_v60  ;;  %v1402_v60 = vmul.f32 %v1398_v56, %v1373_v51 }
 0x134   : > { %1283 = vmatprep.subr.bf16.mxu0 %v4816_v61  ;;  %v1403_v61 = vmul.f32 %v1394_v55, %v1378_v57 }
 0x135   : > { %vm1410_vm1 = vcmp.ne.f32.partialorder %v1402_v60, 0.0 }
 0x136   : > { %vm1411_vm2 = vcmp.ne.f32.partialorder %v1403_v61, 0.0 }
 0x13b   : > { %1284 = vmatpush1.bf16.xpose.msra.mxu0 %v4814_v62  ;;  %v1404_v62 = vmul.f32 %v1398_v56, %v1378_v57 }
 0x13c   : > { %1285 = vmatprep.subr.bf16.mxu0 %v4819_v63  ;;  %v1388_v63 = vpop.permute.xlu1 %1387 }
 0x13d   : > { %vm1412_vm3 = vcmp.ne.f32.partialorder %v1404_v62, 0.0  ;;  %v5372_v14 = vmul.f32 %v1398_v56, %v1388_v63 }
 0x13f   : > { %vm1416_vm8 = vcmp.ne.f32.partialorder %v5372_v14, 0.0 }
 0x143   : > { %1286 = vmatpush1.bf16.xpose.msra.mxu0 %v4817_v0  ;;  %v5349_v0 = vstv %s1449_s22  ;;  %s5433_s22 = sld [smem:[#allocation2 + %s5322_s13]] }
 0x144   : > { %1287 = vmatprep.subr.bf16.mxu0 %v4822_v1  ;;  %v5351_v1 = vmul.f32 %v1394_v55, %v1383_v58 }
 0x146   : > { %vm1413_vm5 = vcmp.ne.f32.partialorder %v5351_v1, 0.0 }
 0x149   : > { %v5484_v1 = vstv %s5433_s22  ;;  %s2049_s22 = sld [smem:[#allocation6 + %s1448_s20]]  ;;  %s5010_s20 = smov 124  }
 0x14b   : > { %1288 = vmatpush1.bf16.xpose.msra.mxu0 %v4820_v2  ;;  %v5353_v2 = vstv %s1612_s19  ;;  %s5536_s19 = sld [smem:[#allocation2 + %s5327_s27]] }
 0x14c   : > { %1289 = vmatprep.subr.bf16.mxu0 %v4827_v3 }
 0x153   : > { %1290 = vmatpush1.bf16.xpose.msra.mxu0 %v4825_v4  ;;  %v5355_v4 = vstv %s1505_s11  ;;  %s1430_s11 = sld [smem:[#allocation2 + %s5315_s18]] }
 0x154   : > { %1312 = vmatprep.subr.bf16.mxu0 %v4834_v5  ;;  %v5357_v5 = vmul.f32 %v1398_v56, %v1383_v58 }
 0x156   : > { %vm1414_vm6 = vcmp.ne.f32.partialorder %v5357_v5, 0.0 }
 0x15a   : > { %1292 = vmatmul.mubr.bf16.vlgmr.msra.gmra.mrb[0].mxu0 %v4829_v6  ;;  %v5359_v6 = vstv %s1681_s12  ;;  %s1425_s12 = sld [smem:[#allocation4 + %s4987_s14]] }
 0x15b   : > { %1313 = vmatpush1.bf16.xpose.msra.mxu0 %v4832_v7  ;;  %1301 = vmatprep.mubr.bf16.mxu0 %v4877_v8 }
 0x15c   : > { %1314 = vmatprep.subr.bf16.mxu0 %v4837_v9  ;;  %v5363_v9 = vmul.f32 %v1394_v55, %v1388_v63 }
 0x15e   : > { %vm1415_vm7 = vcmp.ne.f32.partialorder %v5363_v9, 0.0 }
 0x162   : > { %1302 = vmatmul.mubr.bf16.gmra.mrb[4].mxu0 %v4879_v10  ;;  %v5365_v10 = vstv %s1801_s0  ;;  %s7035_s0 = smov 127  }
 0x163   : > { %1315 = vmatpush1.bf16.xpose.msra.mxu0 %v4835_v11  ;;  %1344 = vmatprep.mubr.bf16.mxu0 %v4885_v12 }
 0x164   : > { %1316 = vmatprep.subr.bf16.mxu0 %v4840_v13 }
 0x16b   : > { %1317 = vmatpush1.bf16.xpose.msra.mxu0 %v4838_v18 }
 0x16c   : > { %1318 = vmatprep.subr.bf16.mxu0 %v4843_v20 }
 0x173   : > { %1319 = vmatpush1.bf16.xpose.msra.mxu0 %v4841_v21 }
 0x174   : > { %1320 = vmatprep.subr.bf16.mxu0 %v4846_v22  ;;  %v5394_v22 = vstv %s5347_s2  ;;  %s5009_s2 = smov 126  }
 0x17b   : > { %1321 = vmatpush1.bf16.xpose.msra.mxu0 %v4844_v23 }
 0x17c   : > { %1322 = vmatprep.subr.bf16.mxu0 %v4849_v24 }
 0x183   : > { %1323 = vmatpush1.bf16.xpose.msra.mxu0 %v4847_v25 }
 0x184   : > { %1324 = vmatprep.subr.bf16.mxu0 %v4852_v26 }
 0x18b   : > { %1325 = vmatpush1.bf16.xpose.msra.mxu0 %v4850_v27 }
 0x18c   : > { %1326 = vmatprep.subr.bf16.mxu0 %v4855_v28 }
 0x193   : > { %1327 = vmatpush1.bf16.xpose.msra.mxu0 %v4853_v29 }
 0x194   : > { %1328 = vmatprep.subr.bf16.mxu0 %v4858_v30 }
 0x19b   : > { %1329 = vmatpush1.bf16.xpose.msra.mxu0 %v4856_v31 }
 0x19c   : > { %1330 = vmatprep.subr.bf16.mxu0 %v4861_v32 }
 0x1a3   : > { %1331 = vmatpush1.bf16.xpose.msra.mxu0 %v4859_v33 }
 0x1a4   : > { %1332 = vmatprep.subr.bf16.mxu0 %v4864_v34 }
 0x1ab   : > { %1333 = vmatpush1.bf16.xpose.msra.mxu0 %v4862_v35 }
 0x1ac   : > { %1334 = vmatprep.subr.bf16.mxu0 %v4867_v36 }
 0x1b3   : > { %1335 = vmatpush1.bf16.xpose.msra.mxu0 %v4865_v37 }
 0x1b4   : > { %1336 = vmatprep.subr.bf16.mxu0 %v4870_v38 }
 0x1bb   : > { %1337 = vmatpush1.bf16.xpose.msra.mxu0 %v4868_v39 }
 0x1bc   : > { %1338 = vmatprep.subr.bf16.mxu0 %v4873_v40 }
 0x1c3   : > { %1339 = vmatpush1.bf16.xpose.msra.mxu0 %v4871_v41 }
 0x1c4   : > { %1340 = vmatprep.subr.bf16.mxu0 %v4876_v42 }
 0x1cb   : > { %1341 = vmatpush1.bf16.xpose.msra.mxu0 %v4874_v43 }
 0x1cc   : > { %1342 = vmatprep.subr.bf16.mxu0 %v4882_v44 }
 0x1d3   : > { %1343 = vmatpush1.bf16.xpose.msra.mxu0 %v4880_v45 }
 0x1da   : > { %1345 = vmatmul.mubr.bf16.vlgmr.msra.gmra.mrb[0].mxu0 %v4883_v46 }
 0x1db   : > { %1354 = vmatprep.mubr.bf16.mxu0 %v4886_v47 }
 0x1e2   : > { %1355 = vmatmul.mubr.bf16.gmra.mrb[4].mxu0 %v4888_v48 }
 0x2ad   : > { %v1346_v3 = vpop.f32.mrb[0].mxu0 }
 0x2ae   : > { %v5361_v7 = vsel %vm1409_vm0, %v1346_v3, 0.0  ;;  %v1348_v8 = vpop.f32.mrb[1].mxu0 }
 0x2af   : > { %v5368_v11 = vsel %vm1410_vm1, %v1348_v8, 0.0  ;;  %v1350_v12 = vpop.f32.mrb[2].mxu0  ;;  %v1451_v13 = vmul.f32 %v5349_v0, %v5361_v7  ;;  %v1614_v15 = vmul.f32 %v5353_v2, %v5361_v7  ;;  %v1507_v23 = vmul.f32 %v5355_v4, %v5361_v7 }
 0x2b0   : > { %v5377_v16 = vsel %vm1411_vm2, %v1350_v12, 0.0  ;;  %v1352_v17 = vpop.f32.mrb[3].mxu0  ;;  %v1452_v18 = vmul.f32 %v5349_v0, %v5368_v11  ;;  %v1615_v19 = vmul.f32 %v5353_v2, %v5368_v11  ;;  %v1508_v24 = vmul.f32 %v5355_v4, %v5368_v11 }
 0x2b1   : > { %v5385_v20 = vsel %vm1412_vm3, %v1352_v17, 0.0  ;;  %1467 = vrot.lane.b32.xlu0 %v1451_v13, %s7035_s0  ;;  %v5391_v21 = vmul.f32 %v5353_v2, %v5377_v16  ;;  %v1630_v25 = vrot.slane %v1614_v15, 1  ;;  %v1683_v29 = vmul.f32 %v5359_v6, %v5361_v7 }
 0x2b2   : > { %1469 = vrot.lane.b32.xlu1 %v1452_v18, %s7035_s0  ;;  %v5403_v26 = vmul.f32 %v5353_v2, %v5385_v20  ;;  %v1633_v28 = vrot.slane %v1615_v19, 1  ;;  %v5412_v30 = vmul.f32 %v5359_v6, %v5377_v16  ;;  %v1684_v32 = vmul.f32 %v5359_v6, %v5368_v11 }
 0x2b3   : > { %v1631_v27 = vrot.slane %v5391_v21, 1  ;;  %v5419_v33 = vmul.f32 %v5359_v6, %v5385_v20  ;;  %v1803_v34 = vmul.f32 %v5365_v10, %v5361_v7  ;;  %v1699_v37 = vrot.slane %v1683_v29, 1 }
 0x2b4   : > { %v1634_v31 = vrot.slane %v5403_v26, 1  ;;  %v1700_v38 = vrot.slane %v5412_v30, 1  ;;  %v5430_v39 = vmul.f32 %v5365_v10, %v5377_v16  ;;  %v1702_v42 = vrot.slane %v1684_v32, 1 }
 0x2b5   : > { %1523 = vrot.lane.b32.xlu0 %v1507_v23, %s5009_s2  ;;  %v1356_v35 = vpop.f32.mrb[4].mxu0  ;;  %v1632_v36 = vsel %vm1580_vm4, %v1630_v25, %v1631_v27  ;;  %v1703_v43 = vrot.slane %v5419_v33, 1  ;;  %v1453_v45 = vmul.f32 %v5349_v0, %v5377_v16  ;;  %v1819_v47 = vrot.slane %v1803_v34, 2 }
 0x2b6   : > { %1525 = vrot.lane.b32.xlu1 %v1508_v24, %s5009_s2  ;;  %v1358_v40 = vpop.f32.mrb[5].mxu0  ;;  %v1635_v41 = vsel %vm1580_vm4, %v1633_v28, %v1634_v31  ;;  %v1701_v46 = vsel %vm1580_vm4, %v1699_v37, %v1700_v38  ;;  %v1820_v48 = vrot.slane %v5430_v39, 2  ;;  %v1454_v52 = vmul.f32 %v5349_v0, %v5385_v20 }
 0x2b7   : > { %v1360_v44 = vpop.f32.mrb[6].mxu0  ;;  %v1704_v53 = vsel %vm1580_vm4, %v1702_v42, %v1703_v43  ;;  %v1804_v54 = vmul.f32 %v5365_v10, %v5368_v11  ;;  %v1806_v55 = vmul.f32 %v5365_v10, %v5385_v20  ;;  %v1509_v56 = vmul.f32 %v5355_v4, %v5377_v16 }
 0x2b8   : > { %v1362_v51 = vpop.f32.mrb[7].mxu0  ;;  %v5457_v57 = vsel %vm1769_vm9, %v1819_v47, %v1820_v48  ;;  %v1872_v58 = vmul.f32 %v5394_v22, %v5361_v7  ;;  %v1874_v59 = vmul.f32 %v5394_v22, %v5377_v16  ;;  %v1873_v62 = vmul.f32 %v5394_v22, %v5368_v11 }
 0x2b9   : > { %1471 = vrot.lane.b32.xlu0 %v1453_v45, %s7035_s0  ;;  %v1822_v60 = vrot.slane %v1804_v54, 2  ;;  %v1823_v61 = vrot.slane %v1806_v55, 2  ;;  %v1875_v63 = vmul.f32 %v5394_v22, %v5385_v20  ;;  %v5470_v3 = vsel %vm1413_vm5, %v1356_v35, 0.0 }
 0x2ba   : > { %1473 = vrot.lane.b32.xlu1 %v1454_v52, %s7035_s0  ;;  %v1510_v8 = vmul.f32 %v5355_v4, %v5385_v20  ;;  %v1888_v12 = vrot.slane %v1872_v58, 2  ;;  %v1889_v13 = vrot.slane %v1874_v59, 2  ;;  %v5476_v15 = vsel %vm1414_vm6, %v1358_v40, 0.0 }
 0x2bb   : > { %v1824_v17 = vsel %vm1769_vm9, %v1822_v60, %v1823_v61  ;;  %v1891_v18 = vrot.slane %v1873_v62, 2  ;;  %v1892_v19 = vrot.slane %v1875_v63, 2  ;;  %v5488_v24 = vsel %vm1415_vm7, %v1360_v44, 0.0 }
 0x2bc   : > { %v5481_v23 = vsel %vm1769_vm9, %v1888_v12, %v1889_v13  ;;  %v5492_v5 = vsel %vm1416_vm8, %v1362_v51, 0.0  ;;  %v1618_v28 = vmul.f32 %v5353_v2, %v5470_v3  ;;  %v1619_v29 = vmul.f32 %v5353_v2, %v5476_v15 }
 0x2bd   : > { %1527 = vrot.lane.b32.xlu0 %v1509_v56, %s5009_s2  ;;  %v1893_v25 = vsel %vm1769_vm9, %v1891_v18, %v1892_v19  ;;  %v1687_v32 = vmul.f32 %v5359_v6, %v5470_v3  ;;  %v1688_v9 = vmul.f32 %v5359_v6, %v5476_v15  ;;  %v1807_v14 = vmul.f32 %v5365_v10, %v5470_v3 }
 0x2be   : > { %1529 = vrot.lane.b32.xlu1 %v1510_v8, %s5009_s2  ;;  %v1636_v33 = vrot.slane %v1618_v28, 1  ;;  %v1808_v34 = vmul.f32 %v5365_v10, %v5476_v15  ;;  %v1876_v35 = vmul.f32 %v5394_v22, %v5470_v3  ;;  %v1877_v37 = vmul.f32 %v5394_v22, %v5476_v15 }
 0x2bf   : > { %v1638_v39 = vrot.slane %v1619_v29, 1  ;;  %v1705_v40 = vrot.slane %v1687_v32, 1  ;;  %v1707_v42 = vrot.slane %v1688_v9, 1  ;;  %v1825_v44 = vrot.slane %v1807_v14, 2 }
 0x2c0   : > { %v5517_v45 = vsel %vm1580_vm4, %v1631_v27, %v1636_v33  ;;  %v1827_v47 = vrot.slane %v1808_v34, 2  ;;  %v1894_v51 = vrot.slane %v1876_v35, 2  ;;  %v1896_v52 = vrot.slane %v1877_v37, 2 }
 0x2c1   : > { %1644 = vrot.lane.b32.xlu0 %v1632_v36, %s7035_s0  ;;  %v5522_v54 = vsel %vm1580_vm4, %v1634_v31, %v1638_v39  ;;  %v5527_v36 = vsel %vm1580_vm4, %v1700_v38, %v1705_v40  ;;  %v5533_v21 = vsel %vm1769_vm9, %v1820_v48, %v1825_v44  ;;  %v5549_v30 = vmul.f32 %v5353_v2, %v5488_v24 }
 0x2c2   : > { %1646 = vrot.lane.b32.xlu1 %v1635_v41, %s7035_s0  ;;  %v5530_v41 = vsel %vm1580_vm4, %v1703_v43, %v1707_v42  ;;  %v5539_v27 = vsel %vm1769_vm9, %v1823_v61, %v1827_v47  ;;  %v5542_v26 = vsel %vm1769_vm9, %v1889_v13, %v1894_v51  ;;  %v5545_v31 = vsel %vm1769_vm9, %v1892_v19, %v1896_v52 }
 0x2c3   : > { %v5554_v38 = vmul.f32 %v5353_v2, %v5492_v5  ;;  %v5558_v43 = vmul.f32 %v5359_v6, %v5488_v24  ;;  %v5562_v48 = vmul.f32 %v5359_v6, %v5492_v5  ;;  %v5566_v55 = vmul.f32 %v5365_v10, %v5488_v24 }
 0x2c4   : > { %v5572_v2 = vmul.f32 %v5365_v10, %v5492_v5  ;;  %v5576_v56 = vmul.f32 %v5394_v22, %v5488_v24  ;;  %v5580_v6 = vmul.f32 %v5394_v22, %v5492_v5  ;;  %v1564_v28 = vmul.f32 %v5484_v1, %v5361_v7 }
 0x2c5   : > { %1713 = vrot.lane.b32.xlu0 %v1701_v46, %s5009_s2  ;;  %v1640_v46 = vrot.slane %v5549_v30, 1  ;;  %v1642_v58 = vrot.slane %v5554_v38, 1  ;;  %v1709_v59 = vrot.slane %v5558_v43, 1  ;;  %v7034_v60 = vrot.slane %v5566_v55, 2 }
 0x2c6   : > { %1715 = vrot.lane.b32.xlu1 %v1704_v53, %s5009_s2  ;;  %v1711_v53 = vrot.slane %v5562_v48, 1  ;;  %v7033_v10 = vrot.slane %v5572_v2, 2  ;;  %v7032_v62 = vrot.slane %v5576_v56, 2  ;;  %v7031_v22 = vrot.slane %v5580_v6, 2 }
 0x2c7   : > { %v5590_v61 = vsel %vm1580_vm4, %v1636_v33, %v1640_v46  ;;  %v5599_v63 = vsel %vm1580_vm4, %v1638_v39, %v1642_v58  ;;  %v5604_v8 = vsel %vm1580_vm4, %v1705_v40, %v1709_v59  ;;  %v5614_v13 = vsel %vm1769_vm9, %v1825_v44, %v7034_v60 }
 0x2c8   : > { %v5609_v12 = vsel %vm1580_vm4, %v1707_v42, %v1711_v53  ;;  %v5625_v18 = vsel %vm1769_vm9, %v1894_v51, %v7032_v62  ;;  %v5630_v19 = vsel %vm1769_vm9, %v1896_v52, %v7031_v22  ;;  %v1752_v29 = vstv %s5536_s19  ;;  %s2103_s19 = sld [smem:[#allocation6 + %s1504_s21]] }
 0x2c9   : > { %1833 = vrot.lane.b32.xlu0 %v5457_v57, %s7035_s0  ;;  %v5620_v57 = vsel %vm1769_vm9, %v1827_v47, %v7033_v10  ;;  %v1566_v32 = vmul.f32 %v5484_v1, %v5377_v16  ;;  %v1567_v9 = vmul.f32 %v5484_v1, %v5385_v20  ;;  %v1581_v14 = vrot.slane %v1564_v28, 1  ;;  %s2206_s21 = sld [smem:[#allocation6 + %s1611_s24]] }
 0x2ca   : > { %1835 = vrot.lane.b32.xlu1 %v1824_v17, %s7035_s0  ;;  %v1565_v17 = vmul.f32 %v5484_v1, %v5368_v11  ;;  %v1753_v37 = vmul.f32 %v1752_v29, %v5361_v7  ;;  %v1455_v39 = vmul.f32 %v5349_v0, %v5470_v3  ;;  %v1754_v40 = vmul.f32 %v1752_v29, %v5368_v11 }
 0x2cb   : > { %v1582_v33 = vrot.slane %v1566_v32, 1  ;;  %v1585_v35 = vrot.slane %v1567_v9, 1  ;;  %v1755_v42 = vmul.f32 %v1752_v29, %v5377_v16  ;;  %v1756_v44 = vmul.f32 %v1752_v29, %v5385_v20 }
 0x2cc   : > { %v1584_v34 = vrot.slane %v1565_v17, 1  ;;  %v1770_v51 = vrot.slane %v1753_v37, 2  ;;  %v1773_v28 = vrot.slane %v1754_v40, 2  ;;  %v1511_v32 = vmul.f32 %v5355_v4, %v5470_v3 }
 0x2cd   : > { %1902 = vrot.lane.b32.xlu0 %v5481_v23, %s5009_s2  ;;  %v1456_v23 = vmul.f32 %v5349_v0, %v5476_v15  ;;  %v5653_v47 = vsel %vm1580_vm4, %v1581_v14, %v1582_v33  ;;  %v1771_v52 = vrot.slane %v1755_v42, 2  ;;  %v1774_v17 = vrot.slane %v1756_v44, 2 }
 0x2ce   : > { %1904 = vrot.lane.b32.xlu1 %v1893_v25, %s5009_s2  ;;  %v5656_v25 = vsel %vm1580_vm4, %v1584_v34, %v1585_v35  ;;  %v1568_v9 = vmul.f32 %v5484_v1, %v5470_v3  ;;  %v1569_v37 = vmul.f32 %v5484_v1, %v5476_v15  ;;  %v1512_v40 = vmul.f32 %v5355_v4, %v5476_v15 }
 0x2cf   : > { %v5665_v14 = vsel %vm1769_vm9, %v1770_v51, %v1771_v52  ;;  %v5668_v34 = vsel %vm1769_vm9, %v1773_v28, %v1774_v17  ;;  %v1457_v42 = vmul.f32 %v5349_v0, %v5488_v24  ;;  %v5681_v28 = vmul.f32 %v5484_v1, %v5488_v24 }
 0x2d0   : > { %v1587_v44 = vrot.slane %v1568_v9, 1  ;;  %v1589_v51 = vrot.slane %v1569_v37, 1  ;;  %v5685_v22 = vmul.f32 %v5484_v1, %v5492_v5  ;;  %v5692_v10 = vmul.f32 %v1752_v29, %v5488_v24 }
 0x2d1   : > { %1475 = vrot.lane.b32.xlu0 %v1455_v39, %s7035_s0  ;;  %v1757_v39 = vmul.f32 %v1752_v29, %v5470_v3  ;;  %v1591_v1 = vrot.slane %v5681_v28, 1 }
 0x2d2   : > { %1477 = vrot.lane.b32.xlu1 %v1456_v23, %s7035_s0  ;;  %v1758_v23 = vmul.f32 %v1752_v29, %v5476_v15  ;;  %v5689_v62 = vsel %vm1580_vm4, %v1582_v33, %v1587_v44  ;;  %v5698_v37 = vsel %vm1580_vm4, %v1585_v35, %v1589_v51  ;;  %v1458_v33 = vmul.f32 %v5349_v0, %v5492_v5 }
 0x2d3   : > { %v1776_v49 = vrot.slane %v1757_v39, 2  ;;  %v1780_v60 = vrot.slane %v5692_v10, 2  ;;  %v5716_v35 = vsel %vm1580_vm4, %v1587_v44, %v1591_v1  ;;  %v1514_v44 = vmul.f32 %v5355_v4, %v5492_v5 }
 0x2d4   : > { %v1778_v9 = vrot.slane %v1758_v23, 2 }
 0x2d5   : > { %1531 = vrot.lane.b32.xlu0 %v1511_v32, %s5009_s2  ;;  %v5695_v32 = vmul.f32 %v1752_v29, %v5492_v5  ;;  %v5701_v39 = vsel %vm1769_vm9, %v1771_v52, %v1776_v49  ;;  %v5727_v0 = vsel %vm1769_vm9, %v1776_v49, %v1780_v60  ;;  %v7051_v49 = vrot.slane %v5566_v55, 2 }
 0x2d6   : > { %1533 = vrot.lane.b32.xlu1 %v1512_v40, %s5009_s2  ;;  %v1593_v40 = vrot.slane %v5685_v22, 1  ;;  %v5708_v23 = vsel %vm1769_vm9, %v1774_v17, %v1778_v9 }
 0x2d7   : > { %v1782_v29 = vrot.slane %v5695_v32, 2 }
 0x2d8   : > { %v5721_v52 = vsel %vm1580_vm4, %v1589_v51, %v1593_v40 }
 0x2d9   : > { %1479 = vrot.lane.b32.xlu0 %v1457_v42, %s7035_s0  ;;  %v5732_v17 = vsel %vm1769_vm9, %v1778_v9, %v1782_v29  ;;  %v1513_v42 = vmul.f32 %v5355_v4, %v5488_v24  ;;  %v7052_v4 = vrot.slane %v5572_v2, 2 }
 0x2da   : > { %1481 = vrot.lane.b32.xlu1 %v1458_v33, %s7035_s0 }
 0x2dd   : > { %1535 = vrot.lane.b32.xlu0 %v1513_v42, %s5009_s2 }
 0x2de   : > { %1537 = vrot.lane.b32.xlu1 %v1514_v44, %s5009_s2 }
 0x2e1   : > { %1648 = vrot.lane.b32.xlu0 %v5517_v45, %s7035_s0  ;;  %v7053_v45 = vrot.slane %v5576_v56, 2 }
 0x2e2   : > { %1650 = vrot.lane.b32.xlu1 %v5522_v54, %s7035_s0  ;;  %v7054_v54 = vrot.slane %v5580_v6, 2 }
 0x2e5   : > { %1717 = vrot.lane.b32.xlu0 %v5527_v36, %s5009_s2  ;;  %v5798_v36 = vstv %s1430_s11  ;;  %s2274_s11 = sld [smem:[#allocation6 + %s1680_s26]] }
 0x2e6   : > { %1719 = vrot.lane.b32.xlu1 %v5530_v41, %s5009_s2  ;;  %v1433_v41 = vmul.f32 %v5798_v36, %v5368_v11 }
 0x2e9   : > { %1837 = vrot.lane.b32.xlu0 %v5533_v21, %s7035_s0  ;;  %v5802_v21 = vstv %s1425_s12  ;;  %s2391_s12 = sld [smem:[#allocation6 + %s1800_s28]] }
 0x2ea   : > { %1839 = vrot.lane.b32.xlu1 %v5539_v27, %s7035_s0  ;;  %v1432_v27 = vmul.f32 %v5798_v36, %v5361_v7  ;;  %v1441_v30 = vadd.f32 %v1433_v41, %v5802_v21  ;;  %v1435_v7 = vmul.f32 %v5798_v36, %v5385_v20  ;;  %s2031_s28 = sld [smem:[#allocation6 + %s5315_s18]] }
 0x2ec   : > { %v1440_v43 = vadd.f32 %v1432_v27, %v5802_v21 }
 0x2ed   : > { %1906 = vrot.lane.b32.xlu0 %v5542_v26, %s5009_s2 }
 0x2ee   : > { %1908 = vrot.lane.b32.xlu1 %v5545_v31, %s5009_s2 }
 0x2f1   : > { %1656 = vrot.lane.b32.xlu0 %v1640_v46, %s7035_s0 }
 0x2f2   : > { %1658 = vrot.lane.b32.xlu1 %v1642_v58, %s7035_s0  ;;  %v1434_v58 = vmul.f32 %v5798_v36, %v5377_v16 }
 0x2f5   : > { %1725 = vrot.lane.b32.xlu0 %v1709_v59, %s5009_s2 }
 0x2f6   : > { %1727 = vrot.lane.b32.xlu1 %v1711_v53, %s5009_s2 }
 0x2f9   : > { %1845 = vrot.lane.b32.xlu0 %v7051_v49, %s7035_s0 }
 0x2fa   : > { %1847 = vrot.lane.b32.xlu1 %v7052_v4, %s7035_s0 }
 0x2fd   : > { %1652 = vrot.lane.b32.xlu0 %v5590_v61, %s7035_s0 }
 0x2fe   : > { %1654 = vrot.lane.b32.xlu1 %v5599_v63, %s7035_s0 }
 0x301   : > { %1721 = vrot.lane.b32.xlu0 %v5604_v8, %s5009_s2  ;;  %v1443_v8 = vadd.f32 %v1435_v7, %v5802_v21 }
 0x302   : > { %1723 = vrot.lane.b32.xlu1 %v5609_v12, %s5009_s2 }
 0x305   : > { %1841 = vrot.lane.b32.xlu0 %v5614_v13, %s7035_s0  ;;  %v1442_v13 = vadd.f32 %v1434_v58, %v5802_v21 }
 0x306   : > { %1843 = vrot.lane.b32.xlu1 %v5620_v57, %s7035_s0 }
 0x309   : > { %1910 = vrot.lane.b32.xlu0 %v5625_v18, %s5009_s2 }
 0x30a   : > { %1912 = vrot.lane.b32.xlu1 %v5630_v19, %s5009_s2 }
 0x30d   : > { %1914 = vrot.lane.b32.xlu0 %v7053_v45, %s5009_s2 }
 0x30e   : > { %1916 = vrot.lane.b32.xlu1 %v7054_v54, %s5009_s2 }
 0x323   : > { %v1468_v26 = vpop.permute.xlu0 %1467 }
 0x324   : > { %v1470_v31 = vpop.permute.xlu1 %1469 }
 0x325   : > { %v1484_v38 = vsel %vm1483_vm10, %v1468_v26, %v1470_v31  ;;  %v1497_v48 = vadd.f32 %v1470_v31, %v1441_v30 }
 0x326   : > { %v1496_v46 = vadd.f32 %v1484_v38, %v1440_v43 }
 0x327   : > { %v1524_v55 = vpop.permute.xlu0 %1523 }
 0x328   : > { %v1526_v2 = vpop.permute.xlu1 %1525 }
 0x329   : > { %v1540_v11 = vsel %vm1539_vm11, %v1524_v55, %v1526_v2  ;;  %v1553_v56 = vadd.f32 %v1526_v2, %v1497_v48  ;;  %v1436_v55 = vmul.f32 %v5798_v36, %v5470_v3 }
 0x32a   : > { %v1552_v6 = vadd.f32 %v1540_v11, %v1496_v46 }
 0x32b   : > { %v1472_v59 = vpop.permute.xlu0 %1471  ;;  %v1604_v53 = vadd.f32 %v5656_v25, %v1553_v56  ;;  %v1444_v7 = vadd.f32 %v1436_v55, %v5802_v21 }
 0x32c   : > { %v1474_v61 = vpop.permute.xlu1 %1473  ;;  %v1603_v63 = vadd.f32 %v5653_v47, %v1552_v6 }
 0x32d   : > { %v1485_v12 = vsel %vm1483_vm10, %v1472_v59, %v1474_v61  ;;  %v1499_v57 = vadd.f32 %v1474_v61, %v1443_v8 }
 0x32e   : > { %v1498_v19 = vadd.f32 %v1485_v12, %v1442_v13 }
 0x32f   : > { %v1528_v18 = vpop.permute.xlu0 %1527 }
 0x330   : > { %v1530_v20 = vpop.permute.xlu1 %1529 }
 0x331   : > { %v1541_v51 = vsel %vm1539_vm11, %v1528_v18, %v1530_v20  ;;  %v1555_v9 = vadd.f32 %v1530_v20, %v1499_v57 }
 0x332   : > { %v1554_v16 = vadd.f32 %v1541_v51, %v1498_v19 }
 0x333   : > { %v1645_v33 = vpop.permute.xlu0 %1644  ;;  %v1606_v25 = vadd.f32 %v5698_v37, %v1555_v9 }
 0x334   : > { %v1647_v42 = vpop.permute.xlu1 %1646  ;;  %v1605_v47 = vadd.f32 %v5689_v62, %v1554_v16  ;;  %v1437_v62 = vmul.f32 %v5798_v36, %v5476_v15 }
 0x335   : > { %v1660_v44 = vsel %vm1483_vm10, %v1645_v33, %v1647_v42  ;;  %v1673_v49 = vadd.f32 %v1647_v42, %v1604_v53 }
 0x336   : > { %v1672_v45 = vadd.f32 %v1660_v44, %v1603_v63  ;;  %v1445_v11 = vadd.f32 %v1437_v62, %v5802_v21 }
 0x337   : > { %v1714_v4 = vpop.permute.xlu0 %1713 }
 0x338   : > { %v1716_v54 = vpop.permute.xlu1 %1715 }
 0x339   : > { %v1729_v41 = vsel %vm1539_vm11, %v1714_v4, %v1716_v54  ;;  %v1742_v27 = vadd.f32 %v1716_v54, %v1673_v49 }
 0x33a   : > { %v1741_v26 = vadd.f32 %v1729_v41, %v1672_v45 }
 0x33b   : > { %v1834_v31 = vpop.permute.xlu0 %1833  ;;  %v1793_v30 = vadd.f32 %v5668_v34, %v1742_v27 }
 0x33c   : > { %v1792_v38 = vadd.f32 %v5665_v14, %v1741_v26  ;;  %v1836_v43 = vpop.permute.xlu1 %1835 }
 0x33d   : > { %v1862_v54 = vadd.f32 %v1836_v43, %v1793_v30 }
 0x33f   : > { %v1903_v37 = vpop.permute.xlu0 %1902 }
 0x340   : > { %v1905_v48 = vpop.permute.xlu1 %1904 }
 0x341   : > { %v1918_v41 = vsel %vm1539_vm11, %v1903_v37, %v1905_v48 }
 0x343   : > { %v1476_v46 = vpop.permute.xlu0 %1475 }
 0x344   : > { %v1478_v2 = vpop.permute.xlu1 %1477 }
 0x345   : > { %v1486_v56 = vsel %vm1483_vm10, %v1476_v46, %v1478_v2  ;;  %v1501_v34 = vadd.f32 %v1478_v2, %v1445_v11 }
 0x346   : > { %v1500_v14 = vadd.f32 %v1486_v56, %v1444_v7 }
 0x347   : > { %v1532_v6 = vpop.permute.xlu0 %1531 }
 0x348   : > { %v1534_v58 = vpop.permute.xlu1 %1533 }
 0x349   : > { %v1542_v59 = vsel %vm1539_vm11, %v1532_v6, %v1534_v58  ;;  %v1557_v53 = vadd.f32 %v1534_v58, %v1501_v34  ;;  %v1439_v6 = vmul.f32 %v5798_v36, %v5492_v5 }
 0x34a   : > { %v1556_v61 = vadd.f32 %v1542_v59, %v1500_v14  ;;  %v1438_v59 = vmul.f32 %v5798_v36, %v5488_v24 }
 0x34b   : > { %v1480_v15 = vpop.permute.xlu0 %1479  ;;  %v5835_v63 = vadd.f32 %v5721_v52, %v1557_v53  ;;  %v1849_v52 = vsel %vm1483_vm10, %v1834_v31, %v1836_v43 }
 0x34c   : > { %v1482_v3 = vpop.permute.xlu1 %1481  ;;  %v5838_v8 = vadd.f32 %v5716_v35, %v1556_v61  ;;  %v1861_v27 = vadd.f32 %v1849_v52, %v1792_v38  ;;  %v1447_v61 = vadd.f32 %v1439_v6, %v5802_v21  ;;  %v1446_v5 = vadd.f32 %v1438_v59, %v5802_v21 }
 0x34e   : > { %v1930_v55 = vadd.f32 %v1918_v41, %v1861_v27 }
 0x34f   : > { %v1536_v12 = vpop.permute.xlu0 %1535 }
 0x350   : > { %v1538_v13 = vpop.permute.xlu1 %1537  ;;  %v1946_v37 = vrot.slane %v1930_v55, 1 }
 0x353   : > { %v1649_v57 = vpop.permute.xlu0 %1648 }
 0x354   : > { %v1651_v18 = vpop.permute.xlu1 %1650 }
 0x355   : > { %v1661_v19 = vsel %vm1483_vm10, %v1649_v57, %v1651_v18  ;;  %v1675_v20 = vadd.f32 %v1651_v18, %v1606_v25  ;;  %v1487_v57 = vsel %vm1483_vm10, %v1480_v15, %v1482_v3 }
 0x356   : > { %v1674_v9 = vadd.f32 %v1661_v19, %v1605_v47  ;;  %v1931_v47 = vadd.f32 %v1905_v48, %v1862_v54 }
 0x357   : > { %v1718_v51 = vpop.permute.xlu0 %1717 }
 0x358   : > { %v1720_v16 = vpop.permute.xlu1 %1719 }
 0x359   : > { %v1730_v33 = vsel %vm1539_vm11, %v1718_v51, %v1720_v16  ;;  %v1744_v42 = vadd.f32 %v1720_v16, %v1675_v20  ;;  %v1503_v20 = vadd.f32 %v1482_v3, %v1447_v61  ;;  %v1543_v51 = vsel %vm1539_vm11, %v1536_v12, %v1538_v13 }
 0x35a   : > { %v1743_v44 = vadd.f32 %v1730_v33, %v1674_v9  ;;  %v1502_v9 = vadd.f32 %v1487_v57, %v1446_v5 }
 0x35b   : > { %v1838_v49 = vpop.permute.xlu0 %1837  ;;  %v1795_v35 = vadd.f32 %v5708_v23, %v1744_v42  ;;  %v1559_v24 = vadd.f32 %v1538_v13, %v1503_v20 }
 0x35c   : > { %v1794_v4 = vadd.f32 %v5701_v39, %v1743_v44  ;;  %v1840_v45 = vpop.permute.xlu1 %1839  ;;  %v1949_v39 = vrot.slane %v1931_v47, 1  ;;  %v1558_v16 = vadd.f32 %v1543_v51, %v1502_v9  ;;  %v5926_v9 = vstv %s2049_s22  ;;  %s2459_s22 = sld [smem:[#allocation6 + %s1869_s1]]  ;;  %s7055_s1 = smov 127  }
 0x35d   : > { %v1850_v25 = vsel %vm1483_vm10, %v1838_v49, %v1840_v45  ;;  %v1864_v26 = vadd.f32 %v1840_v45, %v1795_v35  ;;  %v1610_v44 = vadd.f32 %v1593_v40, %v1559_v24 }
 0x35e   : > { %v1863_v46 = vadd.f32 %v1850_v25, %v1794_v4  ;;  %v1609_v21 = vadd.f32 %v1591_v1, %v1558_v16 }
 0x35f   : > { %v1907_v62 = vpop.permute.xlu0 %1906 }
 0x360   : > { %v1909_v2 = vpop.permute.xlu1 %1908 }
 0x361   : > { %v1919_v31 = vsel %vm1539_vm11, %v1907_v62, %v1909_v2  ;;  %v5848_v11 = vadd.f32 %v1909_v2, %v1864_v26 }
 0x362   : > { %v5850_v23 = vadd.f32 %v1919_v31, %v1863_v46 }
 0x363   : > { %v1950_v30 = vrot.slane %v5848_v11, 1  ;;  %v1657_v43 = vpop.permute.xlu0 %1656 }
 0x364   : > { %v1947_v56 = vrot.slane %v5850_v23, 1  ;;  %v1659_v38 = vpop.permute.xlu1 %1658 }
 0x365   : > { %v1951_v48 = vsel %vm1580_vm4, %v1949_v39, %v1950_v30  ;;  %v1663_v52 = vsel %vm1483_vm10, %v1657_v43, %v1659_v38  ;;  %v1679_v13 = vadd.f32 %v1659_v38, %v1610_v44 }
 0x366   : > { %v5857_v7 = vmax.f32 %v1931_v47, %v1951_v48  ;;  %v1948_v34 = vsel %vm1580_vm4, %v1946_v37, %v1947_v56  ;;  %v1678_v54 = vadd.f32 %v1663_v52, %v1609_v21 }
 0x367   : > { %v1726_v14 = vpop.permute.xlu0 %1725  ;;  %v5864_v58 = vmax.f32 %v1930_v55, %v1948_v34 }
 0x368   : > { %1986 = vrot.lane.b32.xlu1 %v5857_v7, %s7035_s0  ;;  %v1728_v53 = vpop.permute.xlu1 %1727 }
 0x369   : > { %1984 = vrot.lane.b32.xlu0 %v5864_v58, %s7035_s0  ;;  %v1732_v35 = vsel %vm1539_vm11, %v1726_v14, %v1728_v53  ;;  %v1748_v40 = vadd.f32 %v1728_v53, %v1679_v13  ;;  %v5960_v13 = vstv %s2206_s21 }
 0x36b   : > { %v1846_v18 = vpop.permute.xlu0 %1845 }
 0x36c   : > { %v1848_v19 = vpop.permute.xlu1 %1847 }
 0x36d   : > { %v1852_v2 = vsel %vm1483_vm10, %v1846_v18, %v1848_v19 }
 0x36f   : > { %v1653_v36 = vpop.permute.xlu0 %1652 }
 0x370   : > { %v1655_v33 = vpop.permute.xlu1 %1654 }
 0x371   : > { %v1662_v42 = vsel %vm1483_vm10, %v1653_v36, %v1655_v33  ;;  %v1677_v15 = vadd.f32 %v1655_v33, %v5835_v63  ;;  %v1747_v63 = vadd.f32 %v1732_v35, %v1678_v54  ;;  %v5962_v35 = vstv %s2274_s11  ;;  %s557_s11 = scalar_lea.vmem %s7027_s10, %s5309_s30 }
 0x372   : > { %v1676_v3 = vadd.f32 %v1662_v42, %v5838_v8  ;;  %v1799_v8 = vadd.f32 %v1782_v29, %v1748_v40  ;;  %v5935_v42 = vstv %s2103_s19  ;;  %s2158_s19 = sld [smem:[#allocation6 + %s5322_s13]]  ;;  %s4636_s13 = smul.u32 2976, %s5177_s23 }
 0x373   : > { %v1722_v49 = vpop.permute.xlu0 %1721  ;;  %v1798_v62 = vadd.f32 %v1780_v60, %v1747_v63 }
 0x374   : > { %v1724_v12 = vpop.permute.xlu1 %1723  ;;  %s6209_s26 = scalar_lea.vmem %s7025_s8, %s4636_s13 }
 0x375   : > { %v1731_v4 = vsel %vm1539_vm11, %v1722_v49, %v1724_v12  ;;  %v1746_v45 = vadd.f32 %v1724_v12, %v1677_v15  ;;  %v1867_v38 = vadd.f32 %v1852_v2, %v1798_v62 }
 0x376   : > { %v1745_v22 = vadd.f32 %v1731_v4, %v1676_v3 }
 0x377   : > { %v1842_v41 = vpop.permute.xlu0 %1841  ;;  %v1797_v25 = vadd.f32 %v5732_v17, %v1746_v45 }
 0x378   : > { %v1796_v27 = vadd.f32 %v5727_v0, %v1745_v22  ;;  %v1844_v28 = vpop.permute.xlu1 %1843  ;;  %v1868_v0 = vadd.f32 %v1848_v19, %v1799_v8  ;;  %v5972_v22 = vstv %s2391_s12  ;;  %v5994_v62 = vstv %s2158_s19 }
 0x379   : > { %v1851_v1 = vsel %vm1483_vm10, %v1842_v41, %v1844_v28  ;;  %v1866_v47 = vadd.f32 %v1844_v28, %v1797_v25 }
 0x37a   : > { %v1865_v55 = vadd.f32 %v1851_v1, %v1796_v27  ;;  %v5985_v27 = vstv %s2459_s22 }
 0x37b   : > { %v1911_v26 = vpop.permute.xlu0 %1910 }
 0x37c   : > { %v1913_v46 = vpop.permute.xlu1 %1912 }
 0x37d   : > { %v1920_v17 = vsel %vm1539_vm11, %v1911_v26, %v1913_v46  ;;  %v1935_v31 = vadd.f32 %v1913_v46, %v1866_v47 }
 0x37e   : > { %v1934_v39 = vadd.f32 %v1920_v17, %v1865_v55 }
 0x37f   : > { %v1954_v43 = vrot.slane %v1935_v31, 1  ;;  %v1915_v37 = vpop.permute.xlu0 %1914 }
 0x380   : > { %v1952_v48 = vrot.slane %v1934_v39, 1  ;;  %v1917_v32 = vpop.permute.xlu1 %1916 }
 0x381   : > { %v1921_v29 = vsel %vm1539_vm11, %v1915_v37, %v1917_v32  ;;  %v1937_v34 = vadd.f32 %v1917_v32, %v1868_v0  ;;  %v1955_v60 = vsel %vm1580_vm4, %v1950_v30, %v1954_v43 }
 0x382   : > { %v1936_v10 = vadd.f32 %v1921_v29, %v1867_v38  ;;  %v1971_v6 = vmax.f32 %v5848_v11, %v1955_v60  ;;  %v1953_v14 = vsel %vm1580_vm4, %v1947_v56, %v1952_v48 }
 0x383   : > { %v1958_v59 = vrot.slane %v1937_v34, 1  ;;  %v1970_v53 = vmax.f32 %v5850_v23, %v1953_v14 }
 0x384   : > { %v1956_v61 = vrot.slane %v1936_v10, 1  ;;  %1990 = vrot.lane.b32.xlu1 %v1971_v6, %s7035_s0 }
 0x385   : > { %v5905_v57 = vmax.f32 %v1937_v34, %v1958_v59  ;;  %1988 = vrot.lane.b32.xlu0 %v1970_v53, %s7035_s0  ;;  %v1959_v30 = vsel %vm1580_vm4, %v1954_v43, %v1958_v59 }
 0x386   : > { %v5909_v18 = vmax.f32 %v1935_v31, %v1959_v30  ;;  %v1957_v11 = vsel %vm1580_vm4, %v1952_v48, %v1956_v61  ;;  %v5912_v5 = vmax.f32 %v1936_v10, %v1956_v61 }
 0x387   : > { %v5914_v19 = vmax.f32 %v1934_v39, %v1957_v11 }
 0x388   : > { %1994 = vrot.lane.b32.xlu1 %v5909_v18, %s7035_s0 }
 0x389   : > { %1992 = vrot.lane.b32.xlu0 %v5914_v19, %s7035_s0  ;;  %s2342_s0 = sld [smem:[#allocation6 + %s5327_s27]] }
 0x38f   : > { %v6001_v2 = vstv %s2342_s0  ;;  %s2028_s0 = sld [smem:[#allocation7 + %s4987_s14]]  ;;  %s3804_s14 = sshll.u32 %s5177_s23, 1 }
 0x3da   : > { %v1987_v23 = vpop.permute.xlu1 %1986 }
 0x3db   : > { %v2013_v56 = vmax.f32 %v5857_v7, %v1987_v23  ;;  %v1985_v20 = vpop.permute.xlu0 %1984 }
 0x3dc   : > { %v2000_v51 = vsel %vm1483_vm10, %v1985_v20, %v1987_v23 }
 0x3dd   : > { %v5928_v24 = vmax.f32 %v2013_v56, 0.0  ;;  %v2012_v36 = vmax.f32 %v5864_v58, %v2000_v51 }
 0x3df   : > { %v5931_v16 = vmax.f32 %v2012_v36, 0.0  ;;  %v2052_v33 = vmul.f32 %v5926_v9, %v5928_v24  ;;  %v2106_v58 = vmul.f32 %v5935_v42, %v5928_v24  ;;  %v2209_v41 = vmul.f32 %v5960_v13, %v5928_v24 }
 0x3e0   : > { %v2277_v25 = vmul.f32 %v5962_v35, %v5928_v24  ;;  %v2394_v26 = vmul.f32 %v5972_v22, %v5928_v24  ;;  %v6008_v0 = vmul.f32 %v5985_v27, %v5928_v24  ;;  %v2161_v59 = vmul.f32 %v5994_v62, %v5928_v24 }
 0x3e1   : > { %2069 = vrot.lane.b32.xlu1 %v2052_v33, %s5009_s2  ;;  %v2051_v7 = vmul.f32 %v5926_v9, %v5931_v16  ;;  %v2105_v44 = vmul.f32 %v5935_v42, %v5931_v16  ;;  %v2208_v47 = vmul.f32 %v5960_v13, %v5931_v16  ;;  %v2227_v31 = vrot.slane %v2209_v41, 2 }
 0x3e2   : > { %v2295_v39 = vrot.slane %v2277_v25, 2  ;;  %v2276_v38 = vmul.f32 %v5962_v35, %v5931_v16  ;;  %v2412_v34 = vrot.slane %v2394_v26, 4  ;;  %v2393_v60 = vmul.f32 %v5972_v22, %v5931_v16 }
 0x3e3   : > { %2067 = vrot.lane.b32.xlu0 %v2051_v7, %s5009_s2  ;;  %v2224_v32 = vrot.slane %v2208_v47, 2  ;;  %v2480_v30 = vrot.slane %v6008_v0, 4  ;;  %v2345_v36 = vmul.f32 %v6001_v2, %v5928_v24  ;;  %v2344_v33 = vmul.f32 %v6001_v2, %v5931_v16 }
 0x3e4   : > { %v2292_v23 = vrot.slane %v2276_v38, 2  ;;  %v2409_v51 = vrot.slane %v2393_v60, 4 }
 0x3e5   : > { %2123 = vrot.lane.b32.xlu1 %v2106_v58, %s5010_s20  ;;  %v2361_v38 = vrot.slane %v2344_v33, 4 }
 0x3e7   : > { %2121 = vrot.lane.b32.xlu0 %v2105_v44, %s5010_s20 }
 0x3f6   : > { %v1991_v52 = vpop.permute.xlu1 %1990 }
 0x3f7   : > { %v2015_v15 = vmax.f32 %v1971_v6, %v1991_v52  ;;  %v1989_v49 = vpop.permute.xlu0 %1988 }
 0x3f8   : > { %v2001_v21 = vsel %vm1483_vm10, %v1989_v49, %v1991_v52  ;;  %v2179_v52 = vrot.slane %v2161_v59, 2 }
 0x3f9   : > { %v5958_v3 = vmax.f32 %v2015_v15, 0.0  ;;  %v2014_v12 = vmax.f32 %v1970_v53, %v2001_v21 }
 0x3fa   : > { %v1995_v28 = vpop.permute.xlu1 %1994 }
 0x3fb   : > { %v5964_v4 = vmax.f32 %v2014_v12, 0.0  ;;  %v2054_v45 = vmul.f32 %v5926_v9, %v5958_v3  ;;  %v5970_v54 = vmul.f32 %v5960_v13, %v5958_v3  ;;  %v1993_v1 = vpop.permute.xlu0 %1992  ;;  %v2108_v8 = vmul.f32 %v5935_v42, %v5958_v3 }
 0x3fc   : > { %v5999_v46 = vmul.f32 %v5962_v35, %v5958_v3  ;;  %v2002_v43 = vsel %vm1483_vm10, %v1993_v1, %v1995_v28  ;;  %v6021_v29 = vmul.f32 %v5972_v22, %v5958_v3  ;;  %v2017_v10 = vmax.f32 %v5909_v18, %v1995_v28 }
 0x3fd   : > { %2073 = vrot.lane.b32.xlu1 %v2054_v45, %s5009_s2  ;;  %v2053_v40 = vmul.f32 %v5926_v9, %v5964_v4  ;;  %v5983_v63 = vmul.f32 %v5960_v13, %v5964_v4  ;;  %v2228_v55 = vrot.slane %v5970_v54, 2  ;;  %v2107_v17 = vmul.f32 %v5935_v42, %v5964_v4 }
 0x3fe   : > { %v6016_v48 = vmul.f32 %v5962_v35, %v5964_v4  ;;  %v2296_v14 = vrot.slane %v5999_v46, 2  ;;  %v2016_v53 = vmax.f32 %v5914_v19, %v2002_v43  ;;  %v6036_v61 = vmul.f32 %v5972_v22, %v5964_v4 }
 0x3ff   : > { %2071 = vrot.lane.b32.xlu0 %v2053_v40, %s5009_s2  ;;  %v2225_v37 = vrot.slane %v5983_v63, 2  ;;  %v2229_v6 = vsel %vm1769_vm9, %v2227_v31, %v2228_v55  ;;  %v2160_v18 = vmul.f32 %v5994_v62, %v5931_v16  ;;  %v2461_v19 = vmul.f32 %v5985_v27, %v5931_v16 }
 0x400   : > { %v2293_v56 = vrot.slane %v6016_v48, 2  ;;  %v2413_v20 = vrot.slane %v6021_v29, 4  ;;  %v6053_v7 = vmax.f32 %v2017_v10, 0.0  ;;  %v2297_v58 = vsel %vm1769_vm9, %v2295_v39, %v2296_v14 }
 0x401   : > { %2127 = vrot.lane.b32.xlu1 %v2108_v8, %s5010_s20  ;;  %v2226_v11 = vsel %vm1769_vm9, %v2224_v32, %v2225_v37  ;;  %v6060_v44 = vmul.f32 %v5985_v27, %v5958_v3  ;;  %v6062_v15 = vmax.f32 %v2016_v53, 0.0  ;;  %v2410_v49 = vrot.slane %v6036_v61, 4 }
 0x402   : > { %v6068_v21 = vmul.f32 %v5994_v62, %v5958_v3  ;;  %v2176_v12 = vrot.slane %v2160_v18, 2  ;;  %v2294_v45 = vsel %vm1769_vm9, %v2292_v23, %v2293_v56  ;;  %v2463_v40 = vmul.f32 %v5985_v27, %v5964_v4 }
 0x403   : > { %2125 = vrot.lane.b32.xlu0 %v2107_v17, %s5010_s20  ;;  %v6075_v41 = vmul.f32 %v5994_v62, %v5964_v4  ;;  %v6079_v25 = vmul.f32 %v6001_v2, %v5958_v3  ;;  %v2414_v28 = vsel %vm2360_vm12, %v2412_v34, %v2413_v20  ;;  %v2364_v8 = vrot.slane %v2345_v36, 4 }
 0x404   : > { %v2180_v1 = vrot.slane %v6068_v21, 2  ;;  %v6088_v47 = vmul.f32 %v6001_v2, %v5964_v4  ;;  %v2481_v26 = vrot.slane %v6060_v44, 4  ;;  %v6093_v17 = vmul.f32 %v5960_v13, %v6053_v7 }
 0x405   : > { %2240 = vrot.lane.b32.xlu1 %v2229_v6, %s5009_s2  ;;  %v2177_v31 = vrot.slane %v6075_v41, 2  ;;  %v2365_v39 = vrot.slane %v6079_v25, 4  ;;  %v6100_v0 = vmul.f32 %v5960_v13, %v6062_v15  ;;  %v2411_v32 = vsel %vm2360_vm12, %v2409_v51, %v2410_v49 }
 0x406   : > { %v6105_v43 = vsel %vm1769_vm9, %v2179_v52, %v2180_v1  ;;  %v2362_v48 = vrot.slane %v6088_v47, 4  ;;  %v2478_v34 = vrot.slane %v2463_v40, 4  ;;  %v2482_v59 = vsel %vm2360_vm12, %v2480_v30, %v2481_v26 }
 0x407   : > { %2238 = vrot.lane.b32.xlu0 %v2226_v11, %s5009_s2  ;;  %v6112_v60 = vsel %vm1769_vm9, %v2176_v12, %v2177_v31  ;;  %v6117_v10 = vsel %vm2360_vm12, %v2364_v8, %v2365_v39  ;;  %v2477_v53 = vrot.slane %v2461_v19, 4  ;;  %v2232_v61 = vrot.slane %v6093_v17, 2 }
 0x408   : > { %v6123_v6 = vsel %vm2360_vm12, %v2361_v38, %v2362_v48  ;;  %v6129_v18 = vmul.f32 %v5962_v35, %v6053_v7  ;;  %v2230_v23 = vrot.slane %v6100_v0, 2  ;;  %v6136_v51 = vmul.f32 %v5962_v35, %v6062_v15  ;;  %v2606_v38 = vld [vmem:[%s6209_s26 + $0x28] sm:$0xff] }
 0x409   : > { %2308 = vrot.lane.b32.xlu1 %v2297_v58, %s5010_s20  ;;  %v2479_v11 = vsel %vm2360_vm12, %v2477_v53, %v2478_v34  ;;  %v2233_v30 = vsel %vm1769_vm9, %v2228_v55, %v2232_v61  ;;  %v6147_v36 = vmul.f32 %v5972_v22, %v6053_v7  ;;  %v6158_v54 = vmul.f32 %v5972_v22, %v6062_v15  ;;  %v2605_v53 = vld [vmem:[%s6209_s26 + $0x20] sm:$0xff] }
 0x40a   : > { %v2300_v19 = vrot.slane %v6129_v18, 2  ;;  %v2231_v33 = vsel %vm1769_vm9, %v2225_v37, %v2230_v23  ;;  %v2298_v58 = vrot.slane %v6136_v51, 2  ;;  %v6169_v63 = vmul.f32 %v5985_v27, %v6053_v7 }
 0x40b   : > { %2306 = vrot.lane.b32.xlu0 %v2294_v45, %s5010_s20  ;;  %v2417_v44 = vrot.slane %v6147_v36, 4  ;;  %v7039_v52 = vrot.slane %v6158_v54, 4  ;;  %v6178_v46 = vmul.f32 %v5985_v27, %v6062_v15  ;;  %v7056_v51 = vrot.slane %v6158_v54, 4 }
 0x40c   : > { %v2301_v55 = vsel %vm1769_vm9, %v2296_v14, %v2300_v19  ;;  %v2299_v37 = vsel %vm1769_vm9, %v2293_v56, %v2298_v58  ;;  %v7038_v12 = vrot.slane %v6169_v63, 4  ;;  %v7057_v36 = vrot.slane %v6169_v63, 4 }
 0x40d   : > { %2425 = vrot.lane.b32.xlu1 %v2414_v28, %s5009_s2  ;;  %v2418_v14 = vsel %vm2360_vm12, %v2413_v20, %v2417_v44  ;;  %v2416_v56 = vsel %vm2360_vm12, %v2410_v49, %v7039_v52  ;;  %v7037_v45 = vrot.slane %v6178_v46, 4  ;;  %v2602_v20 = vld [vmem:[%s6209_s26 + $0x8] sm:$0xff]  ;;  %v2604_v49 = vld [vmem:[%s6209_s26 + $0x18] sm:$0xff]  ;;  %v2601_v28 = vld [vmem:[%s6209_s26] sm:$0xff]  ;;  %v7058_v54 = vrot.slane %v6178_v46, 4 }
 0x40e   : > { %v2486_v40 = vsel %vm2360_vm12, %v2481_v26, %v7038_v12  ;;  %v4257_v8 = vpack.c.bf16 %v2604_v49, %v2602_v20  ;;  %v2603_v26 = vld [vmem:[%s6209_s26 + $0x10] sm:$0xff]  ;;  %v2644_v12 = vld [vmem:[%s6209_s26 + $0x158] sm:$0xff] }
 0x40f   : > { %2423 = vrot.lane.b32.xlu0 %v2411_v32, %s5009_s2  ;;  %v2484_v29 = vsel %vm2360_vm12, %v2478_v34, %v7037_v45  ;;  %v2608_v32 = vld [vmem:[%s6209_s26 + $0x38] sm:$0xff]  ;;  %v4259_v34 = vpack.c.bf16 %v2603_v26, %v2601_v28  ;;  %v2613_v28 = vld [vmem:[%s6209_s26 + $0x60] sm:$0xff]  ;;  %v2618_v26 = vld [vmem:[%s6209_s26 + $0x88] sm:$0xff] }
 0x410   : > { %4258 = vmatprep.subr.bf16.mxu1 %v4257_v8  ;;  %v2615_v8 = vld [vmem:[%s6209_s26 + $0x70] sm:$0xff]  ;;  %v2642_v45 = vld [vmem:[%s6209_s26 + $0x148] sm:$0xff] }
 0x411   : > { %2493 = vrot.lane.b32.xlu1 %v2482_v59, %s5010_s20  ;;  %v4261_v59 = vpack.c.bf16 %v2608_v32, %v2606_v38  ;;  %4260 = vmatpush1.bf16.msra.mxu1 %v4259_v34  ;;  %v2620_v38 = vld [vmem:[%s6209_s26 + $0x98] sm:$0xff]  ;;  %v4271_v32 = vpack.c.bf16 %v2615_v8, %v2613_v28  ;;  %v2627_v28 = vld [vmem:[%s6209_s26 + $0xd0] sm:$0xff]  ;;  %v2630_v8 = vld [vmem:[%s6209_s26 + $0xe8] sm:$0xff] }
 0x412   : > { %v4273_v34 = vpack.c.bf16 %v2620_v38, %v2618_v26  ;;  %v2632_v26 = vld [vmem:[%s6209_s26 + $0xf8] sm:$0xff]  ;;  %v6243_v38 = vstv %s2031_s28 }
 0x413   : > { %2491 = vrot.lane.b32.xlu0 %v2479_v11, %s5010_s20  ;;  %v2607_v11 = vld [vmem:[%s6209_s26 + $0x30] sm:$0xff]  ;;  %4262 = vmatprep.subr.bf16.mxu1 %v4261_v59  ;;  %v2617_v59 = vld [vmem:[%s6209_s26 + $0x80] sm:$0xff] }
 0x415   : > { %2244 = vrot.lane.b32.xlu1 %v2233_v30, %s5009_s2  ;;  %v2610_v30 = vld [vmem:[%s6209_s26 + $0x48] sm:$0xff] }
 0x417   : > { %2242 = vrot.lane.b32.xlu0 %v2231_v33, %s5009_s2  ;;  %v2612_v33 = vld [vmem:[%s6209_s26 + $0x58] sm:$0xff] }
 0x419   : > { %2312 = vrot.lane.b32.xlu1 %v2301_v55, %s5010_s20  ;;  %v4263_v55 = vpack.c.bf16 %v2607_v11, %v2605_v53  ;;  %v2619_v53 = vld [vmem:[%s6209_s26 + $0x90] sm:$0xff]  ;;  %v2622_v11 = vld [vmem:[%s6209_s26 + $0xa8] sm:$0xff] }
 0x41b   : > { %2310 = vrot.lane.b32.xlu0 %v2299_v37, %s5010_s20  ;;  %v4265_v37 = vpack.c.bf16 %v2612_v33, %v2610_v30  ;;  %4264 = vmatpush1.bf16.msra.mxu1 %v4263_v55  ;;  %v2624_v30 = vld [vmem:[%s6209_s26 + $0xb8] sm:$0xff]  ;;  %v4275_v33 = vpack.c.bf16 %v2619_v53, %v2617_v59  ;;  %v2629_v59 = vld [vmem:[%s6209_s26 + $0xe0] sm:$0xff]  ;;  %v2631_v53 = vld [vmem:[%s6209_s26 + $0xf0] sm:$0xff] }
 0x41c   : > { %v4277_v55 = vpack.c.bf16 %v2624_v30, %v2622_v11  ;;  %v2034_v11 = vmul.f32 %v6243_v38, %v5928_v24  ;;  %v2634_v30 = vld [vmem:[%s6209_s26 + $0x108] sm:$0xff] }
 0x41d   : > { %2429 = vrot.lane.b32.xlu1 %v2418_v14, %s5009_s2  ;;  %v2609_v14 = vld [vmem:[%s6209_s26 + $0x40] sm:$0xff]  ;;  %4266 = vmatprep.subr.bf16.mxu1 %v4265_v37  ;;  %v2638_v24 = vld [vmem:[%s6209_s26 + $0x128] sm:$0xff] }
 0x41e   : > { %v2621_v37 = vld [vmem:[%s6209_s26 + $0xa0] sm:$0xff] }
 0x41f   : > { %2427 = vrot.lane.b32.xlu0 %v2416_v56, %s5009_s2  ;;  %v2611_v56 = vld [vmem:[%s6209_s26 + $0x50] sm:$0xff] }
 0x420   : > { %v4267_v20 = vpack.c.bf16 %v2611_v56, %v2609_v14  ;;  %v2623_v14 = vld [vmem:[%s6209_s26 + $0xb0] sm:$0xff]  ;;  %v2626_v56 = vld [vmem:[%s6209_s26 + $0xc8] sm:$0xff] }
 0x421   : > { %2497 = vrot.lane.b32.xlu1 %v2486_v40, %s5010_s20  ;;  %v2614_v40 = vld [vmem:[%s6209_s26 + $0x68] sm:$0xff] }
 0x422   : > { %4268 = vmatpush1.bf16.msra.mxu1 %v4267_v20 }
 0x423   : > { %2495 = vrot.lane.b32.xlu0 %v2484_v29, %s5010_s20  ;;  %v2616_v29 = vld [vmem:[%s6209_s26 + $0x78] sm:$0xff] }
 0x424   : > { %v4269_v49 = vpack.c.bf16 %v2616_v29, %v2614_v40  ;;  %v2628_v40 = vld [vmem:[%s6209_s26 + $0xd8] sm:$0xff]  ;;  %v4279_v29 = vpack.c.bf16 %v2623_v14, %v2621_v37  ;;  %v4287_v37 = vpack.c.bf16 %v2631_v53, %v2629_v59 }
 0x425   : > { %1998 = vrot.lane.b32.xlu1 %v5905_v57, %s7055_s1  ;;  %v4281_v20 = vpack.c.bf16 %v2628_v40, %v2626_v56  ;;  %v2033_v56 = vmul.f32 %v6243_v38, %v5931_v16 }
 0x426   : > { %4270 = vmatprep.subr.bf16.mxu1 %v4269_v49  ;;  %v2625_v49 = vld [vmem:[%s6209_s26 + $0xc0] sm:$0xff] }
 0x427   : > { %1996 = vrot.lane.b32.xlu0 %v5912_v5, %s7055_s1  ;;  %4272 = vmatpush1.bf16.msra.mxu1 %v4271_v32  ;;  %v4283_v32 = vpack.c.bf16 %v2627_v28, %v2625_v49  ;;  %v2640_v28 = vld [vmem:[%s6209_s26 + $0x138] sm:$0xff] }
 0x428   : > { %4274 = vmatprep.subr.bf16.mxu1 %v4273_v34  ;;  %v4285_v34 = vpack.c.bf16 %v2632_v26, %v2630_v8  ;;  %v4293_v53 = vpack.c.bf16 %v2640_v28, %v2638_v24  ;;  %v2643_v24 = vld [vmem:[%s6209_s26 + $0x150] sm:$0xff]  ;;  %v2646_v28 = vld [vmem:[%s6209_s26 + $0x168] sm:$0xff] }
 0x42b   : > { %4276 = vmatpush1.bf16.msra.mxu1 %v4275_v33  ;;  %v2636_v33 = vld [vmem:[%s6209_s26 + $0x118] sm:$0xff] }
 0x42c   : > { %4278 = vmatprep.subr.bf16.mxu1 %v4277_v55  ;;  %v6251_v55 = vstv %s2028_s0  ;;  %v4289_v40 = vpack.c.bf16 %v2636_v33, %v2634_v30  ;;  %v2637_v30 = vld [vmem:[%s6209_s26 + $0x120] sm:$0xff] }
 0x42d   : > { %v2042_v49 = vadd.f32 %v2034_v11, %v6251_v55  ;;  %v2041_v16 = vadd.f32 %v2033_v56, %v6251_v55  ;;  %v2639_v11 = vld [vmem:[%s6209_s26 + $0x130] sm:$0xff] }
 0x42e   : > { %v4295_v56 = vpack.c.bf16 %v2639_v11, %v2637_v30  ;;  %v2651_v30 = vld [vmem:[%s6209_s26 + $0x190] sm:$0xff]  ;;  %v2654_v11 = vld [vmem:[%s6209_s26 + $0x1a8] sm:$0xff] }
 0x42f   : > { %4280 = vmatpush1.bf16.msra.mxu1 %v4279_v29  ;;  %v2633_v29 = vld [vmem:[%s6209_s26 + $0x100] sm:$0xff] }
 0x430   : > { %4282 = vmatprep.subr.bf16.mxu1 %v4281_v20  ;;  %v2635_v20 = vld [vmem:[%s6209_s26 + $0x110] sm:$0xff] }
 0x431   : > { %v4291_v59 = vpack.c.bf16 %v2635_v20, %v2633_v29  ;;  %v4297_v29 = vpack.c.bf16 %v2644_v12, %v2642_v45  ;;  %v2641_v20 = vld [vmem:[%s6209_s26 + $0x140] sm:$0xff]  ;;  %v2652_v12 = vld [vmem:[%s6209_s26 + $0x198] sm:$0xff] }
 0x433   : > { %4284 = vmatpush1.bf16.msra.mxu1 %v4283_v32 }
 0x434   : > { %4286 = vmatprep.subr.bf16.mxu1 %v4285_v34 }
 0x437   : > { %4288 = vmatpush1.bf16.msra.mxu1 %v4287_v37 }
 0x438   : > { %4290 = vmatprep.subr.bf16.mxu1 %v4289_v40 }
 0x43b   : > { %4292 = vmatpush1.bf16.msra.mxu1 %v4291_v59  ;;  %v2647_v59 = vld [vmem:[%s6209_s26 + $0x170] sm:$0xff] }
 0x43c   : > { %4294 = vmatprep.subr.bf16.mxu1 %v4293_v53  ;;  %v2649_v53 = vld [vmem:[%s6209_s26 + $0x180] sm:$0xff] }
 0x43f   : > { %4296 = vmatpush1.bf16.msra.mxu1 %v4295_v56  ;;  %v2655_v56 = vld [vmem:[%s6209_s26 + $0x1b0] sm:$0xff] }
 0x440   : > { %4298 = vmatprep.subr.bf16.mxu1 %v4297_v29 }
 0x453   : > { %v2070_v14 = vpop.permute.xlu1 %2069 }
 0x454   : > { %v2096_v26 = vadd.f32 %v2070_v14, %v2042_v49 }
 0x455   : > { %v2068_v8 = vpop.permute.xlu0 %2067 }
 0x456   : > { %v2083_v32 = vsel %vm1539_vm11, %v2068_v8, %v2070_v14  ;;  %v2648_v8 = vld [vmem:[%s6209_s26 + $0x178] sm:$0xff] }
 0x457   : > { %v2124_v34 = vpop.permute.xlu1 %2123  ;;  %v2095_v49 = vadd.f32 %v2083_v32, %v2041_v16  ;;  %v2645_v32 = vld [vmem:[%s6209_s26 + $0x160] sm:$0xff]  ;;  %v2650_v16 = vld [vmem:[%s6209_s26 + $0x188] sm:$0xff] }
 0x458   : > { %v2151_v33 = vadd.f32 %v2124_v34, %v2096_v26  ;;  %v4301_v26 = vpack.c.bf16 %v2648_v8, %v2646_v28  ;;  %v4303_v45 = vpack.c.bf16 %v2647_v59, %v2645_v32 }
 0x459   : > { %v2122_v52 = vpop.permute.xlu0 %2121 }
 0x45a   : > { %v2138_v37 = vsel %vm2137_vm13, %v2122_v52, %v2124_v34  ;;  %v2199_v14 = vadd.f32 %v6105_v43, %v2151_v33  ;;  %v4299_v43 = vpack.c.bf16 %v2643_v24, %v2641_v20  ;;  %v4305_v34 = vpack.c.bf16 %v2652_v12, %v2650_v16  ;;  %v2656_v33 = vld [vmem:[%s6209_s26 + $0x1b8] sm:$0xff] }
 0x45b   : > { %v2150_v40 = vadd.f32 %v2138_v37, %v2095_v49  ;;  %v4309_v49 = vpack.c.bf16 %v2656_v33, %v2654_v11  ;;  %v2653_v37 = vld [vmem:[%s6209_s26 + $0x1a0] sm:$0xff]  ;;  %v2036_v16 = vmul.f32 %v6243_v38, %v5958_v3  ;;  %v2035_v11 = vmul.f32 %v6243_v38, %v5964_v4 }
 0x45c   : > { %4300 = vmatpush1.bf16.msra.mxu1 %v4299_v43 }
 0x45d   : > { %v2198_v52 = vadd.f32 %v6112_v60, %v2150_v40  ;;  %4302 = vmatprep.subr.bf16.mxu1 %v4301_v26  ;;  %v4307_v60 = vpack.c.bf16 %v2651_v30, %v2649_v53  ;;  %v4311_v40 = vpack.c.bf16 %v2655_v56, %v2653_v37  ;;  %v2043_v4 = vadd.f32 %v2035_v11, %v6251_v55 }
 0x460   : > { %4304 = vmatpush1.bf16.msra.mxu1 %v4303_v45 }
 0x461   : > { %4306 = vmatprep.subr.bf16.mxu1 %v4305_v34 }
 0x464   : > { %4308 = vmatpush1.bf16.msra.mxu1 %v4307_v60 }
 0x465   : > { %4310 = vmatprep.subr.bf16.mxu1 %v4309_v49  ;;  %v2044_v49 = vadd.f32 %v2036_v16, %v6251_v55 }
 0x468   : > { %4312 = vmatpush1.bf16.msra.mxu1 %v4311_v40 }
 0x46f   : > { %v2074_v29 = vpop.permute.xlu1 %2073 }
 0x471   : > { %v2072_v20 = vpop.permute.xlu0 %2071 }
 0x472   : > { %v2084_v56 = vsel %vm1539_vm11, %v2072_v20, %v2074_v29 }
 0x473   : > { %v2128_v24 = vpop.permute.xlu1 %2127 }
 0x475   : > { %v2126_v28 = vpop.permute.xlu0 %2125 }
 0x477   : > { %v2241_v8 = vpop.permute.xlu1 %2240 }
 0x478   : > { %v2267_v26 = vadd.f32 %v2241_v8, %v2199_v14  ;;  %v6292_v14 = vmul.f32 %v5994_v62, %v6053_v7 }
 0x479   : > { %v2239_v43 = vpop.permute.xlu0 %2238 }
 0x47a   : > { %v2254_v32 = vsel %vm1539_vm11, %v2239_v43, %v2241_v8  ;;  %v2184_v8 = vrot.slane %v6292_v14, 2 }
 0x47b   : > { %v2309_v59 = vpop.permute.xlu1 %2308  ;;  %v2266_v45 = vadd.f32 %v2254_v32, %v2198_v52  ;;  %v2098_v52 = vadd.f32 %v2074_v29, %v2044_v49  ;;  %v2097_v32 = vadd.f32 %v2084_v56, %v2043_v4 }
 0x47c   : > { %v2335_v12 = vadd.f32 %v2309_v59, %v2267_v26  ;;  %v2139_v26 = vsel %vm2137_vm13, %v2126_v28, %v2128_v24  ;;  %v2185_v16 = vsel %vm1769_vm9, %v2180_v1, %v2184_v8 }
 0x47d   : > { %v2307_v34 = vpop.permute.xlu0 %2306  ;;  %v2153_v43 = vadd.f32 %v2128_v24, %v2098_v52  ;;  %v2152_v20 = vadd.f32 %v2139_v26, %v2097_v32  ;;  %v6316_v24 = vmul.f32 %v6001_v2, %v6062_v15  ;;  %v2660_v32 = vld [vmem:[%s6209_s26 + $0x1d8] sm:$0xff] }
 0x47e   : > { %v2322_v53 = vsel %vm2137_vm13, %v2307_v34, %v2309_v59  ;;  %v2384_v30 = vadd.f32 %v6117_v10, %v2335_v12  ;;  %v6299_v10 = vmul.f32 %v5994_v62, %v6062_v15 }
 0x47f   : > { %v2334_v33 = vadd.f32 %v2322_v53, %v2266_v45  ;;  %v2426_v60 = vpop.permute.xlu1 %2425  ;;  %v2201_v45 = vadd.f32 %v2185_v16, %v2153_v43  ;;  %v2367_v52 = vrot.slane %v6316_v24, 4  ;;  %v2657_v16 = vld [vmem:[%s6209_s26 + $0x1c0] sm:$0xff] }
 0x480   : > { %v2182_v29 = vrot.slane %v6299_v10, 2 }
 0x481   : > { %v2424_v37 = vpop.permute.xlu0 %2423  ;;  %v2383_v3 = vadd.f32 %v6123_v6, %v2334_v33  ;;  %v6306_v6 = vmul.f32 %v6001_v2, %v6053_v7  ;;  %v2368_v25 = vsel %vm2360_vm12, %v2362_v48, %v2367_v52 }
 0x482   : > { %v2183_v21 = vsel %vm1769_vm9, %v2177_v31, %v2182_v29  ;;  %v2658_v31 = vld [vmem:[%s6209_s26 + $0x1c8] sm:$0xff] }
 0x483   : > { %v2494_v40 = vpop.permute.xlu1 %2493  ;;  %v2369_v34 = vrot.slane %v6306_v6, 4  ;;  %v2200_v11 = vadd.f32 %v2183_v21, %v2152_v20  ;;  %v2439_v21 = vsel %vm1539_vm11, %v2424_v37, %v2426_v60  ;;  %v3945_v6 = vld [vmem:[%s6209_s26 + $0x2a8] sm:$0xff] }
 0x485   : > { %v2492_v59 = vpop.permute.xlu0 %2491  ;;  %v2370_v43 = vsel %vm2360_vm12, %v2365_v39, %v2369_v34 }
 0x487   : > { %v2245_v12 = vpop.permute.xlu1 %2244 }
 0x488   : > { %v2269_v53 = vadd.f32 %v2245_v12, %v2201_v45  ;;  %v4313_v45 = vpack.c.bf16 %v2660_v32, %v2658_v31 }
 0x489   : > { %v2243_v28 = vpop.permute.xlu0 %2242 }
 0x48a   : > { %v2255_v1 = vsel %vm1539_vm11, %v2243_v28, %v2245_v12  ;;  %v2659_v28 = vld [vmem:[%s6209_s26 + $0x1d0] sm:$0xff]  ;;  %4314 = vmatprep.subr.bf16.mxu1 %v4313_v45 }
 0x48b   : > { %v2313_v33 = vpop.permute.xlu1 %2312  ;;  %v2268_v56 = vadd.f32 %v2255_v1, %v2200_v11  ;;  %v4315_v39 = vpack.c.bf16 %v2659_v28, %v2657_v16  ;;  %v2662_v16 = vld [vmem:[%s6209_s26 + $0x1e8] sm:$0x7f] }
 0x48c   : > { %v2337_v49 = vadd.f32 %v2313_v33, %v2269_v53  ;;  %v2452_v53 = vadd.f32 %v2426_v60, %v2384_v30  ;;  %v2451_v60 = vadd.f32 %v2439_v21, %v2383_v3  ;;  %v3925_v3 = vld [vmem:[%s6209_s26 + $0x208] sm:$0xff] }
 0x48d   : > { %v2311_v4 = vpop.permute.xlu0 %2310  ;;  %4316 = vmatpush1.bf16.msra.mxu1 %v4315_v39 }
 0x48e   : > { %v2323_v41 = vsel %vm2137_vm13, %v2311_v4, %v2313_v33  ;;  %v2386_v26 = vadd.f32 %v2370_v43, %v2337_v49  ;;  %v2520_v33 = vadd.f32 %v2494_v40, %v2452_v53  ;;  %v2507_v49 = vsel %vm2137_vm13, %v2492_v59, %v2494_v40  ;;  %v2661_v40 = vld [vmem:[%s6209_s26 + $0x1e0] sm:$0x7f]  ;;  %3919 = vmatprep.subr.msk.mxu1 %vm1580_vm4, %v2662_v16 }
 0x48f   : > { %v2336_v12 = vadd.f32 %v2323_v41, %v2268_v56  ;;  %v2430_v20 = vpop.permute.xlu1 %2429  ;;  %v2519_v48 = vadd.f32 %v2507_v49, %v2451_v60 }
 0x490   : > { %v2454_v56 = vadd.f32 %v2430_v20, %v2386_v26  ;;  %v2538_v41 = vrot.slane %v2520_v33, 2 }
 0x491   : > { %v2428_v1 = vpop.permute.xlu0 %2427  ;;  %v2385_v11 = vadd.f32 %v2368_v25, %v2336_v12  ;;  %v3923_v12 = vld [vmem:[%s6209_s26 + $0x1f8] sm:$0xff]  ;;  %3920 = vmatpush1.msk.msra.mxu1 %vm1580_vm4, %v2661_v40  ;;  %v2535_v53 = vrot.slane %v2519_v48, 2 }
 0x492   : > { %v2440_v30 = vsel %vm1539_vm11, %v2428_v1, %v2430_v20  ;;  %v4317_v28 = vpack.c.bf16 %v3925_v3, %v3923_v12 }
 0x493   : > { %v2498_v37 = vpop.permute.xlu1 %2497  ;;  %v2453_v4 = vadd.f32 %v2440_v30, %v2385_v11 }
 0x494   : > { %v6344_v47 = vadd.f32 %v2498_v37, %v2454_v56  ;;  %4318 = vmatprep.subr.bf16.mxu1 %v4317_v28 }
 0x495   : > { %v2496_v43 = vpop.permute.xlu0 %2495 }
 0x496   : > { %v2539_v31 = vrot.slane %v6344_v47, 2  ;;  %v2508_v32 = vsel %vm2137_vm13, %v2496_v43, %v2498_v37  ;;  %v2110_v37 = vmul.f32 %v5935_v42, %v6053_v7 }
 0x497   : > { %v6350_v59 = vadd.f32 %v2508_v32, %v2453_v4  ;;  %v1999_v26 = vpop.permute.xlu1 %1998 }
 0x498   : > { %v2019_v20 = vmax.f32 %v5905_v57, %v1999_v26  ;;  %v2540_v45 = vsel %vm1769_vm9, %v2538_v41, %v2539_v31  ;;  %v2109_v41 = vmul.f32 %v5935_v42, %v6062_v15 }
 0x499   : > { %v2536_v21 = vrot.slane %v6350_v59, 2  ;;  %v1997_v25 = vpop.permute.xlu0 %1996  ;;  %v2556_v39 = vmax.f32 %v2520_v33, %v2540_v45  ;;  %v2056_v33 = vmul.f32 %v5926_v9, %v6053_v7 }
 0x49a   : > { %v6361_v1 = vmax.f32 %v2019_v20, 0.0  ;;  %v2003_v11 = vsel %vm1483_vm10, %v1997_v25, %v1999_v26  ;;  %v2038_v25 = vmul.f32 %v6243_v38, %v6053_v7 }
 0x49b   : > { %v2018_v49 = vmax.f32 %v5912_v5, %v2003_v11  ;;  %2569 = vrot.lane.b32.xlu1 %v2556_v39, %s5009_s2  ;;  %v2537_v57 = vsel %vm1769_vm9, %v2535_v53, %v2536_v21  ;;  %v2055_v5 = vmul.f32 %v5926_v9, %v6062_v15 }
 0x49c   : > { %v6369_v56 = vmax.f32 %v2519_v48, %v2537_v57  ;;  %v6379_v60 = vmul.f32 %v5960_v13, %v6361_v1  ;;  %v6394_v43 = vmul.f32 %v5962_v35, %v6361_v1  ;;  %v6413_v26 = vmul.f32 %v5972_v22, %v6361_v1  ;;  %v3922_v57 = vld [vmem:[%s6209_s26 + $0x1f0] sm:$0xff] }
 0x49d   : > { %v6371_v30 = vmax.f32 %v2018_v49, 0.0  ;;  %v6435_v0 = vmul.f32 %v5985_v27, %v6361_v1  ;;  %v6479_v63 = vmul.f32 %v5994_v62, %v6361_v1  ;;  %v2046_v7 = vadd.f32 %v2038_v25, %v6251_v55 }
 0x49e   : > { %2567 = vrot.lane.b32.xlu0 %v6369_v56, %s5009_s2  ;;  %v2236_v4 = vrot.slane %v6379_v60, 2  ;;  %v2304_v40 = vrot.slane %v6394_v43, 2  ;;  %v2421_v3 = vrot.slane %v6413_v26, 4  ;;  %v3971_v60 = vld [vmem:[%s6209_s26 + $0x378] sm:$0xff]  ;;  %v3977_v43 = vld [vmem:[%s6209_s26 + $0x3a8] sm:$0xff] }
 0x49f   : > { %2077 = vrot.lane.b32.xlu1 %v2056_v33, %s5009_s2  ;;  %v6388_v48 = vmul.f32 %v5960_v13, %v6371_v30  ;;  %v6402_v16 = vmul.f32 %v5962_v35, %v6371_v30  ;;  %v6424_v17 = vmul.f32 %v5972_v22, %v6371_v30  ;;  %v6446_v18 = vmul.f32 %v5985_v27, %v6371_v30  ;;  %v3924_v33 = vld [vmem:[%s6209_s26 + $0x200] sm:$0xff]  ;;  %v3981_v26 = vld [vmem:[%s6209_s26 + $0x3c8] sm:$0xff] }
 0x4a0   : > { %v2237_v13 = vsel %vm1769_vm9, %v2232_v61, %v2236_v4  ;;  %v2305_v61 = vsel %vm1769_vm9, %v2300_v19, %v2304_v40  ;;  %v2422_v19 = vsel %vm2360_vm12, %v2417_v44, %v2421_v3  ;;  %v2489_v20 = vrot.slane %v6435_v0, 4  ;;  %v3980_v0 = vld [vmem:[%s6209_s26 + $0x3c0] sm:$0xff] }
 0x4a1   : > { %v2234_v32 = vrot.slane %v6388_v48, 2  ;;  %v2302_v12 = vrot.slane %v6402_v16, 2  ;;  %v3975_v48 = vld [vmem:[%s6209_s26 + $0x398] sm:$0xff] }
 0x4a2   : > { %2075 = vrot.lane.b32.xlu0 %v2055_v5, %s5009_s2  ;;  %v2490_v44 = vsel %vm2360_vm12, %v7057_v36, %v2489_v20  ;;  %v3926_v36 = vld [vmem:[%s6209_s26 + $0x210] sm:$0xff]  ;;  %v3979_v16 = vld [vmem:[%s6209_s26 + $0x3b8] sm:$0xff] }
 0x4a3   : > { %2131 = vrot.lane.b32.xlu1 %v2110_v37, %s5010_s20  ;;  %v2235_v35 = vsel %vm1769_vm9, %v2230_v23, %v2234_v32  ;;  %v2303_v22 = vsel %vm1769_vm9, %v2298_v58, %v2302_v12  ;;  %v2419_v23 = vrot.slane %v6424_v17, 4  ;;  %v2487_v58 = vrot.slane %v6446_v18, 4  ;;  %v3927_v37 = vld [vmem:[%s6209_s26 + $0x218] sm:$0xff] }
 0x4a5   : > { %v2420_v27 = vsel %vm2360_vm12, %v7056_v51, %v2419_v23  ;;  %v2488_v45 = vsel %vm2360_vm12, %v7058_v54, %v2487_v58 }
 0x4a6   : > { %2129 = vrot.lane.b32.xlu0 %v2109_v41, %s5010_s20  ;;  %v3929_v41 = vld [vmem:[%s6209_s26 + $0x228] sm:$0xff] }
 0x4a7   : > { %2248 = vrot.lane.b32.xlu1 %v2237_v13, %s5009_s2  ;;  %v2037_v13 = vmul.f32 %v6243_v38, %v6062_v15  ;;  %v3933_v15 = vld [vmem:[%s6209_s26 + $0x248] sm:$0xff] }
 0x4a9   : > { %v2045_v25 = vadd.f32 %v2037_v13, %v6251_v55 }
 0x4aa   : > { %2246 = vrot.lane.b32.xlu0 %v2235_v35, %s5009_s2  ;;  %v4319_v35 = vpack.c.bf16 %v3924_v33, %v3922_v57  ;;  %v6514_v33 = vmul.f32 %v6001_v2, %v6361_v1 }
 0x4ab   : > { %2316 = vrot.lane.b32.xlu1 %v2305_v61, %s5010_s20  ;;  %v2188_v61 = vrot.slane %v6479_v63, 2 }
 0x4ae   : > { %2314 = vrot.lane.b32.xlu0 %v2303_v22, %s5010_s20  ;;  %v6494_v22 = vmul.f32 %v5994_v62, %v6371_v30  ;;  %v2189_v62 = vsel %vm1769_vm9, %v2184_v8, %v2188_v61  ;;  %v3935_v8 = vld [vmem:[%s6209_s26 + $0x258] sm:$0xff] }
 0x4af   : > { %2433 = vrot.lane.b32.xlu1 %v2422_v19, %s5009_s2 }
 0x4b0   : > { %v2186_v57 = vrot.slane %v6494_v22, 2 }
 0x4b2   : > { %2431 = vrot.lane.b32.xlu0 %v2420_v27, %s5009_s2  ;;  %v4321_v27 = vpack.c.bf16 %v3929_v41, %v3927_v37 }
 0x4b3   : > { %2501 = vrot.lane.b32.xlu1 %v2490_v44, %s5010_s20  ;;  %v3928_v44 = vld [vmem:[%s6209_s26 + $0x220] sm:$0xff] }
 0x4b6   : > { %2499 = vrot.lane.b32.xlu0 %v2488_v45, %s5010_s20 }
 0x50d   : > { %v2570_v28 = vpop.permute.xlu1 %2569 }
 0x50e   : > { %v2589_v53 = vmax.f32 %v2556_v39, %v2570_v28 }
 0x510   : > { %v2568_v11 = vpop.permute.xlu0 %2567  ;;  %v2595_v49 = vmax.f32 %v2589_v53, 0.0  ;;  %v3931_v53 = vld [vmem:[%s6209_s26 + $0x238] sm:$0xff] }
 0x511   : > { %v2579_v46 = vsel %vm1539_vm11, %v2568_v11, %v2570_v28  ;;  %v2078_v5 = vpop.permute.xlu1 %2077  ;;  %v4325_v41 = vpack.c.bf16 %v3933_v15, %v3931_v53  ;;  %v3934_v15 = vld [vmem:[%s6209_s26 + $0x250] sm:$0xff] }
 0x512   : > { %v2588_v39 = vmax.f32 %v6369_v56, %v2579_v46  ;;  %3921 = vmatprep.mubr.msk.f32.mxu1 %vm2663_vm14, %v2595_v49  ;;  %v2100_v51 = vadd.f32 %v2078_v5, %v2046_v7  ;;  %v2828_v54 = vrot.slane %v2595_v49, 4  ;;  %v4323_v49 = vpack.c.bf16 %v3928_v44, %v3926_v36  ;;  %v3932_v7 = vld [vmem:[%s6209_s26 + $0x240] sm:$0xff] }
 0x513   : > { %v2373_v36 = vrot.slane %v6514_v33, 4  ;;  %v6529_v44 = vmul.f32 %v6001_v2, %v6371_v30 }
 0x514   : > { %v6496_v19 = vmax.f32 %v2588_v39, 0.0  ;;  %v2076_v56 = vpop.permute.xlu0 %2075  ;;  %v3930_v39 = vld [vmem:[%s6209_s26 + $0x230] sm:$0xff] }
 0x515   : > { %v2085_v45 = vsel %vm1539_vm11, %v2076_v56, %v2078_v5  ;;  %v2132_v28 = vpop.permute.xlu1 %2131  ;;  %v2187_v56 = vsel %vm1769_vm9, %v2182_v29, %v2186_v57  ;;  %v3939_v29 = vld [vmem:[%s6209_s26 + $0x278] sm:$0xff]  ;;  %v2374_v2 = vsel %vm2360_vm12, %v2369_v34, %v2373_v36 }
 0x516   : > { %v2155_v11 = vadd.f32 %v2132_v28, %v2100_v51  ;;  %2738 = vmatmul.mubr.f32.vlgmr.msra.gmra.mrb[0].mxu1 %v6496_v19  ;;  %v2099_v46 = vadd.f32 %v2085_v45, %v2045_v25  ;;  %v3936_v25 = vld [vmem:[%s6209_s26 + $0x260] sm:$0xff] }
 0x517   : > { %4320 = vmatpush1.bf16.msra.mxu1 %v4319_v35  ;;  %3986 = vmatprep.mubr.msk.f32.mxu1 %vm2663_vm14, %v2828_v54  ;;  %v3937_v35 = vld [vmem:[%s6209_s26 + $0x268] sm:$0xff] }
 0x518   : > { %v2130_v5 = vpop.permute.xlu0 %2129  ;;  %4322 = vmatprep.subr.bf16.mxu1 %v4321_v27  ;;  %v2203_v37 = vadd.f32 %v2189_v62, %v2155_v11  ;;  %v4327_v27 = vpack.c.bf16 %v3932_v7, %v3930_v39  ;;  %v4329_v53 = vpack.c.bf16 %v3937_v35, %v3935_v8  ;;  %v3941_v62 = vld [vmem:[%s6209_s26 + $0x288] sm:$0xff] }
 0x519   : > { %v2140_v13 = vsel %vm2137_vm13, %v2130_v5, %v2132_v28  ;;  %v2249_v14 = vpop.permute.xlu1 %2248  ;;  %v2371_v5 = vrot.slane %v6529_v44, 4  ;;  %v4333_v7 = vpack.c.bf16 %v3941_v62, %v3939_v29  ;;  %v3947_v29 = vld [vmem:[%s6209_s26 + $0x2b8] sm:$0xff]  ;;  %v3949_v62 = vld [vmem:[%s6209_s26 + $0x2c8] sm:$0xff] }
 0x51a   : > { %v2154_v51 = vadd.f32 %v2140_v13, %v2099_v46  ;;  %v2271_v54 = vadd.f32 %v2249_v14, %v2203_v37  ;;  %v4331_v46 = vpack.c.bf16 %v3936_v25, %v3934_v15  ;;  %v3938_v13 = vld [vmem:[%s6209_s26 + $0x270] sm:$0xff]  ;;  %v3944_v25 = vld [vmem:[%s6209_s26 + $0x2a0] sm:$0xff] }
 0x51b   : > { %4324 = vmatpush1.bf16.msra.mxu1 %v4323_v49  ;;  %v3942_v15 = vld [vmem:[%s6209_s26 + $0x290] sm:$0xff] }
 0x51c   : > { %v2247_v45 = vpop.permute.xlu0 %2246  ;;  %v2202_v28 = vadd.f32 %v2187_v56, %v2154_v51  ;;  %4326 = vmatprep.subr.bf16.mxu1 %v4325_v41  ;;  %v3943_v51 = vld [vmem:[%s6209_s26 + $0x298] sm:$0xff]  ;;  %v2372_v56 = vsel %vm2360_vm12, %v2367_v52, %v2371_v5  ;;  %v4339_v52 = vpack.c.bf16 %v3944_v25, %v3942_v15 }
 0x51d   : > { %v2256_v10 = vsel %vm1539_vm11, %v2247_v45, %v2249_v14  ;;  %v2317_v11 = vpop.permute.xlu1 %2316  ;;  %v3940_v14 = vld [vmem:[%s6209_s26 + $0x280] sm:$0xff] }
 0x51e   : > { %v2339_v49 = vadd.f32 %v2317_v11, %v2271_v54  ;;  %v2270_v37 = vadd.f32 %v2256_v10, %v2202_v28 }
 0x51f   : > { %4328 = vmatpush1.bf16.msra.mxu1 %v4327_v27  ;;  %v4335_v27 = vpack.c.bf16 %v3940_v14, %v3938_v13  ;;  %v3951_v13 = vld [vmem:[%s6209_s26 + $0x2d8] sm:$0xff]  ;;  %v3953_v14 = vld [vmem:[%s6209_s26 + $0x2e8] sm:$0xff] }
 0x520   : > { %v2315_v41 = vpop.permute.xlu0 %2314  ;;  %4330 = vmatprep.subr.bf16.mxu1 %v4329_v53  ;;  %v2388_v39 = vadd.f32 %v2374_v2, %v2339_v49  ;;  %v4337_v53 = vpack.c.bf16 %v3945_v6, %v3943_v51 }
 0x521   : > { %v2324_v8 = vsel %vm2137_vm13, %v2315_v41, %v2317_v11  ;;  %v2434_v35 = vpop.permute.xlu1 %2433  ;;  %v3946_v41 = vld [vmem:[%s6209_s26 + $0x2b0] sm:$0xff] }
 0x522   : > { %v2338_v34 = vadd.f32 %v2324_v8, %v2270_v37  ;;  %v2456_v54 = vadd.f32 %v2434_v35, %v2388_v39  ;;  %v4341_v37 = vpack.c.bf16 %v3949_v62, %v3947_v29  ;;  %v3948_v39 = vld [vmem:[%s6209_s26 + $0x2c0] sm:$0xff]  ;;  %v3961_v29 = vld [vmem:[%s6209_s26 + $0x328] sm:$0xff]  ;;  %v2057_v62 = vmul.f32 %v5926_v9, %v6371_v30 }
 0x523   : > { %4332 = vmatpush1.bf16.msra.mxu1 %v4331_v46  ;;  %v4343_v6 = vpack.c.bf16 %v3948_v39, %v3946_v41  ;;  %v3963_v41 = vld [vmem:[%s6209_s26 + $0x338] sm:$0xff]  ;;  %v3965_v39 = vld [vmem:[%s6209_s26 + $0x348] sm:$0xff] }
 0x524   : > { %v2432_v45 = vpop.permute.xlu0 %2431  ;;  %v2387_v28 = vadd.f32 %v2372_v56, %v2338_v34  ;;  %4334 = vmatprep.subr.bf16.mxu1 %v4333_v7  ;;  %v4345_v56 = vpack.c.bf16 %v3953_v14, %v3951_v13  ;;  %v4357_v13 = vpack.c.bf16 %v3965_v39, %v3963_v41  ;;  %v3962_v14 = vld [vmem:[%s6209_s26 + $0x330] sm:$0xff]  ;;  %v3991_v41 = vld [vmem:[%s6209_s26 + $0x400] sm:$0xff] }
 0x525   : > { %v2441_v10 = vsel %vm1539_vm11, %v2432_v45, %v2434_v35  ;;  %v2502_v11 = vpop.permute.xlu1 %2501  ;;  %v3957_v45 = vld [vmem:[%s6209_s26 + $0x308] sm:$0xff]  ;;  %v3993_v39 = vld [vmem:[%s6209_s26 + $0x410] sm:$0xff] }
 0x526   : > { %v6557_v24 = vadd.f32 %v2502_v11, %v2456_v54  ;;  %v2455_v49 = vadd.f32 %v2441_v10, %v2387_v28  ;;  %v3952_v54 = vld [vmem:[%s6209_s26 + $0x2e0] sm:$0xff]  ;;  %v2058_v28 = vmul.f32 %v5926_v9, %v6361_v1  ;;  %v3954_v10 = vld [vmem:[%s6209_s26 + $0x2f0] sm:$0xff]  ;;  %v2111_v9 = vmul.f32 %v5935_v42, %v6371_v30 }
 0x527   : > { %4336 = vmatpush1.bf16.msra.mxu1 %v4335_v27  ;;  %v3950_v27 = vld [vmem:[%s6209_s26 + $0x2d0] sm:$0xff] }
 0x528   : > { %v2543_v2 = vrot.slane %v6557_v24, 2  ;;  %v2500_v46 = vpop.permute.xlu0 %2499  ;;  %4338 = vmatprep.subr.bf16.mxu1 %v4337_v53  ;;  %v4347_v15 = vpack.c.bf16 %v3952_v54, %v3950_v27  ;;  %v3966_v54 = vld [vmem:[%s6209_s26 + $0x350] sm:$0xff] }
 0x529   : > { %v2509_v7 = vsel %vm2137_vm13, %v2500_v46, %v2502_v11  ;;  %v3956_v11 = vld [vmem:[%s6209_s26 + $0x300] sm:$0xff]  ;;  %v3958_v46 = vld [vmem:[%s6209_s26 + $0x310] sm:$0xff] }
 0x52a   : > { %v2544_v8 = vsel %vm1769_vm9, %v2539_v31, %v2543_v2  ;;  %v6570_v35 = vadd.f32 %v2509_v7, %v2455_v49  ;;  %v3955_v31 = vld [vmem:[%s6209_s26 + $0x2f8] sm:$0xff] }
 0x52b   : > { %4340 = vmatpush1.bf16.msra.mxu1 %v4339_v52  ;;  %v6573_v51 = vmax.f32 %v6344_v47, %v2544_v8  ;;  %v4349_v25 = vpack.c.bf16 %v3957_v45, %v3955_v31  ;;  %v4351_v52 = vpack.c.bf16 %v3956_v11, %v3954_v10  ;;  %v3964_v8 = vld [vmem:[%s6209_s26 + $0x340] sm:$0xff]  ;;  %v3978_v11 = vld [vmem:[%s6209_s26 + $0x3b0] sm:$0xff] }
 0x52c   : > { %v2541_v34 = vrot.slane %v6570_v35, 2  ;;  %4342 = vmatprep.subr.bf16.mxu1 %v4341_v37  ;;  %v3960_v37 = vld [vmem:[%s6209_s26 + $0x320] sm:$0xff]  ;;  %v4359_v27 = vpack.c.bf16 %v3964_v8, %v3962_v14  ;;  %v4375_v17 = vpack.c.bf16 %v3980_v0, %v3978_v11  ;;  %v4013_v0 = vld [vmem:[%s6209_s26 + $0x4b0] sm:$0xff] }
 0x52d   : > { %2573 = vrot.lane.b32.xlu1 %v6573_v51, %s5009_s2  ;;  %v4355_v7 = vpack.c.bf16 %v3960_v37, %v3958_v46  ;;  %v3968_v31 = vld [vmem:[%s6209_s26 + $0x360] sm:$0xff]  ;;  %v2827_v46 = vrot.slane %v6496_v19, 4  ;;  %v3997_v19 = vld [vmem:[%s6209_s26 + $0x430] sm:$0xff] }
 0x52e   : > { %v2542_v47 = vsel %vm1769_vm9, %v2536_v21, %v2541_v34  ;;  %v3959_v21 = vld [vmem:[%s6209_s26 + $0x318] sm:$0xff]  ;;  %v4363_v45 = vpack.c.bf16 %v3968_v31, %v3966_v54  ;;  %v3976_v10 = vld [vmem:[%s6209_s26 + $0x3a0] sm:$0xff]  ;;  %v4001_v31 = vld [vmem:[%s6209_s26 + $0x450] sm:$0xff] }
 0x52f   : > { %4344 = vmatpush1.bf16.msra.mxu1 %v4343_v6  ;;  %v6590_v53 = vmax.f32 %v6350_v59, %v2542_v47  ;;  %v2112_v59 = vmul.f32 %v5935_v42, %v6361_v1  ;;  %v4353_v49 = vpack.c.bf16 %v3961_v29, %v3959_v21  ;;  %v3967_v6 = vld [vmem:[%s6209_s26 + $0x358] sm:$0xff]  ;;  %v3987_v29 = vld [vmem:[%s6209_s26 + $0x3e0] sm:$0xff] }
 0x530   : > { %4346 = vmatprep.subr.bf16.mxu1 %v4345_v56  ;;  %v3969_v56 = vld [vmem:[%s6209_s26 + $0x368] sm:$0xff]  ;;  %v3990_v21 = vld [vmem:[%s6209_s26 + $0x3f8] sm:$0xff]  ;;  %v3995_v8 = vld [vmem:[%s6209_s26 + $0x420] sm:$0xff] }
 0x531   : > { %2081 = vrot.lane.b32.xlu1 %v2058_v28, %s5009_s2  ;;  %2571 = vrot.lane.b32.xlu0 %v6590_v53, %s5009_s2  ;;  %v4361_v42 = vpack.c.bf16 %v3969_v56, %v3967_v6  ;;  %v3970_v28 = vld [vmem:[%s6209_s26 + $0x370] sm:$0xff]  ;;  %v4000_v6 = vld [vmem:[%s6209_s26 + $0x448] sm:$0xff] }
 0x532   : > { %v4002_v56 = vld [vmem:[%s6209_s26 + $0x458] sm:$0xff]  ;;  %v3999_v54 = vld [vmem:[%s6209_s26 + $0x440] sm:$0xff] }
 0x533   : > { %4348 = vmatpush1.bf16.msra.mxu1 %v4347_v15  ;;  %v3972_v15 = vld [vmem:[%s6209_s26 + $0x380] sm:$0xff] }
 0x534   : > { %4350 = vmatprep.subr.bf16.mxu1 %v4349_v25  ;;  %v3974_v25 = vld [vmem:[%s6209_s26 + $0x390] sm:$0xff]  ;;  %v4011_v11 = vld [vmem:[%s6209_s26 + $0x4a0] sm:$0xff] }
 0x535   : > { %2135 = vrot.lane.b32.xlu1 %v2112_v59, %s5010_s20  ;;  %2079 = vrot.lane.b32.xlu0 %v2057_v62, %s5009_s2  ;;  %v3989_v59 = vld [vmem:[%s6209_s26 + $0x3f0] sm:$0xff]  ;;  %v3992_v62 = vld [vmem:[%s6209_s26 + $0x408] sm:$0xff] }
 0x537   : > { %4352 = vmatpush1.bf16.msra.mxu1 %v4351_v52  ;;  %v3994_v52 = vld [vmem:[%s6209_s26 + $0x418] sm:$0xff] }
 0x538   : > { %4354 = vmatprep.subr.bf16.mxu1 %v4353_v49  ;;  %v3982_v49 = vld [vmem:[%s6209_s26 + $0x3d0] sm:$0x7f]  ;;  %v4381_v37 = vpack.c.bf16 %v3994_v52, %v3992_v62  ;;  %v4020_v62 = vld [vmem:[%s6209_s26 + $0x4e8] sm:$0xff]  ;;  %v4022_v52 = vld [vmem:[%s6209_s26 + $0x4f8] sm:$0xff] }
 0x539   : > { %2252 = vrot.lane.b32.xlu1 %v2236_v4, %s5009_s2  ;;  %2133 = vrot.lane.b32.xlu0 %v2111_v9, %s5010_s20  ;;  %v3973_v4 = vld [vmem:[%s6209_s26 + $0x388] sm:$0xff] }
 0x53a   : > { %v4365_v47 = vpack.c.bf16 %v3973_v4, %v3971_v60  ;;  %v3996_v9 = vld [vmem:[%s6209_s26 + $0x428] sm:$0xff]  ;;  %v4006_v4 = vld [vmem:[%s6209_s26 + $0x478] sm:$0xff] }
 0x53b   : > { %4356 = vmatpush1.bf16.msra.mxu1 %v4355_v7  ;;  %v3998_v7 = vld [vmem:[%s6209_s26 + $0x438] sm:$0xff]  ;;  %v4004_v60 = vld [vmem:[%s6209_s26 + $0x468] sm:$0xff] }
 0x53c   : > { %4358 = vmatprep.subr.bf16.mxu1 %v4357_v13  ;;  %v4383_v13 = vpack.c.bf16 %v3993_v39, %v3991_v41  ;;  %v4385_v14 = vpack.c.bf16 %v3998_v7, %v3996_v9  ;;  %v4026_v41 = vld [vmem:[%s6209_s26 + $0x518] sm:$0xff]  ;;  %v4023_v7 = vld [vmem:[%s6209_s26 + $0x500] sm:$0xff] }
 0x53d   : > { %2320 = vrot.lane.b32.xlu1 %v2304_v40, %s5010_s20  ;;  %2250 = vrot.lane.b32.xlu0 %v2234_v32, %s5009_s2  ;;  %v4367_v32 = vpack.c.bf16 %v3972_v15, %v3970_v28  ;;  %v4369_v40 = vpack.c.bf16 %v3977_v43, %v3975_v48  ;;  %v4003_v28 = vld [vmem:[%s6209_s26 + $0x460] sm:$0xff]  ;;  %v4005_v15 = vld [vmem:[%s6209_s26 + $0x470] sm:$0xff] }
 0x53e   : > { %v4008_v48 = vld [vmem:[%s6209_s26 + $0x488] sm:$0xff]  ;;  %v4010_v43 = vld [vmem:[%s6209_s26 + $0x498] sm:$0xff] }
 0x53f   : > { %4360 = vmatpush1.bf16.msra.mxu1 %v4359_v27  ;;  %v4387_v27 = vpack.c.bf16 %v3997_v19, %v3995_v8  ;;  %v4030_v8 = vld [vmem:[%s6209_s26 + $0x538] sm:$0xff] }
 0x540   : > { %4362 = vmatprep.subr.bf16.mxu1 %v4361_v42  ;;  %v4389_v42 = vpack.c.bf16 %v4002_v56, %v4000_v6  ;;  %v4027_v56 = vld [vmem:[%s6209_s26 + $0x520] sm:$0xff] }
 0x541   : > { %2437 = vrot.lane.b32.xlu1 %v2421_v3, %s5009_s2  ;;  %2318 = vrot.lane.b32.xlu0 %v2302_v12, %s5010_s20  ;;  %v4371_v12 = vpack.c.bf16 %v3976_v10, %v3974_v25  ;;  %v4373_v3 = vpack.c.bf16 %v3981_v26, %v3979_v16  ;;  %v4007_v25 = vld [vmem:[%s6209_s26 + $0x480] sm:$0xff]  ;;  %v4009_v10 = vld [vmem:[%s6209_s26 + $0x490] sm:$0xff] }
 0x542   : > { %v4012_v16 = vld [vmem:[%s6209_s26 + $0x4a8] sm:$0xff]  ;;  %v4014_v26 = vld [vmem:[%s6209_s26 + $0x4b8] sm:$0xff] }
 0x543   : > { %4364 = vmatpush1.bf16.msra.mxu1 %v4363_v45  ;;  %v4391_v45 = vpack.c.bf16 %v4001_v31, %v3999_v54  ;;  %v4034_v54 = vld [vmem:[%s6209_s26 + $0x558] sm:$0xff] }
 0x544   : > { %4366 = vmatprep.subr.bf16.mxu1 %v4365_v47  ;;  %v4393_v47 = vpack.c.bf16 %v4006_v4, %v4004_v60  ;;  %v4031_v4 = vld [vmem:[%s6209_s26 + $0x540] sm:$0xff] }
 0x545   : > { %2505 = vrot.lane.b32.xlu1 %v2489_v20, %s5010_s20  ;;  %2435 = vrot.lane.b32.xlu0 %v2419_v23, %s5009_s2  ;;  %v3983_v23 = vld [vmem:[%s6209_s26 + $0x3d8] sm:$0x7f]  ;;  %v3988_v20 = vld [vmem:[%s6209_s26 + $0x3e8] sm:$0xff] }
 0x546   : > { %v4377_v18 = vpack.c.bf16 %v3990_v21, %v3988_v20  ;;  %v4403_v20 = vpack.c.bf16 %v4013_v0, %v4011_v11  ;;  %v4046_v11 = vld [vmem:[%s6209_s26 + $0x5b8] sm:$0xff] }
 0x547   : > { %4368 = vmatpush1.bf16.msra.mxu1 %v4367_v32  ;;  %v4395_v32 = vpack.c.bf16 %v4005_v15, %v4003_v28  ;;  %v4038_v28 = vld [vmem:[%s6209_s26 + $0x578] sm:$0xff] }
 0x548   : > { %4370 = vmatprep.subr.bf16.mxu1 %v4369_v40  ;;  %v4397_v40 = vpack.c.bf16 %v4010_v43, %v4008_v48  ;;  %v4035_v43 = vld [vmem:[%s6209_s26 + $0x560] sm:$0xff] }
 0x549   : > { %2503 = vrot.lane.b32.xlu0 %v2487_v58, %s5010_s20  ;;  %v4379_v58 = vpack.c.bf16 %v3989_v59, %v3987_v29  ;;  %v4015_v29 = vld [vmem:[%s6209_s26 + $0x4c0] sm:$0xff]  ;;  %v4017_v59 = vld [vmem:[%s6209_s26 + $0x4d0] sm:$0xff]  ;;  %s549_s20 = scalar_lea.vmem %s7026_s9, %s3804_s14 }
 0x54b   : > { %4372 = vmatpush1.bf16.msra.mxu1 %v4371_v12  ;;  %v4399_v12 = vpack.c.bf16 %v4009_v10, %v4007_v25  ;;  %v4042_v25 = vld [vmem:[%s6209_s26 + $0x598] sm:$0xff] }
 0x54c   : > { %4374 = vmatprep.subr.bf16.mxu1 %v4373_v3  ;;  %v4401_v3 = vpack.c.bf16 %v4014_v26, %v4012_v16  ;;  %v4039_v26 = vld [vmem:[%s6209_s26 + $0x580] sm:$0xff] }
 0x54f   : > { %4376 = vmatpush1.bf16.msra.mxu1 %v4375_v17  ;;  %v4016_v17 = vld [vmem:[%s6209_s26 + $0x4c8] sm:$0xff] }
 0x550   : > { %3984 = vmatprep.subr.msk.mxu1 %vm1580_vm4, %v3983_v23  ;;  %v4018_v23 = vld [vmem:[%s6209_s26 + $0x4d8] sm:$0xff] }
 0x551   : > { %v4405_v21 = vpack.c.bf16 %v4018_v23, %v4016_v17  ;;  %v4043_v23 = vld [vmem:[%s6209_s26 + $0x5a0] sm:$0xff] }
 0x553   : > { %3985 = vmatpush1.msk.msra.mxu1 %vm1580_vm4, %v3982_v49  ;;  %v4407_v49 = vpack.c.bf16 %v4017_v59, %v4015_v29  ;;  %v4048_v29 = vld [vmem:[%s6209_s26 + $0x5c8] sm:$0x7f]  ;;  %v4053_v59 = vld [vmem:[%s6209_s26 + $0x5d8] sm:$0xff] }
 0x554   : > { %2903 = vmatmul.mubr.f32.vlgmr.msra.gmra.mrb[2].mxu1 %v2827_v46  ;;  %4378 = vmatprep.subr.bf16.mxu1 %v4377_v18  ;;  %v4409_v18 = vpack.c.bf16 %v4022_v52, %v4020_v62  ;;  %v4021_v46 = vld [vmem:[%s6209_s26 + $0x4f0] sm:$0xff]  ;;  %v4055_v62 = vld [vmem:[%s6209_s26 + $0x5e8] sm:$0xff]  ;;  %v4047_v52 = vld [vmem:[%s6209_s26 + $0x5c0] sm:$0x7f] }
 0x555   : > { %4380 = vmatpush1.bf16.msra.mxu1 %v4379_v58  ;;  %v4019_v58 = vld [vmem:[%s6209_s26 + $0x4e0] sm:$0xff] }
 0x556   : > { %4382 = vmatprep.subr.bf16.mxu1 %v4381_v37  ;;  %v4024_v37 = vld [vmem:[%s6209_s26 + $0x508] sm:$0xff]  ;;  %v4411_v39 = vpack.c.bf16 %v4021_v46, %v4019_v58  ;;  %v2040_v46 = vmul.f32 %v6243_v38, %v6361_v1  ;;  %v2039_v1 = vmul.f32 %v6243_v38, %v6371_v30 }
 0x557   : > { %v4413_v9 = vpack.c.bf16 %v4026_v41, %v4024_v37 }
 0x558   : > { %v2047_v38 = vadd.f32 %v2039_v1, %v6251_v55  ;;  %v4072_v1 = vld [vmem:[%s6209_s26 + $0x670] sm:$0xff] }
 0x559   : > { %4384 = vmatpush1.bf16.msra.mxu1 %v4383_v13  ;;  %v4025_v13 = vld [vmem:[%s6209_s26 + $0x510] sm:$0xff] }
 0x55a   : > { %4386 = vmatprep.subr.bf16.mxu1 %v4385_v14  ;;  %v4028_v14 = vld [vmem:[%s6209_s26 + $0x528] sm:$0xff]  ;;  %v4415_v19 = vpack.c.bf16 %v4025_v13, %v4023_v7  ;;  %v4054_v7 = vld [vmem:[%s6209_s26 + $0x5e0] sm:$0xff]  ;;  %v2048_v13 = vadd.f32 %v2040_v46, %v6251_v55 }
 0x55b   : > { %v4417_v6 = vpack.c.bf16 %v4030_v8, %v4028_v14  ;;  %v4057_v8 = vld [vmem:[%s6209_s26 + $0x5f8] sm:$0xff] }
 0x55d   : > { %4388 = vmatpush1.bf16.msra.mxu1 %v4387_v27  ;;  %v4029_v27 = vld [vmem:[%s6209_s26 + $0x530] sm:$0xff] }
 0x55e   : > { %4390 = vmatprep.subr.bf16.mxu1 %v4389_v42  ;;  %v4032_v42 = vld [vmem:[%s6209_s26 + $0x548] sm:$0xff]  ;;  %v4419_v31 = vpack.c.bf16 %v4029_v27, %v4027_v56 }
 0x55f   : > { %v4421_v60 = vpack.c.bf16 %v4034_v54, %v4032_v42 }
 0x561   : > { %4392 = vmatpush1.bf16.msra.mxu1 %v4391_v45  ;;  %v4033_v45 = vld [vmem:[%s6209_s26 + $0x550] sm:$0xff] }
 0x562   : > { %4394 = vmatprep.subr.bf16.mxu1 %v4393_v47  ;;  %v4036_v47 = vld [vmem:[%s6209_s26 + $0x568] sm:$0xff]  ;;  %v4423_v15 = vpack.c.bf16 %v4033_v45, %v4031_v4  ;;  %v4058_v4 = vld [vmem:[%s6209_s26 + $0x600] sm:$0xff] }
 0x563   : > { %v4425_v48 = vpack.c.bf16 %v4038_v28, %v4036_v47 }
 0x565   : > { %4396 = vmatpush1.bf16.msra.mxu1 %v4395_v32  ;;  %v4037_v32 = vld [vmem:[%s6209_s26 + $0x570] sm:$0xff] }
 0x566   : > { %4398 = vmatprep.subr.bf16.mxu1 %v4397_v40  ;;  %v4040_v40 = vld [vmem:[%s6209_s26 + $0x588] sm:$0xff]  ;;  %v4427_v10 = vpack.c.bf16 %v4037_v32, %v4035_v43 }
 0x567   : > { %v4429_v16 = vpack.c.bf16 %v4042_v25, %v4040_v40 }
 0x569   : > { %4400 = vmatpush1.bf16.msra.mxu1 %v4399_v12  ;;  %v4041_v12 = vld [vmem:[%s6209_s26 + $0x590] sm:$0xff] }
 0x56a   : > { %4402 = vmatprep.subr.bf16.mxu1 %v4401_v3  ;;  %v4044_v3 = vld [vmem:[%s6209_s26 + $0x5a8] sm:$0xff]  ;;  %v4431_v0 = vpack.c.bf16 %v4041_v12, %v4039_v26  ;;  %v4065_v26 = vld [vmem:[%s6209_s26 + $0x638] sm:$0xff] }
 0x56b   : > { %v4433_v17 = vpack.c.bf16 %v4046_v11, %v4044_v3  ;;  %v4067_v12 = vld [vmem:[%s6209_s26 + $0x648] sm:$0xff] }
 0x56d   : > { %4404 = vmatpush1.bf16.msra.mxu1 %v4403_v20  ;;  %v4045_v20 = vld [vmem:[%s6209_s26 + $0x5b0] sm:$0xff] }
 0x56e   : > { %4406 = vmatprep.subr.bf16.mxu1 %v4405_v21  ;;  %v4435_v21 = vpack.c.bf16 %v4045_v20, %v4043_v23  ;;  %v4449_v23 = vpack.c.bf16 %v4067_v12, %v4065_v26  ;;  %v4064_v20 = vld [vmem:[%s6209_s26 + $0x630] sm:$0xff] }
 0x571   : > { %4408 = vmatpush1.bf16.msra.mxu1 %v4407_v49  ;;  %v4437_v49 = vpack.c.bf16 %v4055_v62, %v4053_v59  ;;  %v4069_v62 = vld [vmem:[%s6209_s26 + $0x658] sm:$0xff] }
 0x572   : > { %4410 = vmatprep.subr.bf16.mxu1 %v4409_v18 }
 0x575   : > { %4412 = vmatpush1.bf16.msra.mxu1 %v4411_v39 }
 0x576   : > { %4414 = vmatprep.subr.bf16.mxu1 %v4413_v9  ;;  %v4052_v9 = vld [vmem:[%s6209_s26 + $0x5d0] sm:$0xff] }
 0x577   : > { %v4439_v56 = vpack.c.bf16 %v4054_v7, %v4052_v9  ;;  %v4073_v9 = vld [vmem:[%s6209_s26 + $0x678] sm:$0xff]  ;;  %v4075_v7 = vld [vmem:[%s6209_s26 + $0x688] sm:$0xff] }
 0x579   : > { %4416 = vmatpush1.bf16.msra.mxu1 %v4415_v19 }
 0x57a   : > { %4418 = vmatprep.subr.bf16.mxu1 %v4417_v6 }
 0x57d   : > { %4420 = vmatpush1.bf16.msra.mxu1 %v4419_v31 }
 0x57e   : > { %4422 = vmatprep.subr.bf16.mxu1 %v4421_v60  ;;  %v4056_v60 = vld [vmem:[%s6209_s26 + $0x5f0] sm:$0xff] }
 0x581   : > { %4424 = vmatpush1.bf16.msra.mxu1 %v4423_v15  ;;  %v4061_v15 = vld [vmem:[%s6209_s26 + $0x618] sm:$0xff] }
 0x582   : > { %4426 = vmatprep.subr.bf16.mxu1 %v4425_v48  ;;  %v4443_v48 = vpack.c.bf16 %v4058_v4, %v4056_v60 }
 0x585   : > { %4428 = vmatpush1.bf16.msra.mxu1 %v4427_v10  ;;  %v4060_v10 = vld [vmem:[%s6209_s26 + $0x610] sm:$0xff] }
 0x586   : > { %4430 = vmatprep.subr.bf16.mxu1 %v4429_v16  ;;  %v4062_v16 = vld [vmem:[%s6209_s26 + $0x620] sm:$0xff] }
 0x587   : > { %v4447_v63 = vpack.c.bf16 %v4062_v16, %v4060_v10  ;;  %v4082_v10 = vld [vmem:[%s6209_s26 + $0x6c0] sm:$0xff]  ;;  %v4085_v16 = vld [vmem:[%s6209_s26 + $0x6d8] sm:$0xff] }
 0x589   : > { %4432 = vmatpush1.bf16.msra.mxu1 %v4431_v0 }
 0x58a   : > { %4434 = vmatprep.subr.bf16.mxu1 %v4433_v17 }
 0x58d   : > { %4436 = vmatpush1.bf16.msra.mxu1 %v4435_v21  ;;  %v4066_v21 = vld [vmem:[%s6209_s26 + $0x640] sm:$0xff] }
 0x58e   : > { %4049 = vmatprep.subr.msk.mxu1 %vm1580_vm4, %v4048_v29  ;;  %v4451_v22 = vpack.c.bf16 %v4066_v21, %v4064_v20  ;;  %v4093_v20 = vld [vmem:[%s6209_s26 + $0x718] sm:$0xff]  ;;  %v4095_v21 = vld [vmem:[%s6209_s26 + $0x728] sm:$0xff] }
 0x591   : > { %4050 = vmatpush1.msk.msra.mxu1 %vm1580_vm4, %v4047_v52  ;;  %v4071_v52 = vld [vmem:[%s6209_s26 + $0x668] sm:$0xff] }
 0x592   : > { %4438 = vmatprep.subr.bf16.mxu1 %v4437_v49  ;;  %v4453_v46 = vpack.c.bf16 %v4071_v52, %v4069_v62  ;;  %v4092_v62 = vld [vmem:[%s6209_s26 + $0x710] sm:$0xff]  ;;  %v4094_v52 = vld [vmem:[%s6209_s26 + $0x720] sm:$0xff] }
 0x59f   : > { %v2574_v18 = vpop.permute.xlu1 %2573 }
 0x5a0   : > { %v2591_v58 = vmax.f32 %v6573_v51, %v2574_v18  ;;  %v4059_v51 = vld [vmem:[%s6209_s26 + $0x608] sm:$0xff] }
 0x5a1   : > { %v4441_v31 = vpack.c.bf16 %v4059_v51, %v4057_v8 }
 0x5a2   : > { %v2597_v37 = vmax.f32 %v2591_v58, 0.0 }
 0x5a3   : > { %v2082_v41 = vpop.permute.xlu1 %2081  ;;  %v2572_v39 = vpop.permute.xlu0 %2571 }
 0x5a4   : > { %v2580_v14 = vsel %vm1539_vm11, %v2572_v39, %v2574_v18  ;;  %4051 = vmatprep.mubr.msk.f32.mxu1 %vm2663_vm14, %v2597_v37  ;;  %v2102_v6 = vadd.f32 %v2082_v41, %v2048_v13  ;;  %v3155_v45 = vrot.slane %v2597_v37, 4  ;;  %v4068_v37 = vld [vmem:[%s6209_s26 + $0x650] sm:$0xff] }
 0x5a5   : > { %v2590_v19 = vmax.f32 %v6590_v53, %v2580_v14  ;;  %v4063_v53 = vld [vmem:[%s6209_s26 + $0x628] sm:$0xff] }
 0x5a6   : > { %v4445_v25 = vpack.c.bf16 %v4063_v53, %v4061_v15 }
 0x5a7   : > { %v6738_v27 = vmax.f32 %v2590_v19, 0.0  ;;  %v2136_v42 = vpop.permute.xlu1 %2135  ;;  %v2080_v54 = vpop.permute.xlu0 %2079  ;;  %v4457_v19 = vpack.c.bf16 %v4075_v7, %v4073_v9  ;;  %v4100_v7 = vld [vmem:[%s6209_s26 + $0x750] sm:$0xff] }
 0x5a8   : > { %v2157_v47 = vadd.f32 %v2136_v42, %v2102_v6  ;;  %v2086_v28 = vsel %vm1539_vm11, %v2080_v54, %v2082_v41  ;;  %v4070_v41 = vld [vmem:[%s6209_s26 + $0x660] sm:$0xff]  ;;  %v4077_v54 = vld [vmem:[%s6209_s26 + $0x698] sm:$0xff] }
 0x5a9   : > { %3065 = vmatmul.mubr.f32.vlgmr.msra.gmra.mrb[4].mxu1 %v6738_v27  ;;  %v2101_v43 = vadd.f32 %v2086_v28, %v2047_v38  ;;  %v4455_v33 = vpack.c.bf16 %v4070_v41, %v4068_v37  ;;  %v4074_v6 = vld [vmem:[%s6209_s26 + $0x680] sm:$0xff]  ;;  %v4081_v38 = vld [vmem:[%s6209_s26 + $0x6b8] sm:$0xff]  ;;  %v4103_v41 = vld [vmem:[%s6209_s26 + $0x768] sm:$0xff] }
 0x5aa   : > { %4440 = vmatpush1.bf16.msra.mxu1 %v4439_v56  ;;  %4116 = vmatprep.mubr.msk.f32.mxu1 %vm2663_vm14, %v3155_v45  ;;  %v2205_v30 = vadd.f32 %v2188_v61, %v2157_v47  ;;  %v4459_v4 = vpack.c.bf16 %v4074_v6, %v4072_v1  ;;  %v4076_v47 = vld [vmem:[%s6209_s26 + $0x690] sm:$0xff]  ;;  %v4078_v28 = vld [vmem:[%s6209_s26 + $0x6a0] sm:$0xff]  ;;  %v4101_v37 = vld [vmem:[%s6209_s26 + $0x758] sm:$0xff] }
 0x5ab   : > { %v2253_v32 = vpop.permute.xlu1 %2252  ;;  %v2134_v40 = vpop.permute.xlu0 %2133  ;;  %4442 = vmatprep.subr.bf16.mxu1 %v4441_v31  ;;  %v4079_v31 = vld [vmem:[%s6209_s26 + $0x6a8] sm:$0xff]  ;;  %v4485_v9 = vpack.c.bf16 %v4103_v41, %v4101_v37  ;;  %v4109_v1 = vld [vmem:[%s6209_s26 + $0x798] sm:$0xff] }
 0x5ac   : > { %v2141_v55 = vsel %vm2137_vm13, %v2134_v40, %v2136_v42  ;;  %v2273_v11 = vadd.f32 %v2253_v32, %v2205_v30  ;;  %v4083_v30 = vld [vmem:[%s6209_s26 + $0x6c8] sm:$0xff] }
 0x5ad   : > { %v2156_v3 = vadd.f32 %v2141_v55, %v2101_v43  ;;  %v4087_v55 = vld [vmem:[%s6209_s26 + $0x6e8] sm:$0xff] }
 0x5ae   : > { %4444 = vmatpush1.bf16.msra.mxu1 %v4443_v48  ;;  %v4111_v6 = vld [vmem:[%s6209_s26 + $0x7a8] sm:$0xff] }
 0x5af   : > { %v2321_v61 = vpop.permute.xlu1 %2320  ;;  %v2204_v0 = vadd.f32 %v2186_v57, %v2156_v3  ;;  %v2251_v17 = vpop.permute.xlu0 %2250  ;;  %4446 = vmatprep.subr.bf16.mxu1 %v4445_v25  ;;  %v4080_v25 = vld [vmem:[%s6209_s26 + $0x6b0] sm:$0xff]  ;;  %v4469_v3 = vpack.c.bf16 %v4087_v55, %v4085_v16  ;;  %v4126_v55 = vld [vmem:[%s6209_s26 + $0x808] sm:$0xff] }
 0x5b0   : > { %v2341_v29 = vadd.f32 %v2321_v61, %v2273_v11  ;;  %v2257_v59 = vsel %vm1539_vm11, %v2251_v17, %v2253_v32  ;;  %v4463_v32 = vpack.c.bf16 %v4078_v28, %v4076_v47  ;;  %v4467_v12 = vpack.c.bf16 %v4082_v10, %v4080_v25  ;;  %v4084_v11 = vld [vmem:[%s6209_s26 + $0x6d0] sm:$0xff]  ;;  %v4117_v28 = vld [vmem:[%s6209_s26 + $0x7c0] sm:$0xff] }
 0x5b1   : > { %v2272_v57 = vadd.f32 %v2257_v59, %v2204_v0  ;;  %v4088_v17 = vld [vmem:[%s6209_s26 + $0x6f0] sm:$0xff]  ;;  %v4477_v59 = vpack.c.bf16 %v4095_v21, %v4093_v20  ;;  %v4121_v10 = vld [vmem:[%s6209_s26 + $0x7e0] sm:$0xff] }
 0x5b2   : > { %4448 = vmatpush1.bf16.msra.mxu1 %v4447_v63  ;;  %v2390_v49 = vadd.f32 %v2373_v36, %v2341_v29  ;;  %v4086_v63 = vld [vmem:[%s6209_s26 + $0x6e0] sm:$0xff]  ;;  %v4123_v16 = vld [vmem:[%s6209_s26 + $0x7f0] sm:$0xff] }
 0x5b3   : > { %v2438_v18 = vpop.permute.xlu1 %2437  ;;  %v2319_v58 = vpop.permute.xlu0 %2318  ;;  %4450 = vmatprep.subr.bf16.mxu1 %v4449_v23  ;;  %v4471_v0 = vpack.c.bf16 %v4086_v63, %v4084_v11  ;;  %v4090_v23 = vld [vmem:[%s6209_s26 + $0x700] sm:$0xff] }
 0x5b4   : > { %v2325_v39 = vsel %vm2137_vm13, %v2319_v58, %v2321_v61  ;;  %v2458_v14 = vadd.f32 %v2438_v18, %v2390_v49  ;;  %v4089_v61 = vld [vmem:[%s6209_s26 + $0x6f8] sm:$0xff]  ;;  %v4475_v29 = vpack.c.bf16 %v4090_v23, %v4088_v17  ;;  %v4096_v58 = vld [vmem:[%s6209_s26 + $0x730] sm:$0xff]  ;;  %v4125_v63 = vld [vmem:[%s6209_s26 + $0x800] sm:$0xff] }
 0x5b5   : > { %v2340_v13 = vadd.f32 %v2325_v39, %v2272_v57  ;;  %v4097_v49 = vld [vmem:[%s6209_s26 + $0x738] sm:$0xff]  ;;  %v4479_v57 = vpack.c.bf16 %v4094_v52, %v4092_v62  ;;  %v4129_v21 = vld [vmem:[%s6209_s26 + $0x820] sm:$0xff] }
 0x5b6   : > { %4452 = vmatpush1.bf16.msra.mxu1 %v4451_v22  ;;  %v4099_v22 = vld [vmem:[%s6209_s26 + $0x748] sm:$0xff]  ;;  %v4136_v62 = vld [vmem:[%s6209_s26 + $0x858] sm:$0xff] }
 0x5b7   : > { %v2506_v36 = vpop.permute.xlu1 %2505  ;;  %v2389_v8 = vadd.f32 %v2371_v5, %v2340_v13  ;;  %v2436_v51 = vpop.permute.xlu0 %2435  ;;  %4454 = vmatprep.subr.bf16.mxu1 %v4453_v46  ;;  %v4461_v5 = vpack.c.bf16 %v4079_v31, %v4077_v54  ;;  %v4098_v46 = vld [vmem:[%s6209_s26 + $0x740] sm:$0xff]  ;;  %v4108_v54 = vld [vmem:[%s6209_s26 + $0x790] sm:$0xff] }
 0x5b8   : > { %v2526_v56 = vadd.f32 %v2506_v36, %v2458_v14  ;;  %v2442_v42 = vsel %vm1539_vm11, %v2436_v51, %v2438_v18  ;;  %v4481_v18 = vpack.c.bf16 %v4099_v22, %v4097_v49  ;;  %v4483_v39 = vpack.c.bf16 %v4098_v46, %v4096_v58  ;;  %v4102_v13 = vld [vmem:[%s6209_s26 + $0x760] sm:$0xff]  ;;  %v4105_v14 = vld [vmem:[%s6209_s26 + $0x778] sm:$0xff]  ;;  %v4104_v51 = vld [vmem:[%s6209_s26 + $0x770] sm:$0xff] }
 0x5b9   : > { %v2457_v45 = vadd.f32 %v2442_v42, %v2389_v8  ;;  %v4493_v42 = vpack.c.bf16 %v4111_v6, %v4109_v1  ;;  %v4110_v31 = vld [vmem:[%s6209_s26 + $0x7a0] sm:$0xff]  ;;  %v4138_v58 = vld [vmem:[%s6209_s26 + $0x868] sm:$0xff]  ;;  %v4140_v46 = vld [vmem:[%s6209_s26 + $0x878] sm:$0xff] }
 0x5ba   : > { %v2547_v60 = vrot.slane %v2526_v56, 2  ;;  %4456 = vmatpush1.bf16.msra.mxu1 %v4455_v33  ;;  %v4107_v33 = vld [vmem:[%s6209_s26 + $0x788] sm:$0xff]  ;;  %v4517_v41 = vpack.c.bf16 %v4140_v46, %v4138_v58  ;;  %v4175_v58 = vld [vmem:[%s6209_s26 + $0x990] sm:$0xff] }
 0x5bb   : > { %v2504_v44 = vpop.permute.xlu0 %2503  ;;  %4458 = vmatprep.subr.bf16.mxu1 %v4457_v19  ;;  %v4489_v8 = vpack.c.bf16 %v4107_v33, %v4105_v14  ;;  %v4106_v19 = vld [vmem:[%s6209_s26 + $0x780] sm:$0xff] }
 0x5bc   : > { %v2548_v15 = vsel %vm1769_vm9, %v2543_v2, %v2547_v60  ;;  %v2510_v53 = vsel %vm2137_vm13, %v2504_v44, %v2506_v36  ;;  %v4465_v2 = vpack.c.bf16 %v4083_v30, %v4081_v38  ;;  %v4487_v36 = vpack.c.bf16 %v4102_v13, %v4100_v7  ;;  %v4120_v44 = vld [vmem:[%s6209_s26 + $0x7d8] sm:$0xff]  ;;  %v4112_v30 = vld [vmem:[%s6209_s26 + $0x7b0] sm:$0x7f]  ;;  %v4142_v7 = vld [vmem:[%s6209_s26 + $0x888] sm:$0xff] }
 0x5bd   : > { %v2525_v48 = vadd.f32 %v2510_v53, %v2457_v45  ;;  %v6785_v43 = vmax.f32 %v6557_v24, %v2548_v15  ;;  %v4491_v56 = vpack.c.bf16 %v4106_v19, %v4104_v51  ;;  %v4495_v60 = vpack.c.bf16 %v4110_v31, %v4108_v54  ;;  %v4118_v45 = vld [vmem:[%s6209_s26 + $0x7c8] sm:$0xff]  ;;  %v4119_v15 = vld [vmem:[%s6209_s26 + $0x7d0] sm:$0xff]  ;;  %v4124_v38 = vld [vmem:[%s6209_s26 + $0x7f8] sm:$0xff] }
 0x5be   : > { %4460 = vmatpush1.bf16.msra.mxu1 %v4459_v4  ;;  %v4113_v4 = vld [vmem:[%s6209_s26 + $0x7b8] sm:$0x7f]  ;;  %v4122_v53 = vld [vmem:[%s6209_s26 + $0x7e8] sm:$0xff] }
 0x5bf   : > { %v2545_v40 = vrot.slane %v2525_v48, 2  ;;  %2577 = vrot.lane.b32.xlu1 %v6785_v43, %s5009_s2  ;;  %4462 = vmatprep.subr.bf16.mxu1 %v4461_v5  ;;  %v5011_v5 = vmov 1966171168   ;;  %v4497_v48 = vpack.c.bf16 %v4120_v44, %v4118_v45  ;;  %v4501_v25 = vpack.c.bf16 %v4124_v38, %v4122_v53  ;;  %v4144_v13 = vld [vmem:[%s6209_s26 + $0x898] sm:$0xff]  ;;  %v4146_v51 = vld [vmem:[%s6209_s26 + $0x8a8] sm:$0xff]  ;;  %v4149_v45 = vld [vmem:[%s6209_s26 + $0x8c0] sm:$0xff] }
 0x5c0   : > { %v2748_v47 = vunpack.c.l.s4 %v5011_v5  ;;  %v4521_v33 = vpack.c.bf16 %v4144_v13, %v4142_v7  ;;  %v4148_v19 = vld [vmem:[%s6209_s26 + $0x8b8] sm:$0xff]  ;;  %v4150_v54 = vld [vmem:[%s6209_s26 + $0x8c8] sm:$0xff]  ;;  %v4151_v44 = vld [vmem:[%s6209_s26 + $0x8d0] sm:$0xff] }
 0x5c1   : > { %v2546_v24 = vsel %vm1769_vm9, %v2541_v34, %v2545_v40  ;;  %v4091_v34 = vld [vmem:[%s6209_s26 + $0x708] sm:$0xff]  ;;  %v4525_v6 = vpack.c.bf16 %v4148_v19, %v4146_v51  ;;  %v4152_v31 = vld [vmem:[%s6209_s26 + $0x8d8] sm:$0xff]  ;;  %v4153_v53 = vld [vmem:[%s6209_s26 + $0x8e0] sm:$0xff] }
 0x5c2   : > { %4464 = vmatpush1.bf16.msra.mxu1 %v4463_v32  ;;  %v6797_v26 = vmax.f32 %v6570_v35, %v2546_v24  ;;  %v4473_v35 = vpack.c.bf16 %v4091_v34, %v4089_v61  ;;  %v4499_v32 = vpack.c.bf16 %v4119_v15, %v4117_v28  ;;  %v2749_v40 = vunpack.c.0.s8 %v2748_v47  ;;  %v4128_v24 = vld [vmem:[%s6209_s26 + $0x818] sm:$0xff]  ;;  %v4127_v61 = vld [vmem:[%s6209_s26 + $0x810] sm:$0xff]  ;;  %v4154_v5 = vld [vmem:[%s6209_s26 + $0x8e8] sm:$0xff] }
 0x5c3   : > { %4466 = vmatprep.subr.bf16.mxu1 %v4465_v2  ;;  %v3154_v2 = vrot.slane %v6738_v27, 4  ;;  %v4505_v11 = vpack.c.bf16 %v4128_v24, %v4126_v55  ;;  %v4507_v23 = vpack.c.bf16 %v4127_v61, %v4125_v63  ;;  %v4156_v47 = vld [vmem:[%s6209_s26 + $0x8f8] sm:$0xff]  ;;  %v4531_v28 = vpack.c.bf16 %v4151_v44, %v4149_v45  ;;  %v4155_v38 = vld [vmem:[%s6209_s26 + $0x8f0] sm:$0xff] }
 0x5c4   : > { %2575 = vrot.lane.b32.xlu0 %v6797_v26, %s5009_s2  ;;  %v4533_v15 = vpack.c.bf16 %v4156_v47, %v4154_v5  ;;  %v4168_v63 = vld [vmem:[%s6209_s26 + $0x958] sm:$0xff]  ;;  %v4186_v47 = vld [vmem:[%s6209_s26 + $0x9d0] sm:$0xff] }
 0x5c6   : > { %4468 = vmatpush1.bf16.msra.mxu1 %v4467_v12  ;;  %v4503_v12 = vpack.c.bf16 %v4123_v16, %v4121_v10  ;;  %v4162_v10 = vld [vmem:[%s6209_s26 + $0x928] sm:$0xff]  ;;  %v4164_v16 = vld [vmem:[%s6209_s26 + $0x938] sm:$0xff] }
 0x5c7   : > { %4470 = vmatprep.subr.bf16.mxu1 %v4469_v3  ;;  %v6843_v3 = vsub.s32 %v2749_v40, %v5312_v50  ;;  %v4541_v24 = vpack.c.bf16 %v4164_v16, %v4162_v10  ;;  %v4194_v16 = vld [vmem:[%s6209_s26 + $0xa10] sm:$0xff] }
 0x5ca   : > { %4472 = vmatpush1.bf16.msra.mxu1 %v4471_v0  ;;  %v4130_v0 = vld [vmem:[%s6209_s26 + $0x828] sm:$0xff] }
 0x5cb   : > { %4474 = vmatprep.subr.bf16.mxu1 %v4473_v35  ;;  %v4132_v35 = vld [vmem:[%s6209_s26 + $0x838] sm:$0xff] }
 0x5cc   : > { %v4509_v20 = vpack.c.bf16 %v4132_v35, %v4130_v0  ;;  %v4165_v0 = vld [vmem:[%s6209_s26 + $0x940] sm:$0xff]  ;;  %v4167_v35 = vld [vmem:[%s6209_s26 + $0x950] sm:$0xff] }
 0x5ce   : > { %4476 = vmatpush1.bf16.msra.mxu1 %v4475_v29  ;;  %v4131_v29 = vld [vmem:[%s6209_s26 + $0x830] sm:$0xff] }
 0x5cf   : > { %4478 = vmatprep.subr.bf16.mxu1 %v4477_v59  ;;  %v4134_v59 = vld [vmem:[%s6209_s26 + $0x848] sm:$0xff]  ;;  %v4511_v49 = vpack.c.bf16 %v4131_v29, %v4129_v21  ;;  %v4169_v29 = vld [vmem:[%s6209_s26 + $0x960] sm:$0xff] }
 0x5d0   : > { %v4513_v22 = vpack.c.bf16 %v4136_v62, %v4134_v59  ;;  %v4171_v59 = vld [vmem:[%s6209_s26 + $0x970] sm:$0xff]  ;;  %v4174_v62 = vld [vmem:[%s6209_s26 + $0x988] sm:$0xff] }
 0x5d2   : > { %4480 = vmatpush1.bf16.msra.mxu1 %v4479_v57  ;;  %v4133_v57 = vld [vmem:[%s6209_s26 + $0x840] sm:$0xff] }
 0x5d3   : > { %4482 = vmatprep.subr.bf16.mxu1 %v4481_v18  ;;  %v4135_v18 = vld [vmem:[%s6209_s26 + $0x850] sm:$0xff] }
 0x5d4   : > { %v4515_v37 = vpack.c.bf16 %v4135_v18, %v4133_v57  ;;  %v4173_v18 = vld [vmem:[%s6209_s26 + $0x980] sm:$0xff] }
 0x5d5   : > { %v4555_v46 = vpack.c.bf16 %v4175_v58, %v4173_v18  ;;  %v4213_v18 = vld [vmem:[%s6209_s26 + $0xaa8] sm:$0xff] }
 0x5d6   : > { %4484 = vmatpush1.bf16.msra.mxu1 %v4483_v39  ;;  %v4137_v39 = vld [vmem:[%s6209_s26 + $0x860] sm:$0xff] }
 0x5d7   : > { %4486 = vmatprep.subr.bf16.mxu1 %v4485_v9  ;;  %v4139_v9 = vld [vmem:[%s6209_s26 + $0x870] sm:$0xff] }
 0x5d8   : > { %v4519_v14 = vpack.c.bf16 %v4139_v9, %v4137_v39  ;;  %v4185_v39 = vld [vmem:[%s6209_s26 + $0x9c8] sm:$0xff]  ;;  %v4177_v9 = vld [vmem:[%s6209_s26 + $0x9a0] sm:$0x7f] }
 0x5da   : > { %4488 = vmatpush1.bf16.msra.mxu1 %v4487_v36  ;;  %v4141_v36 = vld [vmem:[%s6209_s26 + $0x880] sm:$0xff] }
 0x5db   : > { %4490 = vmatprep.subr.bf16.mxu1 %v4489_v8  ;;  %v4143_v8 = vld [vmem:[%s6209_s26 + $0x890] sm:$0xff] }
 0x5dc   : > { %v4523_v1 = vpack.c.bf16 %v4143_v8, %v4141_v36  ;;  %v2600_v36 = vld [vmem:[%s549_s20] sm:$0x3] }
 0x5de   : > { %4492 = vmatpush1.bf16.msra.mxu1 %v4491_v56  ;;  %v4145_v56 = vld [vmem:[%s6209_s26 + $0x8a0] sm:$0xff] }
 0x5df   : > { %4494 = vmatprep.subr.bf16.mxu1 %v4493_v42  ;;  %v4147_v42 = vld [vmem:[%s6209_s26 + $0x8b0] sm:$0xff] }
 0x5e2   : > { %4496 = vmatpush1.bf16.msra.mxu1 %v4495_v60  ;;  %v4527_v60 = vpack.c.bf16 %v4147_v42, %v4145_v56 }
 0x5e3   : > { %4114 = vmatprep.subr.msk.mxu1 %vm1580_vm4, %v4113_v4  ;;  %v4529_v4 = vpack.c.bf16 %v4152_v31, %v4150_v54  ;;  %v4182_v31 = vld [vmem:[%s6209_s26 + $0x9b0] sm:$0xff] }
 0x5e6   : > { %4115 = vmatpush1.msk.msra.mxu1 %vm1580_vm4, %v4112_v30  ;;  %v4158_v30 = vld [vmem:[%s6209_s26 + $0x908] sm:$0xff] }
 0x5e7   : > { %3230 = vmatmul.mubr.f32.vlgmr.msra.gmra.mrb[6].mxu1 %v3154_v2  ;;  %4498 = vmatprep.subr.bf16.mxu1 %v4497_v48  ;;  %v4160_v48 = vld [vmem:[%s6209_s26 + $0x918] sm:$0xff]  ;;  %v4157_v2 = vld [vmem:[%s6209_s26 + $0x900] sm:$0xff] }
 0x5e8   : > { %4500 = vmatpush1.bf16.msra.mxu1 %v4499_v32  ;;  %v4535_v32 = vpack.c.bf16 %v4155_v38, %v4153_v53  ;;  %v4537_v40 = vpack.c.bf16 %v4160_v48, %v4158_v30  ;;  %v4191_v53 = vld [vmem:[%s6209_s26 + $0x9f8] sm:$0xff]  ;;  %v4193_v38 = vld [vmem:[%s6209_s26 + $0xa08] sm:$0xff]  ;;  %v4190_v48 = vld [vmem:[%s6209_s26 + $0x9f0] sm:$0xff] }
 0x5e9   : > { %v2739_v27 = vpop.f32.mrb[0].mxu1  ;;  %4502 = vmatprep.subr.bf16.mxu1 %v4501_v25  ;;  %v4159_v25 = vld [vmem:[%s6209_s26 + $0x910] sm:$0xff]  ;;  %v4565_v30 = vpack.c.bf16 %v4193_v38, %v4191_v53  ;;  %v4233_v53 = vld [vmem:[%s6209_s26 + $0xb48] sm:$0xff] }
 0x5ea   : > { %v2741_v34 = vpop.f32.mrb[1].mxu1  ;;  %v4539_v55 = vpack.c.bf16 %v4159_v25, %v4157_v2  ;;  %v4197_v2 = vld [vmem:[%s6209_s26 + $0xa28] sm:$0xff] }
 0x5eb   : > { %v2746_v17 = vcombine.low %v2739_v27, %v2741_v34  ;;  %v4163_v27 = vld [vmem:[%s6209_s26 + $0x930] sm:$0xff] }
 0x5ec   : > { %4504 = vmatpush1.bf16.msra.mxu1 %v4503_v12  ;;  %v4161_v12 = vld [vmem:[%s6209_s26 + $0x920] sm:$0xff] }
 0x5ed   : > { %v6850_v50 = vrot.slane %v2746_v17, %v6843_v3  ;;  %4506 = vmatprep.subr.bf16.mxu1 %v4505_v11  ;;  %v4166_v11 = vld [vmem:[%s6209_s26 + $0x948] sm:$0xff]  ;;  %v4543_v61 = vpack.c.bf16 %v4163_v27, %v4161_v12 }
 0x5ee   : > { %v4545_v34 = vpack.c.bf16 %v4168_v63, %v4166_v11  ;;  %v4170_v17 = vld [vmem:[%s6209_s26 + $0x968] sm:$0xff]  ;;  %v4198_v63 = vld [vmem:[%s6209_s26 + $0xa30] sm:$0xff] }
 0x5ef   : > { %v2760_v52 = vrot.slane %v6850_v50, %v6843_v3  ;;  %v4201_v12 = vld [vmem:[%s6209_s26 + $0xa48] sm:$0xff] }
 0x5f0   : > { %4508 = vmatpush1.bf16.msra.mxu1 %v4507_v23  ;;  %v4172_v23 = vld [vmem:[%s6209_s26 + $0x978] sm:$0xff] }
 0x5f1   : > { %4510 = vmatprep.subr.bf16.mxu1 %v4509_v20  ;;  %v4547_v20 = vpack.c.bf16 %v4167_v35, %v4165_v0  ;;  %v4549_v21 = vpack.c.bf16 %v4172_v23, %v4170_v17  ;;  %v2762_v51 = vadd.f32 %v2760_v52, %v2600_v36  ;;  %v4187_v52 = vld [vmem:[%s6209_s26 + $0x9d8] sm:$0xff]  ;;  %v4205_v0 = vld [vmem:[%s6209_s26 + $0xa68] sm:$0xff]  ;;  %v4202_v23 = vld [vmem:[%s6209_s26 + $0xa50] sm:$0xff] }
 0x5f2   : > { %v4219_v36 = vld [vmem:[%s6209_s26 + $0xad8] sm:$0xff] }
 0x5f4   : > { %4512 = vmatpush1.bf16.msra.mxu1 %v4511_v49  ;;  %v4176_v49 = vld [vmem:[%s6209_s26 + $0x998] sm:$0xff] }
 0x5f5   : > { %4514 = vmatprep.subr.bf16.mxu1 %v4513_v22  ;;  %v4551_v22 = vpack.c.bf16 %v4171_v59, %v4169_v29  ;;  %v4553_v57 = vpack.c.bf16 %v4176_v49, %v4174_v62  ;;  %v4209_v29 = vld [vmem:[%s6209_s26 + $0xa88] sm:$0xff]  ;;  %v4206_v49 = vld [vmem:[%s6209_s26 + $0xa70] sm:$0xff] }
 0x5f8   : > { %4516 = vmatpush1.bf16.msra.mxu1 %v4515_v37  ;;  %v4178_v37 = vld [vmem:[%s6209_s26 + $0x9a8] sm:$0x7f] }
 0x5f9   : > { %4518 = vmatprep.subr.bf16.mxu1 %v4517_v41  ;;  %v4183_v41 = vld [vmem:[%s6209_s26 + $0x9b8] sm:$0xff] }
 0x5fa   : > { %v4557_v7 = vpack.c.bf16 %v4185_v39, %v4183_v41  ;;  %v4212_v41 = vld [vmem:[%s6209_s26 + $0xaa0] sm:$0xff]  ;;  %v4215_v39 = vld [vmem:[%s6209_s26 + $0xab8] sm:$0xff] }
 0x5fc   : > { %4520 = vmatpush1.bf16.msra.mxu1 %v4519_v14 }
 0x5fd   : > { %4522 = vmatprep.subr.bf16.mxu1 %v4521_v33 }
 0x600   : > { %4524 = vmatpush1.bf16.msra.mxu1 %v4523_v1 }
 0x601   : > { %4526 = vmatprep.subr.bf16.mxu1 %v4525_v6 }
 0x604   : > { %4528 = vmatpush1.bf16.msra.mxu1 %v4527_v60  ;;  %v4184_v60 = vld [vmem:[%s6209_s26 + $0x9c0] sm:$0xff] }
 0x605   : > { %4530 = vmatprep.subr.bf16.mxu1 %v4529_v4  ;;  %v4189_v4 = vld [vmem:[%s6209_s26 + $0x9e8] sm:$0xff]  ;;  %v4559_v44 = vpack.c.bf16 %v4184_v60, %v4182_v31 }
 0x608   : > { %4532 = vmatpush1.bf16.msra.mxu1 %v4531_v28  ;;  %v4188_v28 = vld [vmem:[%s6209_s26 + $0x9e0] sm:$0xff] }
 0x609   : > { %4534 = vmatprep.subr.bf16.mxu1 %v4533_v15 }
 0x60c   : > { %4536 = vmatpush1.bf16.msra.mxu1 %v4535_v32  ;;  %v4192_v32 = vld [vmem:[%s6209_s26 + $0xa00] sm:$0xff] }
 0x60d   : > { %4538 = vmatprep.subr.bf16.mxu1 %v4537_v40  ;;  %v4195_v40 = vld [vmem:[%s6209_s26 + $0xa18] sm:$0xff]  ;;  %v4567_v25 = vpack.c.bf16 %v4192_v32, %v4190_v48  ;;  %v4232_v48 = vld [vmem:[%s6209_s26 + $0xb40] sm:$0xff] }
 0x60e   : > { %v4569_v10 = vpack.c.bf16 %v4197_v2, %v4195_v40  ;;  %v4235_v32 = vld [vmem:[%s6209_s26 + $0xb58] sm:$0xff]  ;;  %v4237_v40 = vld [vmem:[%s6209_s26 + $0xb68] sm:$0xff] }
 0x610   : > { %4540 = vmatpush1.bf16.msra.mxu1 %v4539_v55  ;;  %v4196_v55 = vld [vmem:[%s6209_s26 + $0xa20] sm:$0xff] }
 0x611   : > { %4542 = vmatprep.subr.bf16.mxu1 %v4541_v24  ;;  %v4199_v24 = vld [vmem:[%s6209_s26 + $0xa38] sm:$0xff]  ;;  %v4571_v27 = vpack.c.bf16 %v4196_v55, %v4194_v16  ;;  %v4236_v16 = vld [vmem:[%s6209_s26 + $0xb60] sm:$0xff] }
 0x612   : > { %v4573_v11 = vpack.c.bf16 %v4201_v12, %v4199_v24  ;;  %v4239_v55 = vld [vmem:[%s6209_s26 + $0xb78] sm:$0xff]  ;;  %v4241_v24 = vld [vmem:[%s6209_s26 + $0xb88] sm:$0xff] }
 0x614   : > { %4544 = vmatpush1.bf16.msra.mxu1 %v4543_v61  ;;  %v4200_v61 = vld [vmem:[%s6209_s26 + $0xa40] sm:$0xff] }
 0x615   : > { %4546 = vmatprep.subr.bf16.mxu1 %v4545_v34  ;;  %v4203_v34 = vld [vmem:[%s6209_s26 + $0xa58] sm:$0xff]  ;;  %v4575_v35 = vpack.c.bf16 %v4200_v61, %v4198_v63  ;;  %v4240_v63 = vld [vmem:[%s6209_s26 + $0xb80] sm:$0xff] }
 0x616   : > { %v4577_v17 = vpack.c.bf16 %v4205_v0, %v4203_v34  ;;  %v4243_v34 = vld [vmem:[%s6209_s26 + $0xb98] sm:$0x7f]  ;;  %v4242_v0 = vld [vmem:[%s6209_s26 + $0xb90] sm:$0x7f] }
 0x618   : > { %4548 = vmatpush1.bf16.msra.mxu1 %v4547_v20  ;;  %v4204_v20 = vld [vmem:[%s6209_s26 + $0xa60] sm:$0xff] }
 0x619   : > { %4550 = vmatprep.subr.bf16.mxu1 %v4549_v21  ;;  %v4207_v21 = vld [vmem:[%s6209_s26 + $0xa78] sm:$0xff]  ;;  %v4579_v59 = vpack.c.bf16 %v4204_v20, %v4202_v23 }
 0x61a   : > { %v4581_v62 = vpack.c.bf16 %v4209_v29, %v4207_v21 }
 0x61c   : > { %4552 = vmatpush1.bf16.msra.mxu1 %v4551_v22  ;;  %v4208_v22 = vld [vmem:[%s6209_s26 + $0xa80] sm:$0xff] }
 0x61d   : > { %4554 = vmatprep.subr.bf16.mxu1 %v4553_v57  ;;  %v4211_v57 = vld [vmem:[%s6209_s26 + $0xa98] sm:$0xff]  ;;  %v4583_v58 = vpack.c.bf16 %v4208_v22, %v4206_v49 }
 0x620   : > { %4556 = vmatpush1.bf16.msra.mxu1 %v4555_v46  ;;  %v4585_v46 = vpack.c.bf16 %v4213_v18, %v4211_v57 }
 0x621   : > { %4179 = vmatprep.subr.msk.mxu1 %vm1580_vm4, %v4178_v37  ;;  %v4210_v37 = vld [vmem:[%s6209_s26 + $0xa90] sm:$0xff] }
 0x624   : > { %4180 = vmatpush1.msk.msra.mxu1 %vm1580_vm4, %v4177_v9  ;;  %v4217_v9 = vld [vmem:[%s6209_s26 + $0xac8] sm:$0xff] }
 0x625   : > { %4558 = vmatprep.subr.bf16.mxu1 %v4557_v7  ;;  %v4587_v7 = vpack.c.bf16 %v4212_v41, %v4210_v37 }
 0x627   : > { %v2904_v13 = vpop.f32.mrb[2].mxu1 }
 0x628   : > { %v2906_v14 = vpop.f32.mrb[3].mxu1 }
 0x629   : > { %v2911_v33 = vcombine.low %v2904_v13, %v2906_v14  ;;  %v4589_v13 = vpack.c.bf16 %v4217_v9, %v4215_v39  ;;  %v4214_v14 = vld [vmem:[%s6209_s26 + $0xab0] sm:$0xff] }
 0x62b   : > { %v2918_v8 = vrot.slane %v2911_v33, %v6843_v3  ;;  %v4216_v33 = vld [vmem:[%s6209_s26 + $0xac0] sm:$0xff] }
 0x62d   : > { %v2925_v19 = vrot.slane %v2918_v8, %v6843_v3  ;;  %v4221_v8 = vld [vmem:[%s6209_s26 + $0xae8] sm:$0xff] }
 0x62f   : > { %v6915_v1 = vadd.f32 %v2925_v19, %v2762_v51  ;;  %v4591_v51 = vpack.c.bf16 %v4216_v33, %v4214_v14  ;;  %v4593_v19 = vpack.c.bf16 %v4221_v8, %v4219_v36  ;;  %v7059_v36 = vlaneseq }
 0x631   : > { %v2578_v6 = vpop.permute.xlu1 %2577  ;;  %vm3584_vm15 = vcmp.lt.s32.totalorder %v7059_v36, 200 }
 0x632   : > { %v2593_v56 = vmax.f32 %v6785_v43, %v2578_v6  ;;  %v4561_v43 = vpack.c.bf16 %v4189_v4, %v4187_v52  ;;  %v4224_v52 = vld [vmem:[%s6209_s26 + $0xb00] sm:$0xff]  ;;  %v4227_v4 = vld [vmem:[%s6209_s26 + $0xb18] sm:$0xff] }
 0x634   : > { %v2599_v42 = vmax.f32 %v2593_v56, 0.0  ;;  %v4220_v56 = vld [vmem:[%s6209_s26 + $0xae0] sm:$0xff] }
 0x636   : > { %4181 = vmatprep.mubr.msk.f32.mxu1 %vm2663_vm14, %v2599_v42  ;;  %v2576_v54 = vpop.permute.xlu0 %2575  ;;  %v3482_v15 = vrot.slane %v2599_v42, 4  ;;  %v4223_v42 = vld [vmem:[%s6209_s26 + $0xaf8] sm:$0xff] }
 0x637   : > { %v2581_v50 = vsel %vm1539_vm11, %v2576_v54, %v2578_v6  ;;  %v4218_v6 = vld [vmem:[%s6209_s26 + $0xad0] sm:$0xff]  ;;  %v4225_v54 = vld [vmem:[%s6209_s26 + $0xb08] sm:$0xff] }
 0x638   : > { %v2592_v45 = vmax.f32 %v6797_v26, %v2581_v50  ;;  %v4563_v26 = vpack.c.bf16 %v4188_v28, %v4186_v47  ;;  %v4595_v31 = vpack.c.bf16 %v4220_v56, %v4218_v6  ;;  %v4597_v60 = vpack.c.bf16 %v4225_v54, %v4223_v42  ;;  %v4222_v50 = vld [vmem:[%s6209_s26 + $0xaf0] sm:$0xff]  ;;  %v4228_v28 = vld [vmem:[%s6209_s26 + $0xb20] sm:$0xff] }
 0x639   : > { %v4226_v47 = vld [vmem:[%s6209_s26 + $0xb10] sm:$0xff] }
 0x63a   : > { %v6925_v5 = vmax.f32 %v2592_v45, 0.0  ;;  %v4229_v45 = vld [vmem:[%s6209_s26 + $0xb28] sm:$0xff]  ;;  %v4603_v38 = vpack.c.bf16 %v4228_v28, %v4226_v47 }
 0x63c   : > { %3392 = vmatmul.mubr.f32.vlgmr.msra.gmra.mrb[8].mxu1 %v6925_v5 }
 0x63d   : > { %4560 = vmatpush1.bf16.msra.mxu1 %v4559_v44  ;;  %4246 = vmatprep.mubr.msk.f32.mxu1 %vm2663_vm14, %v3482_v15  ;;  %v4599_v44 = vpack.c.bf16 %v4224_v52, %v4222_v50  ;;  %v4231_v15 = vld [vmem:[%s6209_s26 + $0xb38] sm:$0xff] }
 0x63e   : > { %4562 = vmatprep.subr.bf16.mxu1 %v4561_v43  ;;  %v4601_v43 = vpack.c.bf16 %v4229_v45, %v4227_v4 }
 0x641   : > { %4564 = vmatpush1.bf16.msra.mxu1 %v4563_v26  ;;  %v4605_v26 = vpack.c.bf16 %v4233_v53, %v4231_v15 }
 0x642   : > { %4566 = vmatprep.subr.bf16.mxu1 %v4565_v30  ;;  %v4230_v30 = vld [vmem:[%s6209_s26 + $0xb30] sm:$0xff] }
 0x643   : > { %v4607_v2 = vpack.c.bf16 %v4232_v48, %v4230_v30 }
 0x645   : > { %4568 = vmatpush1.bf16.msra.mxu1 %v4567_v25  ;;  %v4609_v25 = vpack.c.bf16 %v4237_v40, %v4235_v32 }
 0x646   : > { %4570 = vmatprep.subr.bf16.mxu1 %v4569_v10  ;;  %v4234_v10 = vld [vmem:[%s6209_s26 + $0xb50] sm:$0xff] }
 0x647   : > { %v4611_v12 = vpack.c.bf16 %v4236_v16, %v4234_v10 }
 0x649   : > { %4572 = vmatpush1.bf16.msra.mxu1 %v4571_v27  ;;  %v4613_v27 = vpack.c.bf16 %v4241_v24, %v4239_v55 }
 0x64a   : > { %4574 = vmatprep.subr.bf16.mxu1 %v4573_v11  ;;  %v4238_v11 = vld [vmem:[%s6209_s26 + $0xb70] sm:$0xff] }
 0x64b   : > { %v4615_v61 = vpack.c.bf16 %v4240_v63, %v4238_v11 }
 0x64d   : > { %4576 = vmatpush1.bf16.msra.mxu1 %v4575_v35  ;;  %v3481_v35 = vrot.slane %v6925_v5, 4 }
 0x64e   : > { %4578 = vmatprep.subr.bf16.mxu1 %v4577_v17 }
 0x651   : > { %4580 = vmatpush1.bf16.msra.mxu1 %v4579_v59 }
 0x652   : > { %4582 = vmatprep.subr.bf16.mxu1 %v4581_v62 }
 0x655   : > { %4584 = vmatpush1.bf16.msra.mxu1 %v4583_v58 }
 0x656   : > { %4586 = vmatprep.subr.bf16.mxu1 %v4585_v46 }
 0x659   : > { %4588 = vmatpush1.bf16.msra.mxu1 %v4587_v7 }
 0x65a   : > { %4590 = vmatprep.subr.bf16.mxu1 %v4589_v13 }
 0x65d   : > { %4592 = vmatpush1.bf16.msra.mxu1 %v4591_v51 }
 0x65e   : > { %4594 = vmatprep.subr.bf16.mxu1 %v4593_v19 }
 0x661   : > { %4596 = vmatpush1.bf16.msra.mxu1 %v4595_v31 }
 0x662   : > { %4598 = vmatprep.subr.bf16.mxu1 %v4597_v60 }
 0x665   : > { %4600 = vmatpush1.bf16.msra.mxu1 %v4599_v44 }
 0x666   : > { %4602 = vmatprep.subr.bf16.mxu1 %v4601_v43 }
 0x669   : > { %4604 = vmatpush1.bf16.msra.mxu1 %v4603_v38 }
 0x66a   : > { %4606 = vmatprep.subr.bf16.mxu1 %v4605_v26 }
 0x66d   : > { %4608 = vmatpush1.bf16.msra.mxu1 %v4607_v2 }
 0x66e   : > { %4610 = vmatprep.subr.bf16.mxu1 %v4609_v25 }
 0x671   : > { %4612 = vmatpush1.bf16.msra.mxu1 %v4611_v12 }
 0x672   : > { %4614 = vmatprep.subr.bf16.mxu1 %v4613_v27 }
 0x675   : > { %4616 = vmatpush1.bf16.msra.mxu1 %v4615_v61 }
 0x676   : > { %4244 = vmatprep.subr.msk.mxu1 %vm1580_vm4, %v4243_v34 }
 0x679   : > { %4245 = vmatpush1.msk.msra.mxu1 %vm1580_vm4, %v4242_v0 }
 0x67a   : > { %3557 = vmatmul.mubr.f32.vlgmr.msra.gmra.mrb[10].mxu1 %v3481_v35 }
 0x67c   : > { %v3066_v17 = vpop.f32.mrb[4].mxu1 }
 0x67d   : > { %v3068_v23 = vpop.f32.mrb[5].mxu1 }
 0x67e   : > { %v3073_v20 = vcombine.low %v3066_v17, %v3068_v23 }
 0x680   : > { %v3080_v21 = vrot.slane %v3073_v20, %v6843_v3 }
 0x682   : > { %v3087_v29 = vrot.slane %v3080_v21, %v6843_v3 }
 0x684   : > { %v3089_v59 = vadd.f32 %v3087_v29, %v6915_v1 }
 0x6ba   : > { %v3231_v62 = vpop.f32.mrb[6].mxu1 }
 0x6bb   : > { %v3233_v49 = vpop.f32.mrb[7].mxu1 }
 0x6bc   : > { %v3238_v22 = vcombine.low %v3231_v62, %v3233_v49 }
 0x6be   : > { %v3245_v57 = vrot.slane %v3238_v22, %v6843_v3 }
 0x6c0   : > { %v3252_v5 = vrot.slane %v3245_v57, %v6843_v3 }
 0x6c2   : > { %v3254_v18 = vadd.f32 %v3252_v5, %v3089_v59 }
 0x70f   : > { %v3393_v58 = vpop.f32.mrb[8].mxu1 }
 0x710   : > { %v3395_v46 = vpop.f32.mrb[9].mxu1 }
 0x711   : > { %v3400_v37 = vcombine.low %v3393_v58, %v3395_v46 }
 0x713   : > { %v3407_v41 = vrot.slane %v3400_v37, %v6843_v3 }
 0x715   : > { %v3414_v39 = vrot.slane %v3407_v41, %v6843_v3 }
 0x717   : > { %v3416_v9 = vadd.f32 %v3414_v39, %v3254_v18 }
 0x74d   : > { %v3558_v7 = vpop.f32.mrb[10].mxu1 }
 0x74e   : > { %v3560_v13 = vpop.f32.mrb[11].mxu1 }
 0x74f   : > { %v3565_v1 = vcombine.low %v3558_v7, %v3560_v13 }
 0x751   : > { %v3572_v14 = vrot.slane %v3565_v1, %v6843_v3 }
 0x753   : > { %v3579_v33 = vrot.slane %v3572_v14, %v6843_v3 }
 0x755   : > { %v3581_v8 = vadd.f32 %v3579_v33, %v3416_v9 }
 0x757   : > { %3586 = vst.msk [vmem:[%s557_s11] sm:$0x3] %vm3584_vm15, %v3581_v8 }
 0x758 PF: > { %s23_s17 = sadd.s32 1, %s4999_s17   ;;  %s7060_s13 = smov %s4991_s15 }
 0x759   : > { %p20_p8 = scmp.ge.s32.totalorder %s23_s17, 6   ;;  %s7061_s14 = smov %s4995_s16 }
 0x75a   : > { %s7062_s15 = smov %s7065_s25  ;;  %s7063_s16 = smov %s7069_s29 }
 0x75b   :  { %22 = sbr.rel (!%p20_p8) target bundleno = 9 (0x9), region = 127 }
 0x762   :  { %3614 = vsyncpa [#allocation3], 1 }
 0x763   :  { %3616 = vsyncpa [#allocation3 + $0x1], 1 }
 0x764   :  { %3617 = vsyncpa [#allocation5], 1 }
 0x765   :  { %3618 = vsyncpa [#allocation8], 1 }

</bundles_post_ra>
